<compile_context>
chip_gen: v7x
topology: tpu7x:2x2x1
jax: 0.10.0
libtpu: 0.0.40
codegen_flags: <defaults>
</compile_context>

<pallas_src>
import functools

import jax
import jax.numpy as jnp
from jax.experimental import pallas as pl
from jax.experimental.pallas import tpu as pltpu

# ---------------- config (small synthetic BERT + CNN head) ----------------
VOCAB = 100
MAX_POS = 64
TYPE_VOCAB = 2
HIDDEN = 32
NUM_HEADS = 4
HEAD_DIM = HIDDEN // NUM_HEADS
INTERMEDIATE = 64
NUM_LAYERS = 2
NUM_FILTERS = 8
FILTER_SIZES = (2, 3, 4)
NUM_CLASSES = 5
BATCH = 2
SEQ = 16
LN_EPS = 1e-12

_VMEM = pl.BlockSpec(memory_space=pltpu.MemorySpace.VMEM)


# --------------------------- shared math helpers -----------------------------
def _layernorm(x, g, b):
    mu = jnp.mean(x, axis=-1, keepdims=True)
    var = jnp.mean(jnp.square(x - mu), axis=-1, keepdims=True)
    return (x - mu) * jax.lax.rsqrt(var + LN_EPS) * g + b


def _gelu(x):
    # TODO(synk): tanh-approx GELU; reference BERT uses erf-based gelu (~1e-3 diff).
    return 0.5 * x * (1.0 + jnp.tanh(0.7978845608028654 * (x + 0.044715 * x * x * x)))


# -------------------- single fused forward kernel ---------------------------
def _forward_kernel(emb_ref, bias_ref, eg_ref, eb_ref,
                    wq_ref, bq_ref, wk_ref, bk_ref, wv_ref, bv_ref,
                    wo_ref, bo_ref, ln1g_ref, ln1b_ref,
                    w1_ref, b1_ref, w2_ref, b2_ref, ln2g_ref, ln2b_ref,
                    *tail, num_layers, nheads, batch, seq, hdim, filter_sizes):
    n_f = len(filter_sizes)
    conv_refs = tail[:2 * n_f]
    fcw_ref = tail[2 * n_f]
    fcb_ref = tail[2 * n_f + 1]
    o_ref = tail[2 * n_f + 2]

    # ---- embeddings -> LayerNorm -------------------------------------------
    x = _layernorm(emb_ref[...], eg_ref[...], eb_ref[...])            # [B*S, H]
    bias_full = bias_ref[...]                                         # [B, S, S], built once outside

    # ---- BERT encoder layers (statically unrolled) --------------------------
    for layer in range(num_layers):
        attn = None
        for h in range(nheads):
            # per-head projections: weights pre-split per head -> no lane-offset
            # slicing of activations.  1/sqrt(Dh) already folded into WQ/BQ.
            q = (jnp.dot(x, wq_ref[layer, h], preferred_element_type=jnp.float32)
                 + bq_ref[layer, h]).reshape(batch, seq, hdim)
            k = (jnp.dot(x, wk_ref[layer, h], preferred_element_type=jnp.float32)
                 + bk_ref[layer, h]).reshape(batch, seq, hdim)
            v = (jnp.dot(x, wv_ref[layer, h], preferred_element_type=jnp.float32)
                 + bv_ref[layer, h]).reshape(batch, seq, hdim)
            s = jnp.einsum('bqd,bkd->bqk', q, k,
                           preferred_element_type=jnp.float32) + bias_full
            m = jnp.max(s, axis=-1, keepdims=True)
            p = jnp.exp(s - m)
            p = p * pl.reciprocal(jnp.sum(p, axis=-1, keepdims=True), approx=True)
            ctx = jnp.einsum('bqk,bkd->bqd', p, v,
                             preferred_element_type=jnp.float32)      # [B, S, Dh]
            # fold output projection per head (no head/batch concatenation)
            contrib = jnp.dot(ctx.reshape(batch * seq, hdim), wo_ref[layer, h],
                              preferred_element_type=jnp.float32)     # [B*S, H]
            attn = contrib if attn is None else attn + contrib

        x1 = _layernorm(attn + bo_ref[layer] + x, ln1g_ref[layer], ln1b_ref[layer])
        ff = _gelu(jnp.dot(x1, w1_ref[layer], preferred_element_type=jnp.float32)
                   + b1_ref[layer])
        ff = jnp.dot(ff, w2_ref[layer], preferred_element_type=jnp.float32) + b2_ref[layer]
        x = _layernorm(ff + x1, ln2g_ref[layer], ln2b_ref[layer])

    # ---- TextCNN head: convs as shifted matmuls + ReLU + max-pool + FC ------
    # TODO(synk): nn.Dropout omitted (inference/identity semantics).
    logits = None
    for idx, ksz in enumerate(filter_sizes):
        cw_ref = conv_refs[2 * idx]                                    # [ksz, H, F]
        cb_ref = conv_refs[2 * idx + 1]                                # [1, F]
        out_len = seq - ksz + 1
        acc = None
        for i in range(ksz):
            part = jnp.dot(x, cw_ref[i], preferred_element_type=jnp.float32)  # [B*S, F]
            part = part.reshape(batch, seq, part.shape[-1])[:, i:i + out_len, :]
            acc = part if acc is None else acc + part
        y = jnp.maximum(acc + cb_ref[...], 0.0)                        # [B, L, F]
        pooled = jnp.max(y, axis=1)                                    # [B, F] max_pool1d
        # fold final FC per filter size (fc weight pre-split) -> no feature concat
        contrib = jnp.dot(pooled, fcw_ref[idx], preferred_element_type=jnp.float32)
        logits = contrib if logits is None else logits + contrib
    o_ref[...] = (logits + fcb_ref[...]).astype(o_ref.dtype)


# --------------------------- model (glue in JAX) ----------------------------
def model_forward(kp, context, mask):
    """context: int32 [B, S] token ids; mask: float32 [B, S] attention mask."""
    B, S = context.shape
    # embedding lookup (gather) stays in XLA
    emb = (kp["word_emb"][context]
           + kp["pos_emb"][:S][None, :, :]
           + kp["type_emb"][0][None, None, :])                         # [B, S, H]
    emb2 = emb.reshape(B * S, HIDDEN)
    # additive attention-mask bias, computed & broadcast once per forward (2 KiB)
    bias_full = jnp.broadcast_to(((1.0 - mask) * (-1e9))[:, None, :], (B, S, S))

    args = [emb2, bias_full, kp["emb_ln_g"], kp["emb_ln_b"],
            kp["WQ"], kp["BQ"], kp["WK"], kp["BK"], kp["WV"], kp["BV"],
            kp["WO"], kp["BO"], kp["LN1G"], kp["LN1B"],
            kp["W1"], kp["B1"], kp["W2"], kp["B2"], kp["LN2G"], kp["LN2B"]]
    for cw, cb in kp["convs"]:
        args += [cw, cb]
    args += [kp["FCW"], kp["FCB"]]

    kern = functools.partial(_forward_kernel, num_layers=NUM_LAYERS,
                             nheads=NUM_HEADS, batch=B, seq=S, hdim=HEAD_DIM,
                             filter_sizes=FILTER_SIZES)
    return pl.pallas_call(
        kern,
        out_shape=jax.ShapeDtypeStruct((B, NUM_CLASSES), jnp.float32),
        in_specs=[_VMEM] * len(args),
        out_specs=_VMEM,
    )(*args)


# ------------------------- deterministic raw params -------------------------
def init_params(key):
    def nrm(k, shape, scale=0.02):
        return scale * jax.random.normal(k, shape, dtype=jnp.float32)

    keys = iter(jax.random.split(key, 64))
    params = {
        "word_emb": nrm(next(keys), (VOCAB, HIDDEN)),
        "pos_emb": nrm(next(keys), (MAX_POS, HIDDEN)),
        "type_emb": nrm(next(keys), (TYPE_VOCAB, HIDDEN)),
        "emb_ln_g": jnp.ones((1, HIDDEN), jnp.float32),
        "emb_ln_b": jnp.zeros((1, HIDDEN), jnp.float32),
        "layers": [],
        "convs": [],
    }
    for _ in range(NUM_LAYERS):
        params["layers"].append({
            "wq": nrm(next(keys), (HIDDEN, HIDDEN)), "bq": jnp.zeros((1, HIDDEN), jnp.float32),
            "wk": nrm(next(keys), (HIDDEN, HIDDEN)), "bk": jnp.zeros((1, HIDDEN), jnp.float32),
            "wv": nrm(next(keys), (HIDDEN, HIDDEN)), "bv": jnp.zeros((1, HIDDEN), jnp.float32),
            "wo": nrm(next(keys), (HIDDEN, HIDDEN)), "bo": jnp.zeros((1, HIDDEN), jnp.float32),
            "ln1_g": jnp.ones((1, HIDDEN), jnp.float32), "ln1_b": jnp.zeros((1, HIDDEN), jnp.float32),
            "w1": nrm(next(keys), (HIDDEN, INTERMEDIATE)), "b1": jnp.zeros((1, INTERMEDIATE), jnp.float32),
            "w2": nrm(next(keys), (INTERMEDIATE, HIDDEN)), "b2": jnp.zeros((1, HIDDEN), jnp.float32),
            "ln2_g": jnp.ones((1, HIDDEN), jnp.float32), "ln2_b": jnp.zeros((1, HIDDEN), jnp.float32),
        })
    for k in FILTER_SIZES:
        # conv weight layout: [k*H, F], rows = row-major flatten of (k, H),
        # matching torch Conv2d weight [F, 1, k, H].reshape(F, k*H).T
        params["convs"].append((nrm(next(keys), (k * HIDDEN, NUM_FILTERS)),
                                jnp.zeros((1, NUM_FILTERS), jnp.float32)))
    params["fc_w"] = nrm(next(keys), (NUM_FILTERS * len(FILTER_SIZES), NUM_CLASSES))
    params["fc_b"] = jnp.zeros((1, NUM_CLASSES), jnp.float32)
    return params


# ------------- one-time weight re-layout for the kernel (not under jit) -----
def prepare_kernel_params(raw):
    scale = 1.0 / (HEAD_DIM ** 0.5)

    def per_head_cols(w):                     # [H, H] -> [NH, H, Dh]
        return w.reshape(HIDDEN, NUM_HEADS, HEAD_DIM).transpose(1, 0, 2)

    def per_head_bias(b):                     # [1, H] -> [NH, 1, Dh]
        return b.reshape(NUM_HEADS, 1, HEAD_DIM)

    def per_head_rows(w):                     # [H, H] -> [NH, Dh, H]
        return w.reshape(NUM_HEADS, HEAD_DIM, HIDDEN)

    def stack(fn):
        return jnp.stack([fn(p) for p in raw["layers"]], axis=0)

    return {
        "word_emb": raw["word_emb"], "pos_emb": raw["pos_emb"], "type_emb": raw["type_emb"],
        "emb_ln_g": raw["emb_ln_g"], "emb_ln_b": raw["emb_ln_b"],
        "WQ": stack(lambda p: per_head_cols(p["wq"]) * scale),   # 1/sqrt(Dh) folded in
        "BQ": stack(lambda p: per_head_bias(p["bq"]) * scale),
        "WK": stack(lambda p: per_head_cols(p["wk"])),
        "BK": stack(lambda p: per_head_bias(p["bk"])),
        "WV": stack(lambda p: per_head_cols(p["wv"])),
        "BV": stack(lambda p: per_head_bias(p["bv"])),
        "WO": stack(lambda p: per_head_rows(p["wo"])),
        "BO": stack(lambda p: p["bo"]),
        "LN1G": stack(lambda p: p["ln1_g"]), "LN1B": stack(lambda p: p["ln1_b"]),
        "W1": stack(lambda p: p["w1"]), "B1": stack(lambda p: p["b1"]),
        "W2": stack(lambda p: p["w2"]), "B2": stack(lambda p: p["b2"]),
        "LN2G": stack(lambda p: p["ln2_g"]), "LN2B": stack(lambda p: p["ln2_b"]),
        "convs": [(cw.reshape(k, HIDDEN, NUM_FILTERS), cb)
                  for (cw, cb), k in zip(raw["convs"], FILTER_SIZES)],
        "FCW": raw["fc_w"].reshape(len(FILTER_SIZES), NUM_FILTERS, NUM_CLASSES),
        "FCB": raw["fc_b"],
    }


# -------------------- pure-JAX reference (correctness check) ----------------
def reference_forward(raw, context, mask):
    B, S = context.shape
    emb = (raw["word_emb"][context] + raw["pos_emb"][:S][None, :, :]
           + raw["type_emb"][0][None, None, :])
    x = _layernorm(emb, raw["emb_ln_g"], raw["emb_ln_b"])               # [B, S, H]
    bias = ((1.0 - mask) * (-1e9))[:, None, None, :]                    # [B, 1, 1, S]
    for p in raw["layers"]:
        def heads(t):
            return t.reshape(B, S, NUM_HEADS, HEAD_DIM).transpose(0, 2, 1, 3)
        q = heads(x @ p["wq"] + p["bq"])
        k = heads(x @ p["wk"] + p["bk"])
        v = heads(x @ p["wv"] + p["bv"])
        s = jnp.einsum('bhqd,bhkd->bhqk', q, k) / (HEAD_DIM ** 0.5) + bias
        pr = jax.nn.softmax(s, axis=-1)
        ctx = jnp.einsum('bhqk,bhkd->bhqd', pr, v).transpose(0, 2, 1, 3).reshape(B, S, HIDDEN)
        attn = ctx @ p["wo"] + p["bo"]
        x1 = _layernorm(attn + x, p["ln1_g"], p["ln1_b"])
        ff = _gelu(x1 @ p["w1"] + p["b1"]) @ p["w2"] + p["b2"]
        x = _layernorm(ff + x1, p["ln2_g"], p["ln2_b"])
    feats = []
    for (cw, cb), ksz in zip(raw["convs"], FILTER_SIZES):
        L = S - ksz + 1
        win = jnp.concatenate([x[:, i:i + L, :] for i in range(ksz)], axis=-1)  # [B, L, k*H]
        y = jnp.maximum(win @ cw + cb, 0.0)
        feats.append(jnp.max(y, axis=1))
    pooled = jnp.concatenate(feats, axis=-1)
    return pooled @ raw["fc_w"] + raw["fc_b"]


if __name__ == "__main__":
    key = jax.random.PRNGKey(0)
    pkey, ckey = jax.random.split(key)
    raw = init_params(pkey)
    kp = prepare_kernel_params(raw)

    # x = (context, seq_len, mask) in the PyTorch module; we build context & mask.
    context = jax.random.randint(ckey, (BATCH, SEQ), 0, VOCAB, dtype=jnp.int32)
    lengths = jnp.array([[SEQ], [12]], dtype=jnp.int32)  # second sample padded
    mask = (jnp.arange(SEQ)[None, :] < lengths).astype(jnp.float32)

    logits = jax.jit(model_forward)(kp, context, mask)
    logits = jax.block_until_ready(logits)

    ref = reference_forward(raw, context, mask)
    assert logits.shape == (BATCH, NUM_CLASSES)
    assert bool(jnp.all(jnp.isfinite(logits)))
    assert bool(jnp.allclose(logits, ref, atol=5e-3, rtol=5e-2)), (
        "max abs diff = %g" % float(jnp.max(jnp.abs(logits - ref))))
    print("KERNEL_OK")
</pallas_src>

<mosaic_0001>
module attributes {stable_mosaic.version = 11 : i64} {
  func.func @_forward_kernel(%arg0: memref<32x32xf32, #tpu.memory_space<vmem>>, %arg1: memref<2x16x16xf32, #tpu.memory_space<vmem>>, %arg2: memref<1x32xf32, #tpu.memory_space<vmem>>, %arg3: memref<1x32xf32, #tpu.memory_space<vmem>>, %arg4: memref<2x4x32x8xf32, #tpu.memory_space<vmem>>, %arg5: memref<2x4x1x8xf32, #tpu.memory_space<vmem>>, %arg6: memref<2x4x32x8xf32, #tpu.memory_space<vmem>>, %arg7: memref<2x4x1x8xf32, #tpu.memory_space<vmem>>, %arg8: memref<2x4x32x8xf32, #tpu.memory_space<vmem>>, %arg9: memref<2x4x1x8xf32, #tpu.memory_space<vmem>>, %arg10: memref<2x4x8x32xf32, #tpu.memory_space<vmem>>, %arg11: memref<2x1x32xf32, #tpu.memory_space<vmem>>, %arg12: memref<2x1x32xf32, #tpu.memory_space<vmem>>, %arg13: memref<2x1x32xf32, #tpu.memory_space<vmem>>, %arg14: memref<2x32x64xf32, #tpu.memory_space<vmem>>, %arg15: memref<2x1x64xf32, #tpu.memory_space<vmem>>, %arg16: memref<2x64x32xf32, #tpu.memory_space<vmem>>, %arg17: memref<2x1x32xf32, #tpu.memory_space<vmem>>, %arg18: memref<2x1x32xf32, #tpu.memory_space<vmem>>, %arg19: memref<2x1x32xf32, #tpu.memory_space<vmem>>, %arg20: memref<2x32x8xf32, #tpu.memory_space<vmem>>, %arg21: memref<1x8xf32, #tpu.memory_space<vmem>>, %arg22: memref<3x32x8xf32, #tpu.memory_space<vmem>>, %arg23: memref<1x8xf32, #tpu.memory_space<vmem>>, %arg24: memref<4x32x8xf32, #tpu.memory_space<vmem>>, %arg25: memref<1x8xf32, #tpu.memory_space<vmem>>, %arg26: memref<3x8x5xf32, #tpu.memory_space<vmem>>, %arg27: memref<1x5xf32, #tpu.memory_space<vmem>>, %arg28: memref<2x5xf32, #tpu.memory_space<vmem>>) attributes {dimension_semantics = [], scalar_prefetch = 0 : i64, scratch_operands = 0 : i64, tpu.core_type = #tpu.core_type<tc>} {
    %c0 = arith.constant 0 : index
    %c0_0 = arith.constant 0 : index
    %0 = vector.load %arg0[%c0, %c0_0] : memref<32x32xf32, #tpu.memory_space<vmem>>, vector<32x32xf32>
    %c0_1 = arith.constant 0 : index
    %c0_2 = arith.constant 0 : index
    %1 = vector.load %arg2[%c0_1, %c0_2] : memref<1x32xf32, #tpu.memory_space<vmem>>, vector<1x32xf32>
    %c0_3 = arith.constant 0 : index
    %c0_4 = arith.constant 0 : index
    %2 = vector.load %arg3[%c0_3, %c0_4] : memref<1x32xf32, #tpu.memory_space<vmem>>, vector<1x32xf32>
    %cst = arith.constant dense<0.000000e+00> : vector<32xf32>
    %3 = vector.multi_reduction <add>, %0, %cst [1] : vector<32x32xf32> to vector<32xf32>
    %4 = vector.shape_cast %3 : vector<32xf32> to vector<32x1xf32>
    %cst_5 = arith.constant 3.200000e+01 : f32
    %5 = vector.broadcast %cst_5 : f32 to vector<32x1xf32>
    %6 = arith.divf %4, %5 : vector<32x1xf32>
    %7 = vector.broadcast %6 : vector<32x1xf32> to vector<32x32xf32>
    %8 = arith.subf %0, %7 : vector<32x32xf32>
    %9 = arith.mulf %8, %8 : vector<32x32xf32>
    %cst_6 = arith.constant dense<0.000000e+00> : vector<32xf32>
    %10 = vector.multi_reduction <add>, %9, %cst_6 [1] : vector<32x32xf32> to vector<32xf32>
    %11 = vector.shape_cast %10 : vector<32xf32> to vector<32x1xf32>
    %cst_7 = arith.constant 3.200000e+01 : f32
    %12 = vector.broadcast %cst_7 : f32 to vector<32x1xf32>
    %13 = arith.divf %11, %12 : vector<32x1xf32>
    %14 = vector.broadcast %6 : vector<32x1xf32> to vector<32x32xf32>
    %15 = arith.subf %0, %14 : vector<32x32xf32>
    %cst_8 = arith.constant 9.99999996E-13 : f32
    %16 = vector.broadcast %cst_8 : f32 to vector<32x1xf32>
    %17 = arith.addf %13, %16 : vector<32x1xf32>
    %18 = math.rsqrt %17 : vector<32x1xf32>
    %19 = vector.broadcast %18 : vector<32x1xf32> to vector<32x32xf32>
    %20 = arith.mulf %15, %19 : vector<32x32xf32>
    %21 = vector.broadcast %1 : vector<1x32xf32> to vector<32x32xf32>
    %22 = arith.mulf %20, %21 : vector<32x32xf32>
    %23 = vector.broadcast %2 : vector<1x32xf32> to vector<32x32xf32>
    %24 = arith.addf %22, %23 : vector<32x32xf32>
    %c0_9 = arith.constant 0 : index
    %c0_10 = arith.constant 0 : index
    %c0_11 = arith.constant 0 : index
    %25 = vector.load %arg1[%c0_9, %c0_10, %c0_11] : memref<2x16x16xf32, #tpu.memory_space<vmem>>, vector<2x16x16xf32>
    %c0_12 = arith.constant 0 : index
    %c0_13 = arith.constant 0 : index
    %c0_14 = arith.constant 0 : index
    %c0_15 = arith.constant 0 : index
    %26 = vector.load %arg4[%c0_12, %c0_13, %c0_14, %c0_15] : memref<2x4x32x8xf32, #tpu.memory_space<vmem>>, vector<1x1x32x8xf32>
    %27 = vector.shape_cast %26 : vector<1x1x32x8xf32> to vector<32x8xf32>
    %cst_16 = arith.constant dense<0.000000e+00> : vector<32x8xf32>
    %28 = tpu.matmul %24, %27, %cst_16 {dimension_numbers = #tpu.dot_dimension_numbers<[1], [0], [0], [1], [0, 0, 1, 1], [], []>} : vector<32x32xf32>, vector<32x8xf32>, vector<32x8xf32> -> vector<32x8xf32>
    %c0_17 = arith.constant 0 : index
    %c0_18 = arith.constant 0 : index
    %c0_19 = arith.constant 0 : index
    %c0_20 = arith.constant 0 : index
    %29 = vector.load %arg5[%c0_17, %c0_18, %c0_19, %c0_20] : memref<2x4x1x8xf32, #tpu.memory_space<vmem>>, vector<1x1x1x8xf32>
    %30 = vector.shape_cast %29 : vector<1x1x1x8xf32> to vector<1x8xf32>
    %31 = vector.broadcast %30 : vector<1x8xf32> to vector<32x8xf32>
    %32 = arith.addf %28, %31 : vector<32x8xf32>
    %33 = vector.shape_cast %32 : vector<32x8xf32> to vector<2x16x8xf32>
    %c0_21 = arith.constant 0 : index
    %c0_22 = arith.constant 0 : index
    %c0_23 = arith.constant 0 : index
    %c0_24 = arith.constant 0 : index
    %34 = vector.load %arg6[%c0_21, %c0_22, %c0_23, %c0_24] : memref<2x4x32x8xf32, #tpu.memory_space<vmem>>, vector<1x1x32x8xf32>
    %35 = vector.shape_cast %34 : vector<1x1x32x8xf32> to vector<32x8xf32>
    %cst_25 = arith.constant dense<0.000000e+00> : vector<32x8xf32>
    %36 = tpu.matmul %24, %35, %cst_25 {dimension_numbers = #tpu.dot_dimension_numbers<[1], [0], [0], [1], [0, 0, 1, 1], [], []>} : vector<32x32xf32>, vector<32x8xf32>, vector<32x8xf32> -> vector<32x8xf32>
    %c0_26 = arith.constant 0 : index
    %c0_27 = arith.constant 0 : index
    %c0_28 = arith.constant 0 : index
    %c0_29 = arith.constant 0 : index
    %37 = vector.load %arg7[%c0_26, %c0_27, %c0_28, %c0_29] : memref<2x4x1x8xf32, #tpu.memory_space<vmem>>, vector<1x1x1x8xf32>
    %38 = vector.shape_cast %37 : vector<1x1x1x8xf32> to vector<1x8xf32>
    %39 = vector.broadcast %38 : vector<1x8xf32> to vector<32x8xf32>
    %40 = arith.addf %36, %39 : vector<32x8xf32>
    %41 = vector.shape_cast %40 : vector<32x8xf32> to vector<2x16x8xf32>
    %c0_30 = arith.constant 0 : index
    %c0_31 = arith.constant 0 : index
    %c0_32 = arith.constant 0 : index
    %c0_33 = arith.constant 0 : index
    %42 = vector.load %arg8[%c0_30, %c0_31, %c0_32, %c0_33] : memref<2x4x32x8xf32, #tpu.memory_space<vmem>>, vector<1x1x32x8xf32>
    %43 = vector.shape_cast %42 : vector<1x1x32x8xf32> to vector<32x8xf32>
    %cst_34 = arith.constant dense<0.000000e+00> : vector<32x8xf32>
    %44 = tpu.matmul %24, %43, %cst_34 {dimension_numbers = #tpu.dot_dimension_numbers<[1], [0], [0], [1], [0, 0, 1, 1], [], []>} : vector<32x32xf32>, vector<32x8xf32>, vector<32x8xf32> -> vector<32x8xf32>
    %c0_35 = arith.constant 0 : index
    %c0_36 = arith.constant 0 : index
    %c0_37 = arith.constant 0 : index
    %c0_38 = arith.constant 0 : index
    %45 = vector.load %arg9[%c0_35, %c0_36, %c0_37, %c0_38] : memref<2x4x1x8xf32, #tpu.memory_space<vmem>>, vector<1x1x1x8xf32>
    %46 = vector.shape_cast %45 : vector<1x1x1x8xf32> to vector<1x8xf32>
    %47 = vector.broadcast %46 : vector<1x8xf32> to vector<32x8xf32>
    %48 = arith.addf %44, %47 : vector<32x8xf32>
    %49 = vector.shape_cast %48 : vector<32x8xf32> to vector<2x16x8xf32>
    "tpu.trace_start"() <{level = 10 : i32, message = "bqd,bkd->bqk"}> : () -> ()
    %cst_39 = arith.constant dense<0.000000e+00> : vector<2x16x16xf32>
    %50 = tpu.matmul %33, %41, %cst_39 {dimension_numbers = #tpu.dot_dimension_numbers<[2], [2], [1], [1], [0, 0, 0, 1, 1, 1], [0], [0]>} : vector<2x16x8xf32>, vector<2x16x8xf32>, vector<2x16x16xf32> -> vector<2x16x16xf32>
    "tpu.trace_stop"() : () -> ()
    %51 = arith.addf %50, %25 : vector<2x16x16xf32>
    %cst_40 = arith.constant dense<0xFF800000> : vector<2x16xf32>
    %52 = vector.multi_reduction <maximumf>, %51, %cst_40 [2] : vector<2x16x16xf32> to vector<2x16xf32>
    %53 = vector.shape_cast %52 : vector<2x16xf32> to vector<2x16x1xf32>
    %54 = vector.broadcast %53 : vector<2x16x1xf32> to vector<2x16x16xf32>
    %55 = arith.subf %51, %54 : vector<2x16x16xf32>
    %56 = math.exp %55 : vector<2x16x16xf32>
    %cst_41 = arith.constant dense<0.000000e+00> : vector<2x16xf32>
    %57 = vector.multi_reduction <add>, %56, %cst_41 [2] : vector<2x16x16xf32> to vector<2x16xf32>
    %58 = vector.shape_cast %57 : vector<2x16xf32> to vector<2x16x1xf32>
    %59 = tpu.reciprocal %58 {approx = true} : vector<2x16x1xf32> -> vector<2x16x1xf32>
    %60 = vector.broadcast %59 : vector<2x16x1xf32> to vector<2x16x16xf32>
    %61 = arith.mulf %56, %60 : vector<2x16x16xf32>
    "tpu.trace_start"() <{level = 10 : i32, message = "bqk,bkd->bqd"}> : () -> ()
    %cst_42 = arith.constant dense<0.000000e+00> : vector<2x16x8xf32>
    %62 = tpu.matmul %61, %49, %cst_42 {dimension_numbers = #tpu.dot_dimension_numbers<[2], [1], [1], [2], [0, 0, 0, 1, 1, 2], [0], [0]>} : vector<2x16x16xf32>, vector<2x16x8xf32>, vector<2x16x8xf32> -> vector<2x16x8xf32>
    "tpu.trace_stop"() : () -> ()
    %63 = vector.shape_cast %62 : vector<2x16x8xf32> to vector<32x8xf32>
    %c0_43 = arith.constant 0 : index
    %c0_44 = arith.constant 0 : index
    %c0_45 = arith.constant 0 : index
    %c0_46 = arith.constant 0 : index
    %64 = vector.load %arg10[%c0_43, %c0_44, %c0_45, %c0_46] : memref<2x4x8x32xf32, #tpu.memory_space<vmem>>, vector<1x1x8x32xf32>
    %65 = vector.shape_cast %64 : vector<1x1x8x32xf32> to vector<8x32xf32>
    %cst_47 = arith.constant dense<0.000000e+00> : vector<32x32xf32>
    %66 = tpu.matmul %63, %65, %cst_47 {dimension_numbers = #tpu.dot_dimension_numbers<[1], [0], [0], [1], [0, 0, 1, 1], [], []>} : vector<32x8xf32>, vector<8x32xf32>, vector<32x32xf32> -> vector<32x32xf32>
    %c0_48 = arith.constant 0 : index
    %c1 = arith.constant 1 : index
    %c0_49 = arith.constant 0 : index
    %c0_50 = arith.constant 0 : index
    %67 = vector.load %arg4[%c0_48, %c1, %c0_49, %c0_50] : memref<2x4x32x8xf32, #tpu.memory_space<vmem>>, vector<1x1x32x8xf32>
    %68 = vector.shape_cast %67 : vector<1x1x32x8xf32> to vector<32x8xf32>
    %cst_51 = arith.constant dense<0.000000e+00> : vector<32x8xf32>
    %69 = tpu.matmul %24, %68, %cst_51 {dimension_numbers = #tpu.dot_dimension_numbers<[1], [0], [0], [1], [0, 0, 1, 1], [], []>} : vector<32x32xf32>, vector<32x8xf32>, vector<32x8xf32> -> vector<32x8xf32>
    %c0_52 = arith.constant 0 : index
    %c1_53 = arith.constant 1 : index
    %c0_54 = arith.constant 0 : index
    %c0_55 = arith.constant 0 : index
    %70 = vector.load %arg5[%c0_52, %c1_53, %c0_54, %c0_55] : memref<2x4x1x8xf32, #tpu.memory_space<vmem>>, vector<1x1x1x8xf32>
    %71 = vector.shape_cast %70 : vector<1x1x1x8xf32> to vector<1x8xf32>
    %72 = vector.broadcast %71 : vector<1x8xf32> to vector<32x8xf32>
    %73 = arith.addf %69, %72 : vector<32x8xf32>
    %74 = vector.shape_cast %73 : vector<32x8xf32> to vector<2x16x8xf32>
    %c0_56 = arith.constant 0 : index
    %c1_57 = arith.constant 1 : index
    %c0_58 = arith.constant 0 : index
    %c0_59 = arith.constant 0 : index
    %75 = vector.load %arg6[%c0_56, %c1_57, %c0_58, %c0_59] : memref<2x4x32x8xf32, #tpu.memory_space<vmem>>, vector<1x1x32x8xf32>
    %76 = vector.shape_cast %75 : vector<1x1x32x8xf32> to vector<32x8xf32>
    %cst_60 = arith.constant dense<0.000000e+00> : vector<32x8xf32>
    %77 = tpu.matmul %24, %76, %cst_60 {dimension_numbers = #tpu.dot_dimension_numbers<[1], [0], [0], [1], [0, 0, 1, 1], [], []>} : vector<32x32xf32>, vector<32x8xf32>, vector<32x8xf32> -> vector<32x8xf32>
    %c0_61 = arith.constant 0 : index
    %c1_62 = arith.constant 1 : index
    %c0_63 = arith.constant 0 : index
    %c0_64 = arith.constant 0 : index
    %78 = vector.load %arg7[%c0_61, %c1_62, %c0_63, %c0_64] : memref<2x4x1x8xf32, #tpu.memory_space<vmem>>, vector<1x1x1x8xf32>
    %79 = vector.shape_cast %78 : vector<1x1x1x8xf32> to vector<1x8xf32>
    %80 = vector.broadcast %79 : vector<1x8xf32> to vector<32x8xf32>
    %81 = arith.addf %77, %80 : vector<32x8xf32>
    %82 = vector.shape_cast %81 : vector<32x8xf32> to vector<2x16x8xf32>
    %c0_65 = arith.constant 0 : index
    %c1_66 = arith.constant 1 : index
    %c0_67 = arith.constant 0 : index
    %c0_68 = arith.constant 0 : index
    %83 = vector.load %arg8[%c0_65, %c1_66, %c0_67, %c0_68] : memref<2x4x32x8xf32, #tpu.memory_space<vmem>>, vector<1x1x32x8xf32>
    %84 = vector.shape_cast %83 : vector<1x1x32x8xf32> to vector<32x8xf32>
    %cst_69 = arith.constant dense<0.000000e+00> : vector<32x8xf32>
    %85 = tpu.matmul %24, %84, %cst_69 {dimension_numbers = #tpu.dot_dimension_numbers<[1], [0], [0], [1], [0, 0, 1, 1], [], []>} : vector<32x32xf32>, vector<32x8xf32>, vector<32x8xf32> -> vector<32x8xf32>
    %c0_70 = arith.constant 0 : index
    %c1_71 = arith.constant 1 : index
    %c0_72 = arith.constant 0 : index
    %c0_73 = arith.constant 0 : index
    %86 = vector.load %arg9[%c0_70, %c1_71, %c0_72, %c0_73] : memref<2x4x1x8xf32, #tpu.memory_space<vmem>>, vector<1x1x1x8xf32>
    %87 = vector.shape_cast %86 : vector<1x1x1x8xf32> to vector<1x8xf32>
    %88 = vector.broadcast %87 : vector<1x8xf32> to vector<32x8xf32>
    %89 = arith.addf %85, %88 : vector<32x8xf32>
    %90 = vector.shape_cast %89 : vector<32x8xf32> to vector<2x16x8xf32>
    "tpu.trace_start"() <{level = 10 : i32, message = "bqd,bkd->bqk"}> : () -> ()
    %cst_74 = arith.constant dense<0.000000e+00> : vector<2x16x16xf32>
    %91 = tpu.matmul %74, %82, %cst_74 {dimension_numbers = #tpu.dot_dimension_numbers<[2], [2], [1], [1], [0, 0, 0, 1, 1, 1], [0], [0]>} : vector<2x16x8xf32>, vector<2x16x8xf32>, vector<2x16x16xf32> -> vector<2x16x16xf32>
    "tpu.trace_stop"() : () -> ()
    %92 = arith.addf %91, %25 : vector<2x16x16xf32>
    %cst_75 = arith.constant dense<0xFF800000> : vector<2x16xf32>
    %93 = vector.multi_reduction <maximumf>, %92, %cst_75 [2] : vector<2x16x16xf32> to vector<2x16xf32>
    %94 = vector.shape_cast %93 : vector<2x16xf32> to vector<2x16x1xf32>
    %95 = vector.broadcast %94 : vector<2x16x1xf32> to vector<2x16x16xf32>
    %96 = arith.subf %92, %95 : vector<2x16x16xf32>
    %97 = math.exp %96 : vector<2x16x16xf32>
    %cst_76 = arith.constant dense<0.000000e+00> : vector<2x16xf32>
    %98 = vector.multi_reduction <add>, %97, %cst_76 [2] : vector<2x16x16xf32> to vector<2x16xf32>
    %99 = vector.shape_cast %98 : vector<2x16xf32> to vector<2x16x1xf32>
    %100 = tpu.reciprocal %99 {approx = true} : vector<2x16x1xf32> -> vector<2x16x1xf32>
    %101 = vector.broadcast %100 : vector<2x16x1xf32> to vector<2x16x16xf32>
    %102 = arith.mulf %97, %101 : vector<2x16x16xf32>
    "tpu.trace_start"() <{level = 10 : i32, message = "bqk,bkd->bqd"}> : () -> ()
    %cst_77 = arith.constant dense<0.000000e+00> : vector<2x16x8xf32>
    %103 = tpu.matmul %102, %90, %cst_77 {dimension_numbers = #tpu.dot_dimension_numbers<[2], [1], [1], [2], [0, 0, 0, 1, 1, 2], [0], [0]>} : vector<2x16x16xf32>, vector<2x16x8xf32>, vector<2x16x8xf32> -> vector<2x16x8xf32>
    "tpu.trace_stop"() : () -> ()
    %104 = vector.shape_cast %103 : vector<2x16x8xf32> to vector<32x8xf32>
    %c0_78 = arith.constant 0 : index
    %c1_79 = arith.constant 1 : index
    %c0_80 = arith.constant 0 : index
    %c0_81 = arith.constant 0 : index
    %105 = vector.load %arg10[%c0_78, %c1_79, %c0_80, %c0_81] : memref<2x4x8x32xf32, #tpu.memory_space<vmem>>, vector<1x1x8x32xf32>
    %106 = vector.shape_cast %105 : vector<1x1x8x32xf32> to vector<8x32xf32>
    %cst_82 = arith.constant dense<0.000000e+00> : vector<32x32xf32>
    %107 = tpu.matmul %104, %106, %cst_82 {dimension_numbers = #tpu.dot_dimension_numbers<[1], [0], [0], [1], [0, 0, 1, 1], [], []>} : vector<32x8xf32>, vector<8x32xf32>, vector<32x32xf32> -> vector<32x32xf32>
    %108 = arith.addf %66, %107 : vector<32x32xf32>
    %c0_83 = arith.constant 0 : index
    %c2 = arith.constant 2 : index
    %c0_84 = arith.constant 0 : index
    %c0_85 = arith.constant 0 : index
    %109 = vector.load %arg4[%c0_83, %c2, %c0_84, %c0_85] : memref<2x4x32x8xf32, #tpu.memory_space<vmem>>, vector<1x1x32x8xf32>
    %110 = vector.shape_cast %109 : vector<1x1x32x8xf32> to vector<32x8xf32>
    %cst_86 = arith.constant dense<0.000000e+00> : vector<32x8xf32>
    %111 = tpu.matmul %24, %110, %cst_86 {dimension_numbers = #tpu.dot_dimension_numbers<[1], [0], [0], [1], [0, 0, 1, 1], [], []>} : vector<32x32xf32>, vector<32x8xf32>, vector<32x8xf32> -> vector<32x8xf32>
    %c0_87 = arith.constant 0 : index
    %c2_88 = arith.constant 2 : index
    %c0_89 = arith.constant 0 : index
    %c0_90 = arith.constant 0 : index
    %112 = vector.load %arg5[%c0_87, %c2_88, %c0_89, %c0_90] : memref<2x4x1x8xf32, #tpu.memory_space<vmem>>, vector<1x1x1x8xf32>
    %113 = vector.shape_cast %112 : vector<1x1x1x8xf32> to vector<1x8xf32>
    %114 = vector.broadcast %113 : vector<1x8xf32> to vector<32x8xf32>
    %115 = arith.addf %111, %114 : vector<32x8xf32>
    %116 = vector.shape_cast %115 : vector<32x8xf32> to vector<2x16x8xf32>
    %c0_91 = arith.constant 0 : index
    %c2_92 = arith.constant 2 : index
    %c0_93 = arith.constant 0 : index
    %c0_94 = arith.constant 0 : index
    %117 = vector.load %arg6[%c0_91, %c2_92, %c0_93, %c0_94] : memref<2x4x32x8xf32, #tpu.memory_space<vmem>>, vector<1x1x32x8xf32>
    %118 = vector.shape_cast %117 : vector<1x1x32x8xf32> to vector<32x8xf32>
    %cst_95 = arith.constant dense<0.000000e+00> : vector<32x8xf32>
    %119 = tpu.matmul %24, %118, %cst_95 {dimension_numbers = #tpu.dot_dimension_numbers<[1], [0], [0], [1], [0, 0, 1, 1], [], []>} : vector<32x32xf32>, vector<32x8xf32>, vector<32x8xf32> -> vector<32x8xf32>
    %c0_96 = arith.constant 0 : index
    %c2_97 = arith.constant 2 : index
    %c0_98 = arith.constant 0 : index
    %c0_99 = arith.constant 0 : index
    %120 = vector.load %arg7[%c0_96, %c2_97, %c0_98, %c0_99] : memref<2x4x1x8xf32, #tpu.memory_space<vmem>>, vector<1x1x1x8xf32>
    %121 = vector.shape_cast %120 : vector<1x1x1x8xf32> to vector<1x8xf32>
    %122 = vector.broadcast %121 : vector<1x8xf32> to vector<32x8xf32>
    %123 = arith.addf %119, %122 : vector<32x8xf32>
    %124 = vector.shape_cast %123 : vector<32x8xf32> to vector<2x16x8xf32>
    %c0_100 = arith.constant 0 : index
    %c2_101 = arith.constant 2 : index
    %c0_102 = arith.constant 0 : index
    %c0_103 = arith.constant 0 : index
    %125 = vector.load %arg8[%c0_100, %c2_101, %c0_102, %c0_103] : memref<2x4x32x8xf32, #tpu.memory_space<vmem>>, vector<1x1x32x8xf32>
    %126 = vector.shape_cast %125 : vector<1x1x32x8xf32> to vector<32x8xf32>
    %cst_104 = arith.constant dense<0.000000e+00> : vector<32x8xf32>
    %127 = tpu.matmul %24, %126, %cst_104 {dimension_numbers = #tpu.dot_dimension_numbers<[1], [0], [0], [1], [0, 0, 1, 1], [], []>} : vector<32x32xf32>, vector<32x8xf32>, vector<32x8xf32> -> vector<32x8xf32>
    %c0_105 = arith.constant 0 : index
    %c2_106 = arith.constant 2 : index
    %c0_107 = arith.constant 0 : index
    %c0_108 = arith.constant 0 : index
    %128 = vector.load %arg9[%c0_105, %c2_106, %c0_107, %c0_108] : memref<2x4x1x8xf32, #tpu.memory_space<vmem>>, vector<1x1x1x8xf32>
    %129 = vector.shape_cast %128 : vector<1x1x1x8xf32> to vector<1x8xf32>
    %130 = vector.broadcast %129 : vector<1x8xf32> to vector<32x8xf32>
    %131 = arith.addf %127, %130 : vector<32x8xf32>
    %132 = vector.shape_cast %131 : vector<32x8xf32> to vector<2x16x8xf32>
    "tpu.trace_start"() <{level = 10 : i32, message = "bqd,bkd->bqk"}> : () -> ()
    %cst_109 = arith.constant dense<0.000000e+00> : vector<2x16x16xf32>
    %133 = tpu.matmul %116, %124, %cst_109 {dimension_numbers = #tpu.dot_dimension_numbers<[2], [2], [1], [1], [0, 0, 0, 1, 1, 1], [0], [0]>} : vector<2x16x8xf32>, vector<2x16x8xf32>, vector<2x16x16xf32> -> vector<2x16x16xf32>
    "tpu.trace_stop"() : () -> ()
    %134 = arith.addf %133, %25 : vector<2x16x16xf32>
    %cst_110 = arith.constant dense<0xFF800000> : vector<2x16xf32>
    %135 = vector.multi_reduction <maximumf>, %134, %cst_110 [2] : vector<2x16x16xf32> to vector<2x16xf32>
    %136 = vector.shape_cast %135 : vector<2x16xf32> to vector<2x16x1xf32>
    %137 = vector.broadcast %136 : vector<2x16x1xf32> to vector<2x16x16xf32>
    %138 = arith.subf %134, %137 : vector<2x16x16xf32>
    %139 = math.exp %138 : vector<2x16x16xf32>
    %cst_111 = arith.constant dense<0.000000e+00> : vector<2x16xf32>
    %140 = vector.multi_reduction <add>, %139, %cst_111 [2] : vector<2x16x16xf32> to vector<2x16xf32>
    %141 = vector.shape_cast %140 : vector<2x16xf32> to vector<2x16x1xf32>
    %142 = tpu.reciprocal %141 {approx = true} : vector<2x16x1xf32> -> vector<2x16x1xf32>
    %143 = vector.broadcast %142 : vector<2x16x1xf32> to vector<2x16x16xf32>
    %144 = arith.mulf %139, %143 : vector<2x16x16xf32>
    "tpu.trace_start"() <{level = 10 : i32, message = "bqk,bkd->bqd"}> : () -> ()
    %cst_112 = arith.constant dense<0.000000e+00> : vector<2x16x8xf32>
    %145 = tpu.matmul %144, %132, %cst_112 {dimension_numbers = #tpu.dot_dimension_numbers<[2], [1], [1], [2], [0, 0, 0, 1, 1, 2], [0], [0]>} : vector<2x16x16xf32>, vector<2x16x8xf32>, vector<2x16x8xf32> -> vector<2x16x8xf32>
    "tpu.trace_stop"() : () -> ()
    %146 = vector.shape_cast %145 : vector<2x16x8xf32> to vector<32x8xf32>
    %c0_113 = arith.constant 0 : index
    %c2_114 = arith.constant 2 : index
    %c0_115 = arith.constant 0 : index
    %c0_116 = arith.constant 0 : index
    %147 = vector.load %arg10[%c0_113, %c2_114, %c0_115, %c0_116] : memref<2x4x8x32xf32, #tpu.memory_space<vmem>>, vector<1x1x8x32xf32>
    %148 = vector.shape_cast %147 : vector<1x1x8x32xf32> to vector<8x32xf32>
    %cst_117 = arith.constant dense<0.000000e+00> : vector<32x32xf32>
    %149 = tpu.matmul %146, %148, %cst_117 {dimension_numbers = #tpu.dot_dimension_numbers<[1], [0], [0], [1], [0, 0, 1, 1], [], []>} : vector<32x8xf32>, vector<8x32xf32>, vector<32x32xf32> -> vector<32x32xf32>
    %150 = arith.addf %108, %149 : vector<32x32xf32>
    %c0_118 = arith.constant 0 : index
    %c3 = arith.constant 3 : index
    %c0_119 = arith.constant 0 : index
    %c0_120 = arith.constant 0 : index
    %151 = vector.load %arg4[%c0_118, %c3, %c0_119, %c0_120] : memref<2x4x32x8xf32, #tpu.memory_space<vmem>>, vector<1x1x32x8xf32>
    %152 = vector.shape_cast %151 : vector<1x1x32x8xf32> to vector<32x8xf32>
    %cst_121 = arith.constant dense<0.000000e+00> : vector<32x8xf32>
    %153 = tpu.matmul %24, %152, %cst_121 {dimension_numbers = #tpu.dot_dimension_numbers<[1], [0], [0], [1], [0, 0, 1, 1], [], []>} : vector<32x32xf32>, vector<32x8xf32>, vector<32x8xf32> -> vector<32x8xf32>
    %c0_122 = arith.constant 0 : index
    %c3_123 = arith.constant 3 : index
    %c0_124 = arith.constant 0 : index
    %c0_125 = arith.constant 0 : index
    %154 = vector.load %arg5[%c0_122, %c3_123, %c0_124, %c0_125] : memref<2x4x1x8xf32, #tpu.memory_space<vmem>>, vector<1x1x1x8xf32>
    %155 = vector.shape_cast %154 : vector<1x1x1x8xf32> to vector<1x8xf32>
    %156 = vector.broadcast %155 : vector<1x8xf32> to vector<32x8xf32>
    %157 = arith.addf %153, %156 : vector<32x8xf32>
    %158 = vector.shape_cast %157 : vector<32x8xf32> to vector<2x16x8xf32>
    %c0_126 = arith.constant 0 : index
    %c3_127 = arith.constant 3 : index
    %c0_128 = arith.constant 0 : index
    %c0_129 = arith.constant 0 : index
    %159 = vector.load %arg6[%c0_126, %c3_127, %c0_128, %c0_129] : memref<2x4x32x8xf32, #tpu.memory_space<vmem>>, vector<1x1x32x8xf32>
    %160 = vector.shape_cast %159 : vector<1x1x32x8xf32> to vector<32x8xf32>
    %cst_130 = arith.constant dense<0.000000e+00> : vector<32x8xf32>
    %161 = tpu.matmul %24, %160, %cst_130 {dimension_numbers = #tpu.dot_dimension_numbers<[1], [0], [0], [1], [0, 0, 1, 1], [], []>} : vector<32x32xf32>, vector<32x8xf32>, vector<32x8xf32> -> vector<32x8xf32>
    %c0_131 = arith.constant 0 : index
    %c3_132 = arith.constant 3 : index
    %c0_133 = arith.constant 0 : index
    %c0_134 = arith.constant 0 : index
    %162 = vector.load %arg7[%c0_131, %c3_132, %c0_133, %c0_134] : memref<2x4x1x8xf32, #tpu.memory_space<vmem>>, vector<1x1x1x8xf32>
    %163 = vector.shape_cast %162 : vector<1x1x1x8xf32> to vector<1x8xf32>
    %164 = vector.broadcast %163 : vector<1x8xf32> to vector<32x8xf32>
    %165 = arith.addf %161, %164 : vector<32x8xf32>
    %166 = vector.shape_cast %165 : vector<32x8xf32> to vector<2x16x8xf32>
    %c0_135 = arith.constant 0 : index
    %c3_136 = arith.constant 3 : index
    %c0_137 = arith.constant 0 : index
    %c0_138 = arith.constant 0 : index
    %167 = vector.load %arg8[%c0_135, %c3_136, %c0_137, %c0_138] : memref<2x4x32x8xf32, #tpu.memory_space<vmem>>, vector<1x1x32x8xf32>
    %168 = vector.shape_cast %167 : vector<1x1x32x8xf32> to vector<32x8xf32>
    %cst_139 = arith.constant dense<0.000000e+00> : vector<32x8xf32>
    %169 = tpu.matmul %24, %168, %cst_139 {dimension_numbers = #tpu.dot_dimension_numbers<[1], [0], [0], [1], [0, 0, 1, 1], [], []>} : vector<32x32xf32>, vector<32x8xf32>, vector<32x8xf32> -> vector<32x8xf32>
    %c0_140 = arith.constant 0 : index
    %c3_141 = arith.constant 3 : index
    %c0_142 = arith.constant 0 : index
    %c0_143 = arith.constant 0 : index
    %170 = vector.load %arg9[%c0_140, %c3_141, %c0_142, %c0_143] : memref<2x4x1x8xf32, #tpu.memory_space<vmem>>, vector<1x1x1x8xf32>
    %171 = vector.shape_cast %170 : vector<1x1x1x8xf32> to vector<1x8xf32>
    %172 = vector.broadcast %171 : vector<1x8xf32> to vector<32x8xf32>
    %173 = arith.addf %169, %172 : vector<32x8xf32>
    %174 = vector.shape_cast %173 : vector<32x8xf32> to vector<2x16x8xf32>
    "tpu.trace_start"() <{level = 10 : i32, message = "bqd,bkd->bqk"}> : () -> ()
    %cst_144 = arith.constant dense<0.000000e+00> : vector<2x16x16xf32>
    %175 = tpu.matmul %158, %166, %cst_144 {dimension_numbers = #tpu.dot_dimension_numbers<[2], [2], [1], [1], [0, 0, 0, 1, 1, 1], [0], [0]>} : vector<2x16x8xf32>, vector<2x16x8xf32>, vector<2x16x16xf32> -> vector<2x16x16xf32>
    "tpu.trace_stop"() : () -> ()
    %176 = arith.addf %175, %25 : vector<2x16x16xf32>
    %cst_145 = arith.constant dense<0xFF800000> : vector<2x16xf32>
    %177 = vector.multi_reduction <maximumf>, %176, %cst_145 [2] : vector<2x16x16xf32> to vector<2x16xf32>
    %178 = vector.shape_cast %177 : vector<2x16xf32> to vector<2x16x1xf32>
    %179 = vector.broadcast %178 : vector<2x16x1xf32> to vector<2x16x16xf32>
    %180 = arith.subf %176, %179 : vector<2x16x16xf32>
    %181 = math.exp %180 : vector<2x16x16xf32>
    %cst_146 = arith.constant dense<0.000000e+00> : vector<2x16xf32>
    %182 = vector.multi_reduction <add>, %181, %cst_146 [2] : vector<2x16x16xf32> to vector<2x16xf32>
    %183 = vector.shape_cast %182 : vector<2x16xf32> to vector<2x16x1xf32>
    %184 = tpu.reciprocal %183 {approx = true} : vector<2x16x1xf32> -> vector<2x16x1xf32>
    %185 = vector.broadcast %184 : vector<2x16x1xf32> to vector<2x16x16xf32>
    %186 = arith.mulf %181, %185 : vector<2x16x16xf32>
    "tpu.trace_start"() <{level = 10 : i32, message = "bqk,bkd->bqd"}> : () -> ()
    %cst_147 = arith.constant dense<0.000000e+00> : vector<2x16x8xf32>
    %187 = tpu.matmul %186, %174, %cst_147 {dimension_numbers = #tpu.dot_dimension_numbers<[2], [1], [1], [2], [0, 0, 0, 1, 1, 2], [0], [0]>} : vector<2x16x16xf32>, vector<2x16x8xf32>, vector<2x16x8xf32> -> vector<2x16x8xf32>
    "tpu.trace_stop"() : () -> ()
    %188 = vector.shape_cast %187 : vector<2x16x8xf32> to vector<32x8xf32>
    %c0_148 = arith.constant 0 : index
    %c3_149 = arith.constant 3 : index
    %c0_150 = arith.constant 0 : index
    %c0_151 = arith.constant 0 : index
    %189 = vector.load %arg10[%c0_148, %c3_149, %c0_150, %c0_151] : memref<2x4x8x32xf32, #tpu.memory_space<vmem>>, vector<1x1x8x32xf32>
    %190 = vector.shape_cast %189 : vector<1x1x8x32xf32> to vector<8x32xf32>
    %cst_152 = arith.constant dense<0.000000e+00> : vector<32x32xf32>
    %191 = tpu.matmul %188, %190, %cst_152 {dimension_numbers = #tpu.dot_dimension_numbers<[1], [0], [0], [1], [0, 0, 1, 1], [], []>} : vector<32x8xf32>, vector<8x32xf32>, vector<32x32xf32> -> vector<32x32xf32>
    %192 = arith.addf %150, %191 : vector<32x32xf32>
    %c0_153 = arith.constant 0 : index
    %c0_154 = arith.constant 0 : index
    %c0_155 = arith.constant 0 : index
    %193 = vector.load %arg11[%c0_153, %c0_154, %c0_155] : memref<2x1x32xf32, #tpu.memory_space<vmem>>, vector<1x1x32xf32>
    %194 = vector.shape_cast %193 : vector<1x1x32xf32> to vector<1x32xf32>
    %195 = vector.broadcast %194 : vector<1x32xf32> to vector<32x32xf32>
    %196 = arith.addf %192, %195 : vector<32x32xf32>
    %197 = arith.addf %196, %24 : vector<32x32xf32>
    %c0_156 = arith.constant 0 : index
    %c0_157 = arith.constant 0 : index
    %c0_158 = arith.constant 0 : index
    %198 = vector.load %arg12[%c0_156, %c0_157, %c0_158] : memref<2x1x32xf32, #tpu.memory_space<vmem>>, vector<1x1x32xf32>
    %199 = vector.shape_cast %198 : vector<1x1x32xf32> to vector<1x32xf32>
    %c0_159 = arith.constant 0 : index
    %c0_160 = arith.constant 0 : index
    %c0_161 = arith.constant 0 : index
    %200 = vector.load %arg13[%c0_159, %c0_160, %c0_161] : memref<2x1x32xf32, #tpu.memory_space<vmem>>, vector<1x1x32xf32>
    %201 = vector.shape_cast %200 : vector<1x1x32xf32> to vector<1x32xf32>
    %cst_162 = arith.constant dense<0.000000e+00> : vector<32xf32>
    %202 = vector.multi_reduction <add>, %197, %cst_162 [1] : vector<32x32xf32> to vector<32xf32>
    %203 = vector.shape_cast %202 : vector<32xf32> to vector<32x1xf32>
    %cst_163 = arith.constant 3.200000e+01 : f32
    %204 = vector.broadcast %cst_163 : f32 to vector<32x1xf32>
    %205 = arith.divf %203, %204 : vector<32x1xf32>
    %206 = vector.broadcast %205 : vector<32x1xf32> to vector<32x32xf32>
    %207 = arith.subf %197, %206 : vector<32x32xf32>
    %208 = arith.mulf %207, %207 : vector<32x32xf32>
    %cst_164 = arith.constant dense<0.000000e+00> : vector<32xf32>
    %209 = vector.multi_reduction <add>, %208, %cst_164 [1] : vector<32x32xf32> to vector<32xf32>
    %210 = vector.shape_cast %209 : vector<32xf32> to vector<32x1xf32>
    %cst_165 = arith.constant 3.200000e+01 : f32
    %211 = vector.broadcast %cst_165 : f32 to vector<32x1xf32>
    %212 = arith.divf %210, %211 : vector<32x1xf32>
    %213 = vector.broadcast %205 : vector<32x1xf32> to vector<32x32xf32>
    %214 = arith.subf %197, %213 : vector<32x32xf32>
    %cst_166 = arith.constant 9.99999996E-13 : f32
    %215 = vector.broadcast %cst_166 : f32 to vector<32x1xf32>
    %216 = arith.addf %212, %215 : vector<32x1xf32>
    %217 = math.rsqrt %216 : vector<32x1xf32>
    %218 = vector.broadcast %217 : vector<32x1xf32> to vector<32x32xf32>
    %219 = arith.mulf %214, %218 : vector<32x32xf32>
    %220 = vector.broadcast %199 : vector<1x32xf32> to vector<32x32xf32>
    %221 = arith.mulf %219, %220 : vector<32x32xf32>
    %222 = vector.broadcast %201 : vector<1x32xf32> to vector<32x32xf32>
    %223 = arith.addf %221, %222 : vector<32x32xf32>
    %c0_167 = arith.constant 0 : index
    %c0_168 = arith.constant 0 : index
    %c0_169 = arith.constant 0 : index
    %224 = vector.load %arg14[%c0_167, %c0_168, %c0_169] : memref<2x32x64xf32, #tpu.memory_space<vmem>>, vector<1x32x64xf32>
    %225 = vector.shape_cast %224 : vector<1x32x64xf32> to vector<32x64xf32>
    %cst_170 = arith.constant dense<0.000000e+00> : vector<32x64xf32>
    %226 = tpu.matmul %223, %225, %cst_170 {dimension_numbers = #tpu.dot_dimension_numbers<[1], [0], [0], [1], [0, 0, 1, 1], [], []>} : vector<32x32xf32>, vector<32x64xf32>, vector<32x64xf32> -> vector<32x64xf32>
    %c0_171 = arith.constant 0 : index
    %c0_172 = arith.constant 0 : index
    %c0_173 = arith.constant 0 : index
    %227 = vector.load %arg15[%c0_171, %c0_172, %c0_173] : memref<2x1x64xf32, #tpu.memory_space<vmem>>, vector<1x1x64xf32>
    %228 = vector.shape_cast %227 : vector<1x1x64xf32> to vector<1x64xf32>
    %229 = vector.broadcast %228 : vector<1x64xf32> to vector<32x64xf32>
    %230 = arith.addf %226, %229 : vector<32x64xf32>
    %cst_174 = arith.constant 5.000000e-01 : f32
    %231 = vector.broadcast %cst_174 : f32 to vector<32x64xf32>
    %232 = arith.mulf %231, %230 : vector<32x64xf32>
    %cst_175 = arith.constant 4.471500e-02 : f32
    %233 = vector.broadcast %cst_175 : f32 to vector<32x64xf32>
    %234 = arith.mulf %233, %230 : vector<32x64xf32>
    %235 = arith.mulf %234, %230 : vector<32x64xf32>
    %236 = arith.mulf %235, %230 : vector<32x64xf32>
    %237 = arith.addf %230, %236 : vector<32x64xf32>
    %cst_176 = arith.constant 0.797884583 : f32
    %238 = vector.broadcast %cst_176 : f32 to vector<32x64xf32>
    %239 = arith.mulf %238, %237 : vector<32x64xf32>
    %240 = math.tanh %239 : vector<32x64xf32>
    %cst_177 = arith.constant 1.000000e+00 : f32
    %241 = vector.broadcast %cst_177 : f32 to vector<32x64xf32>
    %242 = arith.addf %241, %240 : vector<32x64xf32>
    %243 = arith.mulf %232, %242 : vector<32x64xf32>
    %c0_178 = arith.constant 0 : index
    %c0_179 = arith.constant 0 : index
    %c0_180 = arith.constant 0 : index
    %244 = vector.load %arg16[%c0_178, %c0_179, %c0_180] : memref<2x64x32xf32, #tpu.memory_space<vmem>>, vector<1x64x32xf32>
    %245 = vector.shape_cast %244 : vector<1x64x32xf32> to vector<64x32xf32>
    %cst_181 = arith.constant dense<0.000000e+00> : vector<32x32xf32>
    %246 = tpu.matmul %243, %245, %cst_181 {dimension_numbers = #tpu.dot_dimension_numbers<[1], [0], [0], [1], [0, 0, 1, 1], [], []>} : vector<32x64xf32>, vector<64x32xf32>, vector<32x32xf32> -> vector<32x32xf32>
    %c0_182 = arith.constant 0 : index
    %c0_183 = arith.constant 0 : index
    %c0_184 = arith.constant 0 : index
    %247 = vector.load %arg17[%c0_182, %c0_183, %c0_184] : memref<2x1x32xf32, #tpu.memory_space<vmem>>, vector<1x1x32xf32>
    %248 = vector.shape_cast %247 : vector<1x1x32xf32> to vector<1x32xf32>
    %249 = vector.broadcast %248 : vector<1x32xf32> to vector<32x32xf32>
    %250 = arith.addf %246, %249 : vector<32x32xf32>
    %251 = arith.addf %250, %223 : vector<32x32xf32>
    %c0_185 = arith.constant 0 : index
    %c0_186 = arith.constant 0 : index
    %c0_187 = arith.constant 0 : index
    %252 = vector.load %arg18[%c0_185, %c0_186, %c0_187] : memref<2x1x32xf32, #tpu.memory_space<vmem>>, vector<1x1x32xf32>
    %253 = vector.shape_cast %252 : vector<1x1x32xf32> to vector<1x32xf32>
    %c0_188 = arith.constant 0 : index
    %c0_189 = arith.constant 0 : index
    %c0_190 = arith.constant 0 : index
    %254 = vector.load %arg19[%c0_188, %c0_189, %c0_190] : memref<2x1x32xf32, #tpu.memory_space<vmem>>, vector<1x1x32xf32>
    %255 = vector.shape_cast %254 : vector<1x1x32xf32> to vector<1x32xf32>
    %cst_191 = arith.constant dense<0.000000e+00> : vector<32xf32>
    %256 = vector.multi_reduction <add>, %251, %cst_191 [1] : vector<32x32xf32> to vector<32xf32>
    %257 = vector.shape_cast %256 : vector<32xf32> to vector<32x1xf32>
    %cst_192 = arith.constant 3.200000e+01 : f32
    %258 = vector.broadcast %cst_192 : f32 to vector<32x1xf32>
    %259 = arith.divf %257, %258 : vector<32x1xf32>
    %260 = vector.broadcast %259 : vector<32x1xf32> to vector<32x32xf32>
    %261 = arith.subf %251, %260 : vector<32x32xf32>
    %262 = arith.mulf %261, %261 : vector<32x32xf32>
    %cst_193 = arith.constant dense<0.000000e+00> : vector<32xf32>
    %263 = vector.multi_reduction <add>, %262, %cst_193 [1] : vector<32x32xf32> to vector<32xf32>
    %264 = vector.shape_cast %263 : vector<32xf32> to vector<32x1xf32>
    %cst_194 = arith.constant 3.200000e+01 : f32
    %265 = vector.broadcast %cst_194 : f32 to vector<32x1xf32>
    %266 = arith.divf %264, %265 : vector<32x1xf32>
    %267 = vector.broadcast %259 : vector<32x1xf32> to vector<32x32xf32>
    %268 = arith.subf %251, %267 : vector<32x32xf32>
    %cst_195 = arith.constant 9.99999996E-13 : f32
    %269 = vector.broadcast %cst_195 : f32 to vector<32x1xf32>
    %270 = arith.addf %266, %269 : vector<32x1xf32>
    %271 = math.rsqrt %270 : vector<32x1xf32>
    %272 = vector.broadcast %271 : vector<32x1xf32> to vector<32x32xf32>
    %273 = arith.mulf %268, %272 : vector<32x32xf32>
    %274 = vector.broadcast %253 : vector<1x32xf32> to vector<32x32xf32>
    %275 = arith.mulf %273, %274 : vector<32x32xf32>
    %276 = vector.broadcast %255 : vector<1x32xf32> to vector<32x32xf32>
    %277 = arith.addf %275, %276 : vector<32x32xf32>
    %c1_196 = arith.constant 1 : index
    %c0_197 = arith.constant 0 : index
    %c0_198 = arith.constant 0 : index
    %c0_199 = arith.constant 0 : index
    %278 = vector.load %arg4[%c1_196, %c0_197, %c0_198, %c0_199] : memref<2x4x32x8xf32, #tpu.memory_space<vmem>>, vector<1x1x32x8xf32>
    %279 = vector.shape_cast %278 : vector<1x1x32x8xf32> to vector<32x8xf32>
    %cst_200 = arith.constant dense<0.000000e+00> : vector<32x8xf32>
    %280 = tpu.matmul %277, %279, %cst_200 {dimension_numbers = #tpu.dot_dimension_numbers<[1], [0], [0], [1], [0, 0, 1, 1], [], []>} : vector<32x32xf32>, vector<32x8xf32>, vector<32x8xf32> -> vector<32x8xf32>
    %c1_201 = arith.constant 1 : index
    %c0_202 = arith.constant 0 : index
    %c0_203 = arith.constant 0 : index
    %c0_204 = arith.constant 0 : index
    %281 = vector.load %arg5[%c1_201, %c0_202, %c0_203, %c0_204] : memref<2x4x1x8xf32, #tpu.memory_space<vmem>>, vector<1x1x1x8xf32>
    %282 = vector.shape_cast %281 : vector<1x1x1x8xf32> to vector<1x8xf32>
    %283 = vector.broadcast %282 : vector<1x8xf32> to vector<32x8xf32>
    %284 = arith.addf %280, %283 : vector<32x8xf32>
    %285 = vector.shape_cast %284 : vector<32x8xf32> to vector<2x16x8xf32>
    %c1_205 = arith.constant 1 : index
    %c0_206 = arith.constant 0 : index
    %c0_207 = arith.constant 0 : index
    %c0_208 = arith.constant 0 : index
    %286 = vector.load %arg6[%c1_205, %c0_206, %c0_207, %c0_208] : memref<2x4x32x8xf32, #tpu.memory_space<vmem>>, vector<1x1x32x8xf32>
    %287 = vector.shape_cast %286 : vector<1x1x32x8xf32> to vector<32x8xf32>
    %cst_209 = arith.constant dense<0.000000e+00> : vector<32x8xf32>
    %288 = tpu.matmul %277, %287, %cst_209 {dimension_numbers = #tpu.dot_dimension_numbers<[1], [0], [0], [1], [0, 0, 1, 1], [], []>} : vector<32x32xf32>, vector<32x8xf32>, vector<32x8xf32> -> vector<32x8xf32>
    %c1_210 = arith.constant 1 : index
    %c0_211 = arith.constant 0 : index
    %c0_212 = arith.constant 0 : index
    %c0_213 = arith.constant 0 : index
    %289 = vector.load %arg7[%c1_210, %c0_211, %c0_212, %c0_213] : memref<2x4x1x8xf32, #tpu.memory_space<vmem>>, vector<1x1x1x8xf32>
    %290 = vector.shape_cast %289 : vector<1x1x1x8xf32> to vector<1x8xf32>
    %291 = vector.broadcast %290 : vector<1x8xf32> to vector<32x8xf32>
    %292 = arith.addf %288, %291 : vector<32x8xf32>
    %293 = vector.shape_cast %292 : vector<32x8xf32> to vector<2x16x8xf32>
    %c1_214 = arith.constant 1 : index
    %c0_215 = arith.constant 0 : index
    %c0_216 = arith.constant 0 : index
    %c0_217 = arith.constant 0 : index
    %294 = vector.load %arg8[%c1_214, %c0_215, %c0_216, %c0_217] : memref<2x4x32x8xf32, #tpu.memory_space<vmem>>, vector<1x1x32x8xf32>
    %295 = vector.shape_cast %294 : vector<1x1x32x8xf32> to vector<32x8xf32>
    %cst_218 = arith.constant dense<0.000000e+00> : vector<32x8xf32>
    %296 = tpu.matmul %277, %295, %cst_218 {dimension_numbers = #tpu.dot_dimension_numbers<[1], [0], [0], [1], [0, 0, 1, 1], [], []>} : vector<32x32xf32>, vector<32x8xf32>, vector<32x8xf32> -> vector<32x8xf32>
    %c1_219 = arith.constant 1 : index
    %c0_220 = arith.constant 0 : index
    %c0_221 = arith.constant 0 : index
    %c0_222 = arith.constant 0 : index
    %297 = vector.load %arg9[%c1_219, %c0_220, %c0_221, %c0_222] : memref<2x4x1x8xf32, #tpu.memory_space<vmem>>, vector<1x1x1x8xf32>
    %298 = vector.shape_cast %297 : vector<1x1x1x8xf32> to vector<1x8xf32>
    %299 = vector.broadcast %298 : vector<1x8xf32> to vector<32x8xf32>
    %300 = arith.addf %296, %299 : vector<32x8xf32>
    %301 = vector.shape_cast %300 : vector<32x8xf32> to vector<2x16x8xf32>
    "tpu.trace_start"() <{level = 10 : i32, message = "bqd,bkd->bqk"}> : () -> ()
    %cst_223 = arith.constant dense<0.000000e+00> : vector<2x16x16xf32>
    %302 = tpu.matmul %285, %293, %cst_223 {dimension_numbers = #tpu.dot_dimension_numbers<[2], [2], [1], [1], [0, 0, 0, 1, 1, 1], [0], [0]>} : vector<2x16x8xf32>, vector<2x16x8xf32>, vector<2x16x16xf32> -> vector<2x16x16xf32>
    "tpu.trace_stop"() : () -> ()
    %303 = arith.addf %302, %25 : vector<2x16x16xf32>
    %cst_224 = arith.constant dense<0xFF800000> : vector<2x16xf32>
    %304 = vector.multi_reduction <maximumf>, %303, %cst_224 [2] : vector<2x16x16xf32> to vector<2x16xf32>
    %305 = vector.shape_cast %304 : vector<2x16xf32> to vector<2x16x1xf32>
    %306 = vector.broadcast %305 : vector<2x16x1xf32> to vector<2x16x16xf32>
    %307 = arith.subf %303, %306 : vector<2x16x16xf32>
    %308 = math.exp %307 : vector<2x16x16xf32>
    %cst_225 = arith.constant dense<0.000000e+00> : vector<2x16xf32>
    %309 = vector.multi_reduction <add>, %308, %cst_225 [2] : vector<2x16x16xf32> to vector<2x16xf32>
    %310 = vector.shape_cast %309 : vector<2x16xf32> to vector<2x16x1xf32>
    %311 = tpu.reciprocal %310 {approx = true} : vector<2x16x1xf32> -> vector<2x16x1xf32>
    %312 = vector.broadcast %311 : vector<2x16x1xf32> to vector<2x16x16xf32>
    %313 = arith.mulf %308, %312 : vector<2x16x16xf32>
    "tpu.trace_start"() <{level = 10 : i32, message = "bqk,bkd->bqd"}> : () -> ()
    %cst_226 = arith.constant dense<0.000000e+00> : vector<2x16x8xf32>
    %314 = tpu.matmul %313, %301, %cst_226 {dimension_numbers = #tpu.dot_dimension_numbers<[2], [1], [1], [2], [0, 0, 0, 1, 1, 2], [0], [0]>} : vector<2x16x16xf32>, vector<2x16x8xf32>, vector<2x16x8xf32> -> vector<2x16x8xf32>
    "tpu.trace_stop"() : () -> ()
    %315 = vector.shape_cast %314 : vector<2x16x8xf32> to vector<32x8xf32>
    %c1_227 = arith.constant 1 : index
    %c0_228 = arith.constant 0 : index
    %c0_229 = arith.constant 0 : index
    %c0_230 = arith.constant 0 : index
    %316 = vector.load %arg10[%c1_227, %c0_228, %c0_229, %c0_230] : memref<2x4x8x32xf32, #tpu.memory_space<vmem>>, vector<1x1x8x32xf32>
    %317 = vector.shape_cast %316 : vector<1x1x8x32xf32> to vector<8x32xf32>
    %cst_231 = arith.constant dense<0.000000e+00> : vector<32x32xf32>
    %318 = tpu.matmul %315, %317, %cst_231 {dimension_numbers = #tpu.dot_dimension_numbers<[1], [0], [0], [1], [0, 0, 1, 1], [], []>} : vector<32x8xf32>, vector<8x32xf32>, vector<32x32xf32> -> vector<32x32xf32>
    %c1_232 = arith.constant 1 : index
    %c1_233 = arith.constant 1 : index
    %c0_234 = arith.constant 0 : index
    %c0_235 = arith.constant 0 : index
    %319 = vector.load %arg4[%c1_232, %c1_233, %c0_234, %c0_235] : memref<2x4x32x8xf32, #tpu.memory_space<vmem>>, vector<1x1x32x8xf32>
    %320 = vector.shape_cast %319 : vector<1x1x32x8xf32> to vector<32x8xf32>
    %cst_236 = arith.constant dense<0.000000e+00> : vector<32x8xf32>
    %321 = tpu.matmul %277, %320, %cst_236 {dimension_numbers = #tpu.dot_dimension_numbers<[1], [0], [0], [1], [0, 0, 1, 1], [], []>} : vector<32x32xf32>, vector<32x8xf32>, vector<32x8xf32> -> vector<32x8xf32>
    %c1_237 = arith.constant 1 : index
    %c1_238 = arith.constant 1 : index
    %c0_239 = arith.constant 0 : index
    %c0_240 = arith.constant 0 : index
    %322 = vector.load %arg5[%c1_237, %c1_238, %c0_239, %c0_240] : memref<2x4x1x8xf32, #tpu.memory_space<vmem>>, vector<1x1x1x8xf32>
    %323 = vector.shape_cast %322 : vector<1x1x1x8xf32> to vector<1x8xf32>
    %324 = vector.broadcast %323 : vector<1x8xf32> to vector<32x8xf32>
    %325 = arith.addf %321, %324 : vector<32x8xf32>
    %326 = vector.shape_cast %325 : vector<32x8xf32> to vector<2x16x8xf32>
    %c1_241 = arith.constant 1 : index
    %c1_242 = arith.constant 1 : index
    %c0_243 = arith.constant 0 : index
    %c0_244 = arith.constant 0 : index
    %327 = vector.load %arg6[%c1_241, %c1_242, %c0_243, %c0_244] : memref<2x4x32x8xf32, #tpu.memory_space<vmem>>, vector<1x1x32x8xf32>
    %328 = vector.shape_cast %327 : vector<1x1x32x8xf32> to vector<32x8xf32>
    %cst_245 = arith.constant dense<0.000000e+00> : vector<32x8xf32>
    %329 = tpu.matmul %277, %328, %cst_245 {dimension_numbers = #tpu.dot_dimension_numbers<[1], [0], [0], [1], [0, 0, 1, 1], [], []>} : vector<32x32xf32>, vector<32x8xf32>, vector<32x8xf32> -> vector<32x8xf32>
    %c1_246 = arith.constant 1 : index
    %c1_247 = arith.constant 1 : index
    %c0_248 = arith.constant 0 : index
    %c0_249 = arith.constant 0 : index
    %330 = vector.load %arg7[%c1_246, %c1_247, %c0_248, %c0_249] : memref<2x4x1x8xf32, #tpu.memory_space<vmem>>, vector<1x1x1x8xf32>
    %331 = vector.shape_cast %330 : vector<1x1x1x8xf32> to vector<1x8xf32>
    %332 = vector.broadcast %331 : vector<1x8xf32> to vector<32x8xf32>
    %333 = arith.addf %329, %332 : vector<32x8xf32>
    %334 = vector.shape_cast %333 : vector<32x8xf32> to vector<2x16x8xf32>
    %c1_250 = arith.constant 1 : index
    %c1_251 = arith.constant 1 : index
    %c0_252 = arith.constant 0 : index
    %c0_253 = arith.constant 0 : index
    %335 = vector.load %arg8[%c1_250, %c1_251, %c0_252, %c0_253] : memref<2x4x32x8xf32, #tpu.memory_space<vmem>>, vector<1x1x32x8xf32>
    %336 = vector.shape_cast %335 : vector<1x1x32x8xf32> to vector<32x8xf32>
    %cst_254 = arith.constant dense<0.000000e+00> : vector<32x8xf32>
    %337 = tpu.matmul %277, %336, %cst_254 {dimension_numbers = #tpu.dot_dimension_numbers<[1], [0], [0], [1], [0, 0, 1, 1], [], []>} : vector<32x32xf32>, vector<32x8xf32>, vector<32x8xf32> -> vector<32x8xf32>
    %c1_255 = arith.constant 1 : index
    %c1_256 = arith.constant 1 : index
    %c0_257 = arith.constant 0 : index
    %c0_258 = arith.constant 0 : index
    %338 = vector.load %arg9[%c1_255, %c1_256, %c0_257, %c0_258] : memref<2x4x1x8xf32, #tpu.memory_space<vmem>>, vector<1x1x1x8xf32>
    %339 = vector.shape_cast %338 : vector<1x1x1x8xf32> to vector<1x8xf32>
    %340 = vector.broadcast %339 : vector<1x8xf32> to vector<32x8xf32>
    %341 = arith.addf %337, %340 : vector<32x8xf32>
    %342 = vector.shape_cast %341 : vector<32x8xf32> to vector<2x16x8xf32>
    "tpu.trace_start"() <{level = 10 : i32, message = "bqd,bkd->bqk"}> : () -> ()
    %cst_259 = arith.constant dense<0.000000e+00> : vector<2x16x16xf32>
    %343 = tpu.matmul %326, %334, %cst_259 {dimension_numbers = #tpu.dot_dimension_numbers<[2], [2], [1], [1], [0, 0, 0, 1, 1, 1], [0], [0]>} : vector<2x16x8xf32>, vector<2x16x8xf32>, vector<2x16x16xf32> -> vector<2x16x16xf32>
    "tpu.trace_stop"() : () -> ()
    %344 = arith.addf %343, %25 : vector<2x16x16xf32>
    %cst_260 = arith.constant dense<0xFF800000> : vector<2x16xf32>
    %345 = vector.multi_reduction <maximumf>, %344, %cst_260 [2] : vector<2x16x16xf32> to vector<2x16xf32>
    %346 = vector.shape_cast %345 : vector<2x16xf32> to vector<2x16x1xf32>
    %347 = vector.broadcast %346 : vector<2x16x1xf32> to vector<2x16x16xf32>
    %348 = arith.subf %344, %347 : vector<2x16x16xf32>
    %349 = math.exp %348 : vector<2x16x16xf32>
    %cst_261 = arith.constant dense<0.000000e+00> : vector<2x16xf32>
    %350 = vector.multi_reduction <add>, %349, %cst_261 [2] : vector<2x16x16xf32> to vector<2x16xf32>
    %351 = vector.shape_cast %350 : vector<2x16xf32> to vector<2x16x1xf32>
    %352 = tpu.reciprocal %351 {approx = true} : vector<2x16x1xf32> -> vector<2x16x1xf32>
    %353 = vector.broadcast %352 : vector<2x16x1xf32> to vector<2x16x16xf32>
    %354 = arith.mulf %349, %353 : vector<2x16x16xf32>
    "tpu.trace_start"() <{level = 10 : i32, message = "bqk,bkd->bqd"}> : () -> ()
    %cst_262 = arith.constant dense<0.000000e+00> : vector<2x16x8xf32>
    %355 = tpu.matmul %354, %342, %cst_262 {dimension_numbers = #tpu.dot_dimension_numbers<[2], [1], [1], [2], [0, 0, 0, 1, 1, 2], [0], [0]>} : vector<2x16x16xf32>, vector<2x16x8xf32>, vector<2x16x8xf32> -> vector<2x16x8xf32>
    "tpu.trace_stop"() : () -> ()
    %356 = vector.shape_cast %355 : vector<2x16x8xf32> to vector<32x8xf32>
    %c1_263 = arith.constant 1 : index
    %c1_264 = arith.constant 1 : index
    %c0_265 = arith.constant 0 : index
    %c0_266 = arith.constant 0 : index
    %357 = vector.load %arg10[%c1_263, %c1_264, %c0_265, %c0_266] : memref<2x4x8x32xf32, #tpu.memory_space<vmem>>, vector<1x1x8x32xf32>
    %358 = vector.shape_cast %357 : vector<1x1x8x32xf32> to vector<8x32xf32>
    %cst_267 = arith.constant dense<0.000000e+00> : vector<32x32xf32>
    %359 = tpu.matmul %356, %358, %cst_267 {dimension_numbers = #tpu.dot_dimension_numbers<[1], [0], [0], [1], [0, 0, 1, 1], [], []>} : vector<32x8xf32>, vector<8x32xf32>, vector<32x32xf32> -> vector<32x32xf32>
    %360 = arith.addf %318, %359 : vector<32x32xf32>
    %c1_268 = arith.constant 1 : index
    %c2_269 = arith.constant 2 : index
    %c0_270 = arith.constant 0 : index
    %c0_271 = arith.constant 0 : index
    %361 = vector.load %arg4[%c1_268, %c2_269, %c0_270, %c0_271] : memref<2x4x32x8xf32, #tpu.memory_space<vmem>>, vector<1x1x32x8xf32>
    %362 = vector.shape_cast %361 : vector<1x1x32x8xf32> to vector<32x8xf32>
    %cst_272 = arith.constant dense<0.000000e+00> : vector<32x8xf32>
    %363 = tpu.matmul %277, %362, %cst_272 {dimension_numbers = #tpu.dot_dimension_numbers<[1], [0], [0], [1], [0, 0, 1, 1], [], []>} : vector<32x32xf32>, vector<32x8xf32>, vector<32x8xf32> -> vector<32x8xf32>
    %c1_273 = arith.constant 1 : index
    %c2_274 = arith.constant 2 : index
    %c0_275 = arith.constant 0 : index
    %c0_276 = arith.constant 0 : index
    %364 = vector.load %arg5[%c1_273, %c2_274, %c0_275, %c0_276] : memref<2x4x1x8xf32, #tpu.memory_space<vmem>>, vector<1x1x1x8xf32>
    %365 = vector.shape_cast %364 : vector<1x1x1x8xf32> to vector<1x8xf32>
    %366 = vector.broadcast %365 : vector<1x8xf32> to vector<32x8xf32>
    %367 = arith.addf %363, %366 : vector<32x8xf32>
    %368 = vector.shape_cast %367 : vector<32x8xf32> to vector<2x16x8xf32>
    %c1_277 = arith.constant 1 : index
    %c2_278 = arith.constant 2 : index
    %c0_279 = arith.constant 0 : index
    %c0_280 = arith.constant 0 : index
    %369 = vector.load %arg6[%c1_277, %c2_278, %c0_279, %c0_280] : memref<2x4x32x8xf32, #tpu.memory_space<vmem>>, vector<1x1x32x8xf32>
    %370 = vector.shape_cast %369 : vector<1x1x32x8xf32> to vector<32x8xf32>
    %cst_281 = arith.constant dense<0.000000e+00> : vector<32x8xf32>
    %371 = tpu.matmul %277, %370, %cst_281 {dimension_numbers = #tpu.dot_dimension_numbers<[1], [0], [0], [1], [0, 0, 1, 1], [], []>} : vector<32x32xf32>, vector<32x8xf32>, vector<32x8xf32> -> vector<32x8xf32>
    %c1_282 = arith.constant 1 : index
    %c2_283 = arith.constant 2 : index
    %c0_284 = arith.constant 0 : index
    %c0_285 = arith.constant 0 : index
    %372 = vector.load %arg7[%c1_282, %c2_283, %c0_284, %c0_285] : memref<2x4x1x8xf32, #tpu.memory_space<vmem>>, vector<1x1x1x8xf32>
    %373 = vector.shape_cast %372 : vector<1x1x1x8xf32> to vector<1x8xf32>
    %374 = vector.broadcast %373 : vector<1x8xf32> to vector<32x8xf32>
    %375 = arith.addf %371, %374 : vector<32x8xf32>
    %376 = vector.shape_cast %375 : vector<32x8xf32> to vector<2x16x8xf32>
    %c1_286 = arith.constant 1 : index
    %c2_287 = arith.constant 2 : index
    %c0_288 = arith.constant 0 : index
    %c0_289 = arith.constant 0 : index
    %377 = vector.load %arg8[%c1_286, %c2_287, %c0_288, %c0_289] : memref<2x4x32x8xf32, #tpu.memory_space<vmem>>, vector<1x1x32x8xf32>
    %378 = vector.shape_cast %377 : vector<1x1x32x8xf32> to vector<32x8xf32>
    %cst_290 = arith.constant dense<0.000000e+00> : vector<32x8xf32>
    %379 = tpu.matmul %277, %378, %cst_290 {dimension_numbers = #tpu.dot_dimension_numbers<[1], [0], [0], [1], [0, 0, 1, 1], [], []>} : vector<32x32xf32>, vector<32x8xf32>, vector<32x8xf32> -> vector<32x8xf32>
    %c1_291 = arith.constant 1 : index
    %c2_292 = arith.constant 2 : index
    %c0_293 = arith.constant 0 : index
    %c0_294 = arith.constant 0 : index
    %380 = vector.load %arg9[%c1_291, %c2_292, %c0_293, %c0_294] : memref<2x4x1x8xf32, #tpu.memory_space<vmem>>, vector<1x1x1x8xf32>
    %381 = vector.shape_cast %380 : vector<1x1x1x8xf32> to vector<1x8xf32>
    %382 = vector.broadcast %381 : vector<1x8xf32> to vector<32x8xf32>
    %383 = arith.addf %379, %382 : vector<32x8xf32>
    %384 = vector.shape_cast %383 : vector<32x8xf32> to vector<2x16x8xf32>
    "tpu.trace_start"() <{level = 10 : i32, message = "bqd,bkd->bqk"}> : () -> ()
    %cst_295 = arith.constant dense<0.000000e+00> : vector<2x16x16xf32>
    %385 = tpu.matmul %368, %376, %cst_295 {dimension_numbers = #tpu.dot_dimension_numbers<[2], [2], [1], [1], [0, 0, 0, 1, 1, 1], [0], [0]>} : vector<2x16x8xf32>, vector<2x16x8xf32>, vector<2x16x16xf32> -> vector<2x16x16xf32>
    "tpu.trace_stop"() : () -> ()
    %386 = arith.addf %385, %25 : vector<2x16x16xf32>
    %cst_296 = arith.constant dense<0xFF800000> : vector<2x16xf32>
    %387 = vector.multi_reduction <maximumf>, %386, %cst_296 [2] : vector<2x16x16xf32> to vector<2x16xf32>
    %388 = vector.shape_cast %387 : vector<2x16xf32> to vector<2x16x1xf32>
    %389 = vector.broadcast %388 : vector<2x16x1xf32> to vector<2x16x16xf32>
    %390 = arith.subf %386, %389 : vector<2x16x16xf32>
    %391 = math.exp %390 : vector<2x16x16xf32>
    %cst_297 = arith.constant dense<0.000000e+00> : vector<2x16xf32>
    %392 = vector.multi_reduction <add>, %391, %cst_297 [2] : vector<2x16x16xf32> to vector<2x16xf32>
    %393 = vector.shape_cast %392 : vector<2x16xf32> to vector<2x16x1xf32>
    %394 = tpu.reciprocal %393 {approx = true} : vector<2x16x1xf32> -> vector<2x16x1xf32>
    %395 = vector.broadcast %394 : vector<2x16x1xf32> to vector<2x16x16xf32>
    %396 = arith.mulf %391, %395 : vector<2x16x16xf32>
    "tpu.trace_start"() <{level = 10 : i32, message = "bqk,bkd->bqd"}> : () -> ()
    %cst_298 = arith.constant dense<0.000000e+00> : vector<2x16x8xf32>
    %397 = tpu.matmul %396, %384, %cst_298 {dimension_numbers = #tpu.dot_dimension_numbers<[2], [1], [1], [2], [0, 0, 0, 1, 1, 2], [0], [0]>} : vector<2x16x16xf32>, vector<2x16x8xf32>, vector<2x16x8xf32> -> vector<2x16x8xf32>
    "tpu.trace_stop"() : () -> ()
    %398 = vector.shape_cast %397 : vector<2x16x8xf32> to vector<32x8xf32>
    %c1_299 = arith.constant 1 : index
    %c2_300 = arith.constant 2 : index
    %c0_301 = arith.constant 0 : index
    %c0_302 = arith.constant 0 : index
    %399 = vector.load %arg10[%c1_299, %c2_300, %c0_301, %c0_302] : memref<2x4x8x32xf32, #tpu.memory_space<vmem>>, vector<1x1x8x32xf32>
    %400 = vector.shape_cast %399 : vector<1x1x8x32xf32> to vector<8x32xf32>
    %cst_303 = arith.constant dense<0.000000e+00> : vector<32x32xf32>
    %401 = tpu.matmul %398, %400, %cst_303 {dimension_numbers = #tpu.dot_dimension_numbers<[1], [0], [0], [1], [0, 0, 1, 1], [], []>} : vector<32x8xf32>, vector<8x32xf32>, vector<32x32xf32> -> vector<32x32xf32>
    %402 = arith.addf %360, %401 : vector<32x32xf32>
    %c1_304 = arith.constant 1 : index
    %c3_305 = arith.constant 3 : index
    %c0_306 = arith.constant 0 : index
    %c0_307 = arith.constant 0 : index
    %403 = vector.load %arg4[%c1_304, %c3_305, %c0_306, %c0_307] : memref<2x4x32x8xf32, #tpu.memory_space<vmem>>, vector<1x1x32x8xf32>
    %404 = vector.shape_cast %403 : vector<1x1x32x8xf32> to vector<32x8xf32>
    %cst_308 = arith.constant dense<0.000000e+00> : vector<32x8xf32>
    %405 = tpu.matmul %277, %404, %cst_308 {dimension_numbers = #tpu.dot_dimension_numbers<[1], [0], [0], [1], [0, 0, 1, 1], [], []>} : vector<32x32xf32>, vector<32x8xf32>, vector<32x8xf32> -> vector<32x8xf32>
    %c1_309 = arith.constant 1 : index
    %c3_310 = arith.constant 3 : index
    %c0_311 = arith.constant 0 : index
    %c0_312 = arith.constant 0 : index
    %406 = vector.load %arg5[%c1_309, %c3_310, %c0_311, %c0_312] : memref<2x4x1x8xf32, #tpu.memory_space<vmem>>, vector<1x1x1x8xf32>
    %407 = vector.shape_cast %406 : vector<1x1x1x8xf32> to vector<1x8xf32>
    %408 = vector.broadcast %407 : vector<1x8xf32> to vector<32x8xf32>
    %409 = arith.addf %405, %408 : vector<32x8xf32>
    %410 = vector.shape_cast %409 : vector<32x8xf32> to vector<2x16x8xf32>
    %c1_313 = arith.constant 1 : index
    %c3_314 = arith.constant 3 : index
    %c0_315 = arith.constant 0 : index
    %c0_316 = arith.constant 0 : index
    %411 = vector.load %arg6[%c1_313, %c3_314, %c0_315, %c0_316] : memref<2x4x32x8xf32, #tpu.memory_space<vmem>>, vector<1x1x32x8xf32>
    %412 = vector.shape_cast %411 : vector<1x1x32x8xf32> to vector<32x8xf32>
    %cst_317 = arith.constant dense<0.000000e+00> : vector<32x8xf32>
    %413 = tpu.matmul %277, %412, %cst_317 {dimension_numbers = #tpu.dot_dimension_numbers<[1], [0], [0], [1], [0, 0, 1, 1], [], []>} : vector<32x32xf32>, vector<32x8xf32>, vector<32x8xf32> -> vector<32x8xf32>
    %c1_318 = arith.constant 1 : index
    %c3_319 = arith.constant 3 : index
    %c0_320 = arith.constant 0 : index
    %c0_321 = arith.constant 0 : index
    %414 = vector.load %arg7[%c1_318, %c3_319, %c0_320, %c0_321] : memref<2x4x1x8xf32, #tpu.memory_space<vmem>>, vector<1x1x1x8xf32>
    %415 = vector.shape_cast %414 : vector<1x1x1x8xf32> to vector<1x8xf32>
    %416 = vector.broadcast %415 : vector<1x8xf32> to vector<32x8xf32>
    %417 = arith.addf %413, %416 : vector<32x8xf32>
    %418 = vector.shape_cast %417 : vector<32x8xf32> to vector<2x16x8xf32>
    %c1_322 = arith.constant 1 : index
    %c3_323 = arith.constant 3 : index
    %c0_324 = arith.constant 0 : index
    %c0_325 = arith.constant 0 : index
    %419 = vector.load %arg8[%c1_322, %c3_323, %c0_324, %c0_325] : memref<2x4x32x8xf32, #tpu.memory_space<vmem>>, vector<1x1x32x8xf32>
    %420 = vector.shape_cast %419 : vector<1x1x32x8xf32> to vector<32x8xf32>
    %cst_326 = arith.constant dense<0.000000e+00> : vector<32x8xf32>
    %421 = tpu.matmul %277, %420, %cst_326 {dimension_numbers = #tpu.dot_dimension_numbers<[1], [0], [0], [1], [0, 0, 1, 1], [], []>} : vector<32x32xf32>, vector<32x8xf32>, vector<32x8xf32> -> vector<32x8xf32>
    %c1_327 = arith.constant 1 : index
    %c3_328 = arith.constant 3 : index
    %c0_329 = arith.constant 0 : index
    %c0_330 = arith.constant 0 : index
    %422 = vector.load %arg9[%c1_327, %c3_328, %c0_329, %c0_330] : memref<2x4x1x8xf32, #tpu.memory_space<vmem>>, vector<1x1x1x8xf32>
    %423 = vector.shape_cast %422 : vector<1x1x1x8xf32> to vector<1x8xf32>
    %424 = vector.broadcast %423 : vector<1x8xf32> to vector<32x8xf32>
    %425 = arith.addf %421, %424 : vector<32x8xf32>
    %426 = vector.shape_cast %425 : vector<32x8xf32> to vector<2x16x8xf32>
    "tpu.trace_start"() <{level = 10 : i32, message = "bqd,bkd->bqk"}> : () -> ()
    %cst_331 = arith.constant dense<0.000000e+00> : vector<2x16x16xf32>
    %427 = tpu.matmul %410, %418, %cst_331 {dimension_numbers = #tpu.dot_dimension_numbers<[2], [2], [1], [1], [0, 0, 0, 1, 1, 1], [0], [0]>} : vector<2x16x8xf32>, vector<2x16x8xf32>, vector<2x16x16xf32> -> vector<2x16x16xf32>
    "tpu.trace_stop"() : () -> ()
    %428 = arith.addf %427, %25 : vector<2x16x16xf32>
    %cst_332 = arith.constant dense<0xFF800000> : vector<2x16xf32>
    %429 = vector.multi_reduction <maximumf>, %428, %cst_332 [2] : vector<2x16x16xf32> to vector<2x16xf32>
    %430 = vector.shape_cast %429 : vector<2x16xf32> to vector<2x16x1xf32>
    %431 = vector.broadcast %430 : vector<2x16x1xf32> to vector<2x16x16xf32>
    %432 = arith.subf %428, %431 : vector<2x16x16xf32>
    %433 = math.exp %432 : vector<2x16x16xf32>
    %cst_333 = arith.constant dense<0.000000e+00> : vector<2x16xf32>
    %434 = vector.multi_reduction <add>, %433, %cst_333 [2] : vector<2x16x16xf32> to vector<2x16xf32>
    %435 = vector.shape_cast %434 : vector<2x16xf32> to vector<2x16x1xf32>
    %436 = tpu.reciprocal %435 {approx = true} : vector<2x16x1xf32> -> vector<2x16x1xf32>
    %437 = vector.broadcast %436 : vector<2x16x1xf32> to vector<2x16x16xf32>
    %438 = arith.mulf %433, %437 : vector<2x16x16xf32>
    "tpu.trace_start"() <{level = 10 : i32, message = "bqk,bkd->bqd"}> : () -> ()
    %cst_334 = arith.constant dense<0.000000e+00> : vector<2x16x8xf32>
    %439 = tpu.matmul %438, %426, %cst_334 {dimension_numbers = #tpu.dot_dimension_numbers<[2], [1], [1], [2], [0, 0, 0, 1, 1, 2], [0], [0]>} : vector<2x16x16xf32>, vector<2x16x8xf32>, vector<2x16x8xf32> -> vector<2x16x8xf32>
    "tpu.trace_stop"() : () -> ()
    %440 = vector.shape_cast %439 : vector<2x16x8xf32> to vector<32x8xf32>
    %c1_335 = arith.constant 1 : index
    %c3_336 = arith.constant 3 : index
    %c0_337 = arith.constant 0 : index
    %c0_338 = arith.constant 0 : index
    %441 = vector.load %arg10[%c1_335, %c3_336, %c0_337, %c0_338] : memref<2x4x8x32xf32, #tpu.memory_space<vmem>>, vector<1x1x8x32xf32>
    %442 = vector.shape_cast %441 : vector<1x1x8x32xf32> to vector<8x32xf32>
    %cst_339 = arith.constant dense<0.000000e+00> : vector<32x32xf32>
    %443 = tpu.matmul %440, %442, %cst_339 {dimension_numbers = #tpu.dot_dimension_numbers<[1], [0], [0], [1], [0, 0, 1, 1], [], []>} : vector<32x8xf32>, vector<8x32xf32>, vector<32x32xf32> -> vector<32x32xf32>
    %444 = arith.addf %402, %443 : vector<32x32xf32>
    %c1_340 = arith.constant 1 : index
    %c0_341 = arith.constant 0 : index
    %c0_342 = arith.constant 0 : index
    %445 = vector.load %arg11[%c1_340, %c0_341, %c0_342] : memref<2x1x32xf32, #tpu.memory_space<vmem>>, vector<1x1x32xf32>
    %446 = vector.shape_cast %445 : vector<1x1x32xf32> to vector<1x32xf32>
    %447 = vector.broadcast %446 : vector<1x32xf32> to vector<32x32xf32>
    %448 = arith.addf %444, %447 : vector<32x32xf32>
    %449 = arith.addf %448, %277 : vector<32x32xf32>
    %c1_343 = arith.constant 1 : index
    %c0_344 = arith.constant 0 : index
    %c0_345 = arith.constant 0 : index
    %450 = vector.load %arg12[%c1_343, %c0_344, %c0_345] : memref<2x1x32xf32, #tpu.memory_space<vmem>>, vector<1x1x32xf32>
    %451 = vector.shape_cast %450 : vector<1x1x32xf32> to vector<1x32xf32>
    %c1_346 = arith.constant 1 : index
    %c0_347 = arith.constant 0 : index
    %c0_348 = arith.constant 0 : index
    %452 = vector.load %arg13[%c1_346, %c0_347, %c0_348] : memref<2x1x32xf32, #tpu.memory_space<vmem>>, vector<1x1x32xf32>
    %453 = vector.shape_cast %452 : vector<1x1x32xf32> to vector<1x32xf32>
    %cst_349 = arith.constant dense<0.000000e+00> : vector<32xf32>
    %454 = vector.multi_reduction <add>, %449, %cst_349 [1] : vector<32x32xf32> to vector<32xf32>
    %455 = vector.shape_cast %454 : vector<32xf32> to vector<32x1xf32>
    %cst_350 = arith.constant 3.200000e+01 : f32
    %456 = vector.broadcast %cst_350 : f32 to vector<32x1xf32>
    %457 = arith.divf %455, %456 : vector<32x1xf32>
    %458 = vector.broadcast %457 : vector<32x1xf32> to vector<32x32xf32>
    %459 = arith.subf %449, %458 : vector<32x32xf32>
    %460 = arith.mulf %459, %459 : vector<32x32xf32>
    %cst_351 = arith.constant dense<0.000000e+00> : vector<32xf32>
    %461 = vector.multi_reduction <add>, %460, %cst_351 [1] : vector<32x32xf32> to vector<32xf32>
    %462 = vector.shape_cast %461 : vector<32xf32> to vector<32x1xf32>
    %cst_352 = arith.constant 3.200000e+01 : f32
    %463 = vector.broadcast %cst_352 : f32 to vector<32x1xf32>
    %464 = arith.divf %462, %463 : vector<32x1xf32>
    %465 = vector.broadcast %457 : vector<32x1xf32> to vector<32x32xf32>
    %466 = arith.subf %449, %465 : vector<32x32xf32>
    %cst_353 = arith.constant 9.99999996E-13 : f32
    %467 = vector.broadcast %cst_353 : f32 to vector<32x1xf32>
    %468 = arith.addf %464, %467 : vector<32x1xf32>
    %469 = math.rsqrt %468 : vector<32x1xf32>
    %470 = vector.broadcast %469 : vector<32x1xf32> to vector<32x32xf32>
    %471 = arith.mulf %466, %470 : vector<32x32xf32>
    %472 = vector.broadcast %451 : vector<1x32xf32> to vector<32x32xf32>
    %473 = arith.mulf %471, %472 : vector<32x32xf32>
    %474 = vector.broadcast %453 : vector<1x32xf32> to vector<32x32xf32>
    %475 = arith.addf %473, %474 : vector<32x32xf32>
    %c1_354 = arith.constant 1 : index
    %c0_355 = arith.constant 0 : index
    %c0_356 = arith.constant 0 : index
    %476 = vector.load %arg14[%c1_354, %c0_355, %c0_356] : memref<2x32x64xf32, #tpu.memory_space<vmem>>, vector<1x32x64xf32>
    %477 = vector.shape_cast %476 : vector<1x32x64xf32> to vector<32x64xf32>
    %cst_357 = arith.constant dense<0.000000e+00> : vector<32x64xf32>
    %478 = tpu.matmul %475, %477, %cst_357 {dimension_numbers = #tpu.dot_dimension_numbers<[1], [0], [0], [1], [0, 0, 1, 1], [], []>} : vector<32x32xf32>, vector<32x64xf32>, vector<32x64xf32> -> vector<32x64xf32>
    %c1_358 = arith.constant 1 : index
    %c0_359 = arith.constant 0 : index
    %c0_360 = arith.constant 0 : index
    %479 = vector.load %arg15[%c1_358, %c0_359, %c0_360] : memref<2x1x64xf32, #tpu.memory_space<vmem>>, vector<1x1x64xf32>
    %480 = vector.shape_cast %479 : vector<1x1x64xf32> to vector<1x64xf32>
    %481 = vector.broadcast %480 : vector<1x64xf32> to vector<32x64xf32>
    %482 = arith.addf %478, %481 : vector<32x64xf32>
    %cst_361 = arith.constant 5.000000e-01 : f32
    %483 = vector.broadcast %cst_361 : f32 to vector<32x64xf32>
    %484 = arith.mulf %483, %482 : vector<32x64xf32>
    %cst_362 = arith.constant 4.471500e-02 : f32
    %485 = vector.broadcast %cst_362 : f32 to vector<32x64xf32>
    %486 = arith.mulf %485, %482 : vector<32x64xf32>
    %487 = arith.mulf %486, %482 : vector<32x64xf32>
    %488 = arith.mulf %487, %482 : vector<32x64xf32>
    %489 = arith.addf %482, %488 : vector<32x64xf32>
    %cst_363 = arith.constant 0.797884583 : f32
    %490 = vector.broadcast %cst_363 : f32 to vector<32x64xf32>
    %491 = arith.mulf %490, %489 : vector<32x64xf32>
    %492 = math.tanh %491 : vector<32x64xf32>
    %cst_364 = arith.constant 1.000000e+00 : f32
    %493 = vector.broadcast %cst_364 : f32 to vector<32x64xf32>
    %494 = arith.addf %493, %492 : vector<32x64xf32>
    %495 = arith.mulf %484, %494 : vector<32x64xf32>
    %c1_365 = arith.constant 1 : index
    %c0_366 = arith.constant 0 : index
    %c0_367 = arith.constant 0 : index
    %496 = vector.load %arg16[%c1_365, %c0_366, %c0_367] : memref<2x64x32xf32, #tpu.memory_space<vmem>>, vector<1x64x32xf32>
    %497 = vector.shape_cast %496 : vector<1x64x32xf32> to vector<64x32xf32>
    %cst_368 = arith.constant dense<0.000000e+00> : vector<32x32xf32>
    %498 = tpu.matmul %495, %497, %cst_368 {dimension_numbers = #tpu.dot_dimension_numbers<[1], [0], [0], [1], [0, 0, 1, 1], [], []>} : vector<32x64xf32>, vector<64x32xf32>, vector<32x32xf32> -> vector<32x32xf32>
    %c1_369 = arith.constant 1 : index
    %c0_370 = arith.constant 0 : index
    %c0_371 = arith.constant 0 : index
    %499 = vector.load %arg17[%c1_369, %c0_370, %c0_371] : memref<2x1x32xf32, #tpu.memory_space<vmem>>, vector<1x1x32xf32>
    %500 = vector.shape_cast %499 : vector<1x1x32xf32> to vector<1x32xf32>
    %501 = vector.broadcast %500 : vector<1x32xf32> to vector<32x32xf32>
    %502 = arith.addf %498, %501 : vector<32x32xf32>
    %503 = arith.addf %502, %475 : vector<32x32xf32>
    %c1_372 = arith.constant 1 : index
    %c0_373 = arith.constant 0 : index
    %c0_374 = arith.constant 0 : index
    %504 = vector.load %arg18[%c1_372, %c0_373, %c0_374] : memref<2x1x32xf32, #tpu.memory_space<vmem>>, vector<1x1x32xf32>
    %505 = vector.shape_cast %504 : vector<1x1x32xf32> to vector<1x32xf32>
    %c1_375 = arith.constant 1 : index
    %c0_376 = arith.constant 0 : index
    %c0_377 = arith.constant 0 : index
    %506 = vector.load %arg19[%c1_375, %c0_376, %c0_377] : memref<2x1x32xf32, #tpu.memory_space<vmem>>, vector<1x1x32xf32>
    %507 = vector.shape_cast %506 : vector<1x1x32xf32> to vector<1x32xf32>
    %cst_378 = arith.constant dense<0.000000e+00> : vector<32xf32>
    %508 = vector.multi_reduction <add>, %503, %cst_378 [1] : vector<32x32xf32> to vector<32xf32>
    %509 = vector.shape_cast %508 : vector<32xf32> to vector<32x1xf32>
    %cst_379 = arith.constant 3.200000e+01 : f32
    %510 = vector.broadcast %cst_379 : f32 to vector<32x1xf32>
    %511 = arith.divf %509, %510 : vector<32x1xf32>
    %512 = vector.broadcast %511 : vector<32x1xf32> to vector<32x32xf32>
    %513 = arith.subf %503, %512 : vector<32x32xf32>
    %514 = arith.mulf %513, %513 : vector<32x32xf32>
    %cst_380 = arith.constant dense<0.000000e+00> : vector<32xf32>
    %515 = vector.multi_reduction <add>, %514, %cst_380 [1] : vector<32x32xf32> to vector<32xf32>
    %516 = vector.shape_cast %515 : vector<32xf32> to vector<32x1xf32>
    %cst_381 = arith.constant 3.200000e+01 : f32
    %517 = vector.broadcast %cst_381 : f32 to vector<32x1xf32>
    %518 = arith.divf %516, %517 : vector<32x1xf32>
    %519 = vector.broadcast %511 : vector<32x1xf32> to vector<32x32xf32>
    %520 = arith.subf %503, %519 : vector<32x32xf32>
    %cst_382 = arith.constant 9.99999996E-13 : f32
    %521 = vector.broadcast %cst_382 : f32 to vector<32x1xf32>
    %522 = arith.addf %518, %521 : vector<32x1xf32>
    %523 = math.rsqrt %522 : vector<32x1xf32>
    %524 = vector.broadcast %523 : vector<32x1xf32> to vector<32x32xf32>
    %525 = arith.mulf %520, %524 : vector<32x32xf32>
    %526 = vector.broadcast %505 : vector<1x32xf32> to vector<32x32xf32>
    %527 = arith.mulf %525, %526 : vector<32x32xf32>
    %528 = vector.broadcast %507 : vector<1x32xf32> to vector<32x32xf32>
    %529 = arith.addf %527, %528 : vector<32x32xf32>
    %c0_383 = arith.constant 0 : index
    %c0_384 = arith.constant 0 : index
    %c0_385 = arith.constant 0 : index
    %530 = vector.load %arg20[%c0_383, %c0_384, %c0_385] : memref<2x32x8xf32, #tpu.memory_space<vmem>>, vector<1x32x8xf32>
    %531 = vector.shape_cast %530 : vector<1x32x8xf32> to vector<32x8xf32>
    %cst_386 = arith.constant dense<0.000000e+00> : vector<32x8xf32>
    %532 = tpu.matmul %529, %531, %cst_386 {dimension_numbers = #tpu.dot_dimension_numbers<[1], [0], [0], [1], [0, 0, 1, 1], [], []>} : vector<32x32xf32>, vector<32x8xf32>, vector<32x8xf32> -> vector<32x8xf32>
    %533 = vector.shape_cast %532 : vector<32x8xf32> to vector<2x16x8xf32>
    %534 = vector.extract_strided_slice %533 {offsets = [0, 0, 0], sizes = [2, 15, 8], strides = [1, 1, 1]} : vector<2x16x8xf32> to vector<2x15x8xf32>
    %c1_387 = arith.constant 1 : index
    %c0_388 = arith.constant 0 : index
    %c0_389 = arith.constant 0 : index
    %535 = vector.load %arg20[%c1_387, %c0_388, %c0_389] : memref<2x32x8xf32, #tpu.memory_space<vmem>>, vector<1x32x8xf32>
    %536 = vector.shape_cast %535 : vector<1x32x8xf32> to vector<32x8xf32>
    %cst_390 = arith.constant dense<0.000000e+00> : vector<32x8xf32>
    %537 = tpu.matmul %529, %536, %cst_390 {dimension_numbers = #tpu.dot_dimension_numbers<[1], [0], [0], [1], [0, 0, 1, 1], [], []>} : vector<32x32xf32>, vector<32x8xf32>, vector<32x8xf32> -> vector<32x8xf32>
    %538 = vector.shape_cast %537 : vector<32x8xf32> to vector<2x16x8xf32>
    %539 = vector.extract_strided_slice %538 {offsets = [0, 1, 0], sizes = [2, 15, 8], strides = [1, 1, 1]} : vector<2x16x8xf32> to vector<2x15x8xf32>
    %540 = arith.addf %534, %539 : vector<2x15x8xf32>
    %c0_391 = arith.constant 0 : index
    %c0_392 = arith.constant 0 : index
    %541 = vector.load %arg21[%c0_391, %c0_392] : memref<1x8xf32, #tpu.memory_space<vmem>>, vector<1x8xf32>
    %542 = vector.shape_cast %541 : vector<1x8xf32> to vector<1x1x8xf32>
    %543 = vector.broadcast %542 : vector<1x1x8xf32> to vector<2x15x8xf32>
    %544 = arith.addf %540, %543 : vector<2x15x8xf32>
    %cst_393 = arith.constant 0.000000e+00 : f32
    %545 = vector.broadcast %cst_393 : f32 to vector<2x15x8xf32>
    %546 = arith.maximumf %544, %545 : vector<2x15x8xf32>
    %cst_394 = arith.constant dense<0xFF800000> : vector<2x8xf32>
    %547 = vector.multi_reduction <maximumf>, %546, %cst_394 [1] : vector<2x15x8xf32> to vector<2x8xf32>
    %c0_395 = arith.constant 0 : index
    %c0_396 = arith.constant 0 : index
    %c0_397 = arith.constant 0 : index
    %548 = vector.load %arg26[%c0_395, %c0_396, %c0_397] : memref<3x8x5xf32, #tpu.memory_space<vmem>>, vector<1x8x5xf32>
    %549 = vector.shape_cast %548 : vector<1x8x5xf32> to vector<8x5xf32>
    %cst_398 = arith.constant dense<0.000000e+00> : vector<2x5xf32>
    %550 = tpu.matmul %547, %549, %cst_398 {dimension_numbers = #tpu.dot_dimension_numbers<[1], [0], [0], [1], [0, 0, 1, 1], [], []>} : vector<2x8xf32>, vector<8x5xf32>, vector<2x5xf32> -> vector<2x5xf32>
    %c0_399 = arith.constant 0 : index
    %c0_400 = arith.constant 0 : index
    %c0_401 = arith.constant 0 : index
    %551 = vector.load %arg22[%c0_399, %c0_400, %c0_401] : memref<3x32x8xf32, #tpu.memory_space<vmem>>, vector<1x32x8xf32>
    %552 = vector.shape_cast %551 : vector<1x32x8xf32> to vector<32x8xf32>
    %cst_402 = arith.constant dense<0.000000e+00> : vector<32x8xf32>
    %553 = tpu.matmul %529, %552, %cst_402 {dimension_numbers = #tpu.dot_dimension_numbers<[1], [0], [0], [1], [0, 0, 1, 1], [], []>} : vector<32x32xf32>, vector<32x8xf32>, vector<32x8xf32> -> vector<32x8xf32>
    %554 = vector.shape_cast %553 : vector<32x8xf32> to vector<2x16x8xf32>
    %555 = vector.extract_strided_slice %554 {offsets = [0, 0, 0], sizes = [2, 14, 8], strides = [1, 1, 1]} : vector<2x16x8xf32> to vector<2x14x8xf32>
    %c1_403 = arith.constant 1 : index
    %c0_404 = arith.constant 0 : index
    %c0_405 = arith.constant 0 : index
    %556 = vector.load %arg22[%c1_403, %c0_404, %c0_405] : memref<3x32x8xf32, #tpu.memory_space<vmem>>, vector<1x32x8xf32>
    %557 = vector.shape_cast %556 : vector<1x32x8xf32> to vector<32x8xf32>
    %cst_406 = arith.constant dense<0.000000e+00> : vector<32x8xf32>
    %558 = tpu.matmul %529, %557, %cst_406 {dimension_numbers = #tpu.dot_dimension_numbers<[1], [0], [0], [1], [0, 0, 1, 1], [], []>} : vector<32x32xf32>, vector<32x8xf32>, vector<32x8xf32> -> vector<32x8xf32>
    %559 = vector.shape_cast %558 : vector<32x8xf32> to vector<2x16x8xf32>
    %560 = vector.extract_strided_slice %559 {offsets = [0, 1, 0], sizes = [2, 14, 8], strides = [1, 1, 1]} : vector<2x16x8xf32> to vector<2x14x8xf32>
    %561 = arith.addf %555, %560 : vector<2x14x8xf32>
    %c2_407 = arith.constant 2 : index
    %c0_408 = arith.constant 0 : index
    %c0_409 = arith.constant 0 : index
    %562 = vector.load %arg22[%c2_407, %c0_408, %c0_409] : memref<3x32x8xf32, #tpu.memory_space<vmem>>, vector<1x32x8xf32>
    %563 = vector.shape_cast %562 : vector<1x32x8xf32> to vector<32x8xf32>
    %cst_410 = arith.constant dense<0.000000e+00> : vector<32x8xf32>
    %564 = tpu.matmul %529, %563, %cst_410 {dimension_numbers = #tpu.dot_dimension_numbers<[1], [0], [0], [1], [0, 0, 1, 1], [], []>} : vector<32x32xf32>, vector<32x8xf32>, vector<32x8xf32> -> vector<32x8xf32>
    %565 = vector.shape_cast %564 : vector<32x8xf32> to vector<2x16x8xf32>
    %566 = vector.extract_strided_slice %565 {offsets = [0, 2, 0], sizes = [2, 14, 8], strides = [1, 1, 1]} : vector<2x16x8xf32> to vector<2x14x8xf32>
    %567 = arith.addf %561, %566 : vector<2x14x8xf32>
    %c0_411 = arith.constant 0 : index
    %c0_412 = arith.constant 0 : index
    %568 = vector.load %arg23[%c0_411, %c0_412] : memref<1x8xf32, #tpu.memory_space<vmem>>, vector<1x8xf32>
    %569 = vector.shape_cast %568 : vector<1x8xf32> to vector<1x1x8xf32>
    %570 = vector.broadcast %569 : vector<1x1x8xf32> to vector<2x14x8xf32>
    %571 = arith.addf %567, %570 : vector<2x14x8xf32>
    %cst_413 = arith.constant 0.000000e+00 : f32
    %572 = vector.broadcast %cst_413 : f32 to vector<2x14x8xf32>
    %573 = arith.maximumf %571, %572 : vector<2x14x8xf32>
    %cst_414 = arith.constant dense<0xFF800000> : vector<2x8xf32>
    %574 = vector.multi_reduction <maximumf>, %573, %cst_414 [1] : vector<2x14x8xf32> to vector<2x8xf32>
    %c1_415 = arith.constant 1 : index
    %c0_416 = arith.constant 0 : index
    %c0_417 = arith.constant 0 : index
    %575 = vector.load %arg26[%c1_415, %c0_416, %c0_417] : memref<3x8x5xf32, #tpu.memory_space<vmem>>, vector<1x8x5xf32>
    %576 = vector.shape_cast %575 : vector<1x8x5xf32> to vector<8x5xf32>
    %cst_418 = arith.constant dense<0.000000e+00> : vector<2x5xf32>
    %577 = tpu.matmul %574, %576, %cst_418 {dimension_numbers = #tpu.dot_dimension_numbers<[1], [0], [0], [1], [0, 0, 1, 1], [], []>} : vector<2x8xf32>, vector<8x5xf32>, vector<2x5xf32> -> vector<2x5xf32>
    %578 = arith.addf %550, %577 : vector<2x5xf32>
    %c0_419 = arith.constant 0 : index
    %c0_420 = arith.constant 0 : index
    %c0_421 = arith.constant 0 : index
    %579 = vector.load %arg24[%c0_419, %c0_420, %c0_421] : memref<4x32x8xf32, #tpu.memory_space<vmem>>, vector<1x32x8xf32>
    %580 = vector.shape_cast %579 : vector<1x32x8xf32> to vector<32x8xf32>
    %cst_422 = arith.constant dense<0.000000e+00> : vector<32x8xf32>
    %581 = tpu.matmul %529, %580, %cst_422 {dimension_numbers = #tpu.dot_dimension_numbers<[1], [0], [0], [1], [0, 0, 1, 1], [], []>} : vector<32x32xf32>, vector<32x8xf32>, vector<32x8xf32> -> vector<32x8xf32>
    %582 = vector.shape_cast %581 : vector<32x8xf32> to vector<2x16x8xf32>
    %583 = vector.extract_strided_slice %582 {offsets = [0, 0, 0], sizes = [2, 13, 8], strides = [1, 1, 1]} : vector<2x16x8xf32> to vector<2x13x8xf32>
    %c1_423 = arith.constant 1 : index
    %c0_424 = arith.constant 0 : index
    %c0_425 = arith.constant 0 : index
    %584 = vector.load %arg24[%c1_423, %c0_424, %c0_425] : memref<4x32x8xf32, #tpu.memory_space<vmem>>, vector<1x32x8xf32>
    %585 = vector.shape_cast %584 : vector<1x32x8xf32> to vector<32x8xf32>
    %cst_426 = arith.constant dense<0.000000e+00> : vector<32x8xf32>
    %586 = tpu.matmul %529, %585, %cst_426 {dimension_numbers = #tpu.dot_dimension_numbers<[1], [0], [0], [1], [0, 0, 1, 1], [], []>} : vector<32x32xf32>, vector<32x8xf32>, vector<32x8xf32> -> vector<32x8xf32>
    %587 = vector.shape_cast %586 : vector<32x8xf32> to vector<2x16x8xf32>
    %588 = vector.extract_strided_slice %587 {offsets = [0, 1, 0], sizes = [2, 13, 8], strides = [1, 1, 1]} : vector<2x16x8xf32> to vector<2x13x8xf32>
    %589 = arith.addf %583, %588 : vector<2x13x8xf32>
    %c2_427 = arith.constant 2 : index
    %c0_428 = arith.constant 0 : index
    %c0_429 = arith.constant 0 : index
    %590 = vector.load %arg24[%c2_427, %c0_428, %c0_429] : memref<4x32x8xf32, #tpu.memory_space<vmem>>, vector<1x32x8xf32>
    %591 = vector.shape_cast %590 : vector<1x32x8xf32> to vector<32x8xf32>
    %cst_430 = arith.constant dense<0.000000e+00> : vector<32x8xf32>
    %592 = tpu.matmul %529, %591, %cst_430 {dimension_numbers = #tpu.dot_dimension_numbers<[1], [0], [0], [1], [0, 0, 1, 1], [], []>} : vector<32x32xf32>, vector<32x8xf32>, vector<32x8xf32> -> vector<32x8xf32>
    %593 = vector.shape_cast %592 : vector<32x8xf32> to vector<2x16x8xf32>
    %594 = vector.extract_strided_slice %593 {offsets = [0, 2, 0], sizes = [2, 13, 8], strides = [1, 1, 1]} : vector<2x16x8xf32> to vector<2x13x8xf32>
    %595 = arith.addf %589, %594 : vector<2x13x8xf32>
    %c3_431 = arith.constant 3 : index
    %c0_432 = arith.constant 0 : index
    %c0_433 = arith.constant 0 : index
    %596 = vector.load %arg24[%c3_431, %c0_432, %c0_433] : memref<4x32x8xf32, #tpu.memory_space<vmem>>, vector<1x32x8xf32>
    %597 = vector.shape_cast %596 : vector<1x32x8xf32> to vector<32x8xf32>
    %cst_434 = arith.constant dense<0.000000e+00> : vector<32x8xf32>
    %598 = tpu.matmul %529, %597, %cst_434 {dimension_numbers = #tpu.dot_dimension_numbers<[1], [0], [0], [1], [0, 0, 1, 1], [], []>} : vector<32x32xf32>, vector<32x8xf32>, vector<32x8xf32> -> vector<32x8xf32>
    %599 = vector.shape_cast %598 : vector<32x8xf32> to vector<2x16x8xf32>
    %600 = vector.extract_strided_slice %599 {offsets = [0, 3, 0], sizes = [2, 13, 8], strides = [1, 1, 1]} : vector<2x16x8xf32> to vector<2x13x8xf32>
    %601 = arith.addf %595, %600 : vector<2x13x8xf32>
    %c0_435 = arith.constant 0 : index
    %c0_436 = arith.constant 0 : index
    %602 = vector.load %arg25[%c0_435, %c0_436] : memref<1x8xf32, #tpu.memory_space<vmem>>, vector<1x8xf32>
    %603 = vector.shape_cast %602 : vector<1x8xf32> to vector<1x1x8xf32>
    %604 = vector.broadcast %603 : vector<1x1x8xf32> to vector<2x13x8xf32>
    %605 = arith.addf %601, %604 : vector<2x13x8xf32>
    %cst_437 = arith.constant 0.000000e+00 : f32
    %606 = vector.broadcast %cst_437 : f32 to vector<2x13x8xf32>
    %607 = arith.maximumf %605, %606 : vector<2x13x8xf32>
    %cst_438 = arith.constant dense<0xFF800000> : vector<2x8xf32>
    %608 = vector.multi_reduction <maximumf>, %607, %cst_438 [1] : vector<2x13x8xf32> to vector<2x8xf32>
    %c2_439 = arith.constant 2 : index
    %c0_440 = arith.constant 0 : index
    %c0_441 = arith.constant 0 : index
    %609 = vector.load %arg26[%c2_439, %c0_440, %c0_441] : memref<3x8x5xf32, #tpu.memory_space<vmem>>, vector<1x8x5xf32>
    %610 = vector.shape_cast %609 : vector<1x8x5xf32> to vector<8x5xf32>
    %cst_442 = arith.constant dense<0.000000e+00> : vector<2x5xf32>
    %611 = tpu.matmul %608, %610, %cst_442 {dimension_numbers = #tpu.dot_dimension_numbers<[1], [0], [0], [1], [0, 0, 1, 1], [], []>} : vector<2x8xf32>, vector<8x5xf32>, vector<2x5xf32> -> vector<2x5xf32>
    %612 = arith.addf %578, %611 : vector<2x5xf32>
    %c0_443 = arith.constant 0 : index
    %c0_444 = arith.constant 0 : index
    %613 = vector.load %arg27[%c0_443, %c0_444] : memref<1x5xf32, #tpu.memory_space<vmem>>, vector<1x5xf32>
    %614 = vector.broadcast %613 : vector<1x5xf32> to vector<2x5xf32>
    %615 = arith.addf %612, %614 : vector<2x5xf32>
    %c0_445 = arith.constant 0 : index
    %c0_446 = arith.constant 0 : index
    %616 = vector.load %arg28[%c0_445, %c0_446] : memref<2x5xf32, #tpu.memory_space<vmem>>, vector<2x5xf32>
    tpu.vector_store %arg28[%c0_445, %c0_446], %615 {strides = array<i32>} : memref<2x5xf32, #tpu.memory_space<vmem>>, vector<2x5xf32>,
    return
  }
}

</mosaic_0001>

<bundles_post_ra>
// kernel: model_forward.1
= control target key start
LH: loop header
LB: loop body
LE: loop exit
PB: predicated region body
PF: predicated region fallthrough
CT: control target
= control target key end

     0   :  { %s12682_s0 = inlined_call_operand.vmem [shape: f32[32,32], index: 0, kind: input, shape index: {}]   ;;  %s12683_s1 = inlined_call_operand.vmem [shape: f32[2,16,16], index: 1, kind: input, shape index: {}]   ;;  %s12684_s2 = inlined_call_operand.vmem [shape: f32[1,32], index: 2, kind: input, shape index: {}]   ;;  %s12685_s3 = inlined_call_operand.vmem [shape: f32[1,32], index: 3, kind: input, shape index: {}]   ;;  %s12686_s4 = inlined_call_operand.vmem [shape: f32[2,4,32,8], index: 4, kind: input, shape index: {}]   ;;  %s12687_s5 = inlined_call_operand.vmem [shape: f32[2,4,1,8], index: 5, kind: input, shape index: {}]   ;;  %s12688_s6 = inlined_call_operand.vmem [shape: f32[2,4,32,8], index: 6, kind: input, shape index: {}]   ;;  %s12689_s7 = inlined_call_operand.vmem [shape: f32[2,4,1,8], index: 7, kind: input, shape index: {}]   ;;  %s12690_s8 = inlined_call_operand.vmem [shape: f32[2,4,32,8], index: 8, kind: input, shape index: {}]   ;;  %s12691_s9 = inlined_call_operand.vmem [shape: f32[2,4,1,8], index: 9, kind: input, shape index: {}]   ;;  %s12692_s10 = inlined_call_operand.vmem [shape: f32[2,4,8,32], index: 10, kind: input, shape index: {}]   ;;  %s12693_s11 = inlined_call_operand.vmem [shape: f32[2,1,32], index: 11, kind: input, shape index: {}]   ;;  %s12694_s12 = inlined_call_operand.vmem [shape: f32[2,1,32], index: 12, kind: input, shape index: {}]   ;;  %s12695_s13 = inlined_call_operand.vmem [shape: f32[2,1,32], index: 13, kind: input, shape index: {}]   ;;  %s12696_s14 = inlined_call_operand.vmem [shape: f32[2,32,64], index: 14, kind: input, shape index: {}]   ;;  %s12697_s15 = inlined_call_operand.vmem [shape: f32[2,1,64], index: 15, kind: input, shape index: {}]   ;;  %s12698_s16 = inlined_call_operand.vmem [shape: f32[2,64,32], index: 16, kind: input, shape index: {}]   ;;  %s12699_s17 = inlined_call_operand.vmem [shape: f32[2,1,32], index: 17, kind: input, shape index: {}]   ;;  %s12700_s18 = inlined_call_operand.vmem [shape: f32[2,1,32], index: 18, kind: input, shape index: {}]   ;;  %s12701_s19 = inlined_call_operand.vmem [shape: f32[2,1,32], index: 19, kind: input, shape index: {}]   ;;  %s12702_s20 = inlined_call_operand.vmem [shape: f32[2,32,8], index: 20, kind: input, shape index: {}]   ;;  %s12703_s21 = inlined_call_operand.vmem [shape: f32[1,8], index: 21, kind: input, shape index: {}]   ;;  %s12704_s22 = inlined_call_operand.vmem [shape: f32[3,32,8], index: 22, kind: input, shape index: {}]   ;;  %s12705_s23 = inlined_call_operand.vmem [shape: f32[1,8], index: 23, kind: input, shape index: {}]   ;;  %s12706_s24 = inlined_call_operand.vmem [shape: f32[4,32,8], index: 24, kind: input, shape index: {}]   ;;  %s12707_s25 = inlined_call_operand.vmem [shape: f32[1,8], index: 25, kind: input, shape index: {}]   ;;  %s12708_s26 = inlined_call_operand.vmem [shape: f32[3,8,5], index: 26, kind: input, shape index: {}]   ;;  %s12709_s27 = inlined_call_operand.vmem [shape: f32[1,5], index: 27, kind: input, shape index: {}]   ;;  %s12710_s28 = inlined_call_operand.hbm [shape: f32[2,5], index: 28, kind: output, shape index: {}]  }
   0x1   :  { %12723 = sst [smem:[#allocation5_spill]] %s12682_s0 }
   0x2   :  { %12724 = sst [smem:[#allocation6_spill]] %s12683_s1 }
   0x3   :  { %12725 = sst [smem:[#allocation7_spill]] %s12684_s2 }
   0x4   :  { %12726 = sst [smem:[#allocation8_spill]] %s12685_s3 }
   0x5   :  { %12727 = sst [smem:[#allocation9_spill]] %s12686_s4 }
   0x6   :  { %12728 = sst [smem:[#allocation10_spill]] %s12687_s5 }
   0x7   :  { %12729 = sst [smem:[#allocation11_spill]] %s12688_s6 }
   0x8   :  { %12730 = sst [smem:[#allocation12_spill]] %s12689_s7 }
   0x9   :  { %12731 = sst [smem:[#allocation13_spill]] %s12690_s8 }
   0xa   :  { %12732 = sst [smem:[#allocation14_spill]] %s12691_s9 }
   0xb   :  { %12733 = sst [smem:[#allocation15_spill]] %s12692_s10 }
   0xc   :  { %12734 = sst [smem:[#allocation16_spill]] %s12693_s11 }
   0xd   :  { %12735 = sst [smem:[#allocation17_spill]] %s12694_s12 }
   0xe   :  { %12736 = sst [smem:[#allocation18_spill]] %s12705_s23 }
   0xf   :  { %12737 = sst [smem:[#allocation19_spill]] %s12707_s25 }
  0x10   :  { %12738 = sst [smem:[#allocation20_spill]] %s12709_s27 }
  0x11   :  { %12739 = sst [smem:[#allocation21_spill]] %s12710_s28 }
  0x12   :  { %s12740_s9 = sld [smem:[#allocation5_spill]]  ;;  %vm96_vm0 = vcmask 261120  }
  0x18   :  { %v90_v0 = vld [vmem:[%s12740_s9] sm:$0xff]  ;;  %v92_v1 = vld [vmem:[%s12740_s9 + $0x10] sm:$0xff]  ;;  %v91_v2 = vld [vmem:[%s12740_s9 + $0x8] sm:$0xff] }
  0x19   :  { %v97_v3 = vsel %vm96_vm0, %v90_v0, 0.0  ;;  %v103_v4 = vsel %vm96_vm0, %v92_v1, 0.0  ;;  %v93_v5 = vld [vmem:[%s12740_s9 + $0x18] sm:$0xff] }
  0x1a   :  { %33 = vsyncpa [#allocation3], 0  ;;  %98 = vadd.xlane.f32.xlu0 %v97_v3  ;;  %104 = vadd.xlane.f32.xlu1 %v103_v4  ;;  %v100_v6 = vsel %vm96_vm0, %v91_v2, 0.0  ;;  %v106_v7 = vsel %vm96_vm0, %v93_v5, 0.0  ;;  %s12741_s7 = sld [smem:[#allocation9_spill]]  ;;  %s12742_s5 = sld [smem:[#allocation11_spill]] }
  0x1b   :  { %s12743_s8 = sld [smem:[#allocation13_spill]]  ;;  %s12744_s10 = sld [smem:[#allocation7_spill]]  ;;  %vm474_vm1 = vcmask 64512   ;;  %vm649_vm3 = vcmask 130048   ;;  %vm3529_vm4 = vcmask 523264   ;;  %vm11044_vm5 = vmmov 0  }
  0x1c   :  { %s12745_s29 = sld [smem:[#allocation8_spill]]  ;;  %s12746_s3 = sld [smem:[#allocation12_spill]]  ;;  %vm11303_vm2 = vmpackc.low %vm474_vm1, %vm474_vm1  ;;  %vm7444_vm6 = vcmask 1046528   ;;  %vm7785_vm7 = vcmask 1045504   ;;  %vm7475_vm8 = vcmask 63488   ;;  %vm7816_vm9 = vcmask 62464  }
  0x1d   :  { %s12747_s0 = sld [smem:[#allocation10_spill]]  ;;  %s12750_s9 = sld [smem:[#allocation14_spill]]  ;;  %vm7838_vm10 = vcmask 1041409   ;;  %vm8386_vm11 = vcmask 1044480   ;;  %vm8417_vm12 = vcmask 61440   ;;  %vm8521_vm13 = vcmask 33792  }
  0x1e   :  { %101 = vadd.xlane.f32.xlu0 %v100_v6  ;;  %107 = vadd.xlane.f32.xlu1 %v106_v7  ;;  %s12751_s2 = sld [smem:[#allocation6_spill]]  ;;  %s12752_s11 = sld [smem:[#allocation15_spill]] }
  0x1f   :  { %s12753_s4 = sld [smem:[#allocation16_spill]]  ;;  %s12754_s6 = sld [smem:[#allocation17_spill]] }
  0x20   :  { %v174_v28 = vld [vmem:[%s12741_s7] sm:$0xff]  ;;  %v175_v29 = vld [vmem:[%s12741_s7 + $0x8] sm:$0xff]  ;;  %v176_v34 = vld [vmem:[%s12741_s7 + $0x10] sm:$0xff]  ;;  %s12755_s12 = sld [smem:[#allocation18_spill]] }
  0x21   :  { %v282_v30 = vld [vmem:[%s12742_s5] sm:$0xff]  ;;  %v10332_v31 = vpack.c.bf16 %v175_v29, %v174_v28  ;;  %v283_v32 = vld [vmem:[%s12742_s5 + $0x8] sm:$0xff]  ;;  %v177_v35 = vld [vmem:[%s12741_s7 + $0x18] sm:$0xff] }
  0x22   :  { %v10340_v33 = vpack.c.bf16 %v283_v32, %v282_v30  ;;  %v284_v36 = vld [vmem:[%s12742_s5 + $0x10] sm:$0xff]  ;;  %v10336_v37 = vpack.c.bf16 %v177_v35, %v176_v34  ;;  %v285_v38 = vld [vmem:[%s12742_s5 + $0x18] sm:$0xff]  ;;  %v378_v40 = vld [vmem:[%s12743_s8] sm:$0xff] }
  0x23   :  { %10333 = vmatprep.subr.bf16.mxu0 %v10332_v31  ;;  %v10344_v39 = vpack.c.bf16 %v285_v38, %v284_v36  ;;  %v379_v41 = vld [vmem:[%s12743_s8 + $0x8] sm:$0xff]  ;;  %v8537_v56 = vld [vmem:[%s12744_s10] ss:$0 sm:$0xff]  ;;  %v381_v3 = vld [vmem:[%s12743_s8 + $0x18] sm:$0xff] }
  0x24   :  { %10341 = vmatprep.subr.bf16.mxu1 %v10340_v33  ;;  %10335 = vmatpush3.bf16.msra.mxu0 %v10332_v31  ;;  %v10348_v42 = vpack.c.bf16 %v379_v41, %v378_v40  ;;  %v8538_v58 = vld [vmem:[%s12745_s29] ss:$0 sm:$0xff]  ;;  %v8567_v29 = vld [vmem:[%s12741_s7 + $0x28] sm:$0xff] }
  0x25   :  { %10343 = vmatpush3.bf16.msra.mxu1 %v10340_v33  ;;  %10337 = vmatprep.subr.bf16.mxu0 %v10336_v37  ;;  %v8566_v28 = vld [vmem:[%s12741_s7 + $0x20] sm:$0xff] }
  0x26   :  { %10345 = vmatprep.subr.bf16.mxu1 %v10344_v39  ;;  %v8549_v32 = vld [vmem:[%s12750_s9] ss:$0 sm:$0xff]  ;;  %v10376_v34 = vpack.c.bf16 %v8567_v29, %v8566_v28 }
  0x28   :  { %10339 = vmatpush3.bf16.msra.mxu0 %v10336_v37 }
  0x29   :  { %10347 = vmatpush3.bf16.msra.mxu1 %v10344_v39  ;;  %10349 = vmatprep.subr.bf16.mxu0 %v10348_v42 }
  0xa7   :  { %v99_v8 = vpop.xlane.xlu0 %98  ;;  %v105_v9 = vpop.xlane.xlu1 %104 }
  0xa8   :  { %v110_v10 = vmul.f32 0.03125, %v99_v8  ;;  %v112_v11 = vmul.f32 0.03125, %v105_v9 }
  0xaa   :  { %v114_v12 = vsub.f32 %v90_v0, %v110_v10  ;;  %v11207_v13 = vsub.f32 %v92_v1, %v112_v11 }
  0xab   :  { %v102_v14 = vpop.xlane.xlu0 %101  ;;  %v108_v15 = vpop.xlane.xlu1 %107 }
  0xac   :  { %v111_v16 = vmul.f32 0.03125, %v102_v14  ;;  %v113_v17 = vmul.f32 0.03125, %v108_v15  ;;  %v118_v18 = vmul.f32 %v114_v12, %v114_v12  ;;  %v120_v19 = vmul.f32 %v11207_v13, %v11207_v13 }
  0xae   :  { %v115_v20 = vsub.f32 %v91_v2, %v111_v16  ;;  %v11211_v21 = vsub.f32 %v93_v5, %v113_v17  ;;  %v122_v22 = vsel %vm96_vm0, %v118_v18, 0.0  ;;  %v128_v23 = vsel %vm96_vm0, %v120_v19, 0.0  ;;  %v380_v2 = vld [vmem:[%s12743_s8 + $0x10] sm:$0xff] }
  0xaf   :  { %123 = vadd.xlane.f32.xlu0 %v122_v22  ;;  %v10352_v9 = vpack.c.bf16 %v381_v3, %v380_v2 }
  0xb0   :  { %v119_v24 = vmul.f32 %v115_v20, %v115_v20  ;;  %v121_v25 = vmul.f32 %v11211_v21, %v11211_v21 }
  0xb2   :  { %v125_v26 = vsel %vm96_vm0, %v119_v24, 0.0  ;;  %v131_v27 = vsel %vm96_vm0, %v121_v25, 0.0 }
  0xb3   :  { %129 = vadd.xlane.f32.xlu0 %v128_v23  ;;  %126 = vadd.xlane.f32.xlu1 %v125_v26 }
  0xb7   :  { %132 = vadd.xlane.f32.xlu1 %v131_v27 }
 0x13c   :  { %v124_v43 = vpop.xlane.xlu0 %123 }
 0x13d   :  { %v134_v44 = vmul.f32 0.03125, %v124_v43  ;;  %v8569_v43 = vld [vmem:[%s12741_s7 + $0x38] sm:$0xff] }
 0x13f   :  { %v138_v45 = vadd.f32 1e-12, %v134_v44 }
 0x140   :  { %v127_v46 = vpop.xlane.xlu1 %126  ;;  %v130_v47 = vpop.xlane.xlu0 %129 }
 0x141   :  { %10831 = vrsqrt.f32 %v138_v45  ;;  %v135_v48 = vmul.f32 0.03125, %v127_v46  ;;  %v136_v49 = vmul.f32 0.03125, %v130_v47 }
 0x143   :  { %v139_v50 = vadd.f32 1e-12, %v135_v48  ;;  %v140_v51 = vadd.f32 1e-12, %v136_v49 }
 0x144   :  { %v133_v52 = vpop.xlane.xlu1 %132 }
 0x145   :  { %10833 = vrsqrt.f32 %v139_v50  ;;  %v137_v53 = vmul.f32 0.03125, %v133_v52  ;;  %v8586_v50 = vld [vmem:[%s12743_s8 + $0x20] sm:$0xff] }
 0x146   :  { %10835 = vrsqrt.f32 %v140_v51  ;;  %v8587_v51 = vld [vmem:[%s12743_s8 + $0x28] sm:$0xff] }
 0x147   :  { %v141_v54 = vadd.f32 1e-12, %v137_v53  ;;  %v10392_v52 = vpack.c.bf16 %v8587_v51, %v8586_v50  ;;  %v8588_v53 = vld [vmem:[%s12743_s8 + $0x30] sm:$0xff] }
 0x149   :  { %10837 = vrsqrt.f32 %v141_v54  ;;  %v8589_v54 = vld [vmem:[%s12743_s8 + $0x38] sm:$0xff] }
 0x14b   :  { %v10832_v55 = vpop.eup %10831 }
 0x14c   :  { %v146_v57 = vmul.f32 %v10832_v55, %v114_v12  ;;  %v8544_v12 = vld [vmem:[%s12746_s3] ss:$0 sm:$0xff]  ;;  %v10396_v55 = vpack.c.bf16 %v8589_v54, %v8588_v53 }
 0x14e   :  { %v156_v59 = vmul.f32 %v8537_v56, %v146_v57  ;;  %v11373_v57 = vld [vmem:[%s12751_s2] sm:$0xff] }
 0x14f   :  { %v10834_v60 = vpop.eup %10833 }
 0x150   :  { %v10836_v61 = vpop.eup %10835  ;;  %v11255_v62 = vadd.f32 %v8538_v58, %v156_v59  ;;  %v147_v63 = vmul.f32 %v10834_v60, %v115_v20 }
 0x151   :  { %v148_v0 = vmul.f32 %v10836_v61, %v11207_v13  ;;  %v8539_v13 = vld [vmem:[%s12747_s0] ss:$0 sm:$0xff] }
 0x152   :  { %v157_v1 = vmul.f32 %v8537_v56, %v147_v63  ;;  %9503 = vmatprep.mubr.msk.f32.mxu0 %vm96_vm0, %v11255_v62  ;;  %9517 = vmatprep.mubr.msk.f32.mxu1 %vm96_vm0, %v11255_v62  ;;  %v11380_v63 = vld [vmem:[%s12751_s2 + $0x18] sm:$0xff] }
 0x153   :  { %v10838_v4 = vpop.eup %10837  ;;  %v158_v5 = vmul.f32 %v8537_v56, %v148_v0 }
 0x154   :  { %v11268_v6 = vadd.f32 %v8538_v58, %v157_v1  ;;  %v149_v7 = vmul.f32 %v10838_v4, %v11211_v21  ;;  %v11386_v1 = vld [vmem:[%s12751_s2 + $0x10] sm:$0xff] }
 0x155   :  { %v11271_v8 = vadd.f32 %v8538_v58, %v158_v5 }
 0x156   :  { %v159_v10 = vmul.f32 %v8537_v56, %v149_v7  ;;  %9504 = vmatmul.mubr.msk.f32.vlgmr.msra.gmra.mrb[0].mxu0 %vm96_vm0, %v11268_v6  ;;  %9518 = vmatmul.mubr.msk.f32.vlgmr.msra.gmra.mrb[0].mxu1 %vm96_vm0, %v11268_v6  ;;  %v11368_v56 = vld [vmem:[%s12751_s2 + $0x8] sm:$0xff] }
 0x157   :  { %9506 = vmatprep.mubr.msk.f32.mxu0 %vm96_vm0, %v11271_v8  ;;  %9520 = vmatprep.mubr.msk.f32.mxu1 %vm96_vm0, %v11271_v8 }
 0x158   :  { %v11281_v11 = vadd.f32 %v8538_v58, %v159_v10  ;;  %10351 = vmatpush3.bf16.msra.mxu0 %v10348_v42  ;;  %v8568_v42 = vld [vmem:[%s12741_s7 + $0x30] sm:$0xff] }
 0x159   :  { %10353 = vmatprep.subr.bf16.mxu0 %v10352_v9  ;;  %v10380_v48 = vpack.c.bf16 %v8569_v43, %v8568_v42 }
 0x15a   :  { %9507 = vmatmul.mubr.msk.f32.gmra.mrb[2].mxu0 %vm96_vm0, %v11281_v11  ;;  %9521 = vmatmul.mubr.msk.f32.gmra.mrb[2].mxu1 %vm96_vm0, %v11281_v11 }
 0x15b   :  { %9531 = vmatprep.mubr.msk.f32.mxu0 %vm96_vm0, %v11255_v62 }
 0x15c   :  { %10355 = vmatpush3.bf16.msra.mxu0 %v10352_v9 }
 0x15f   :  { %9532 = vmatmul.mubr.msk.f32.vlgmr.msra.gmra.mrb[4].mxu0 %vm96_vm0, %v11268_v6 }
 0x160   :  { %9534 = vmatprep.mubr.msk.f32.mxu0 %vm96_vm0, %v11271_v8 }
 0x163   :  { %9535 = vmatmul.mubr.msk.f32.gmra.mrb[6].mxu0 %vm96_vm0, %v11281_v11 }
 0x229   :  { %v9505_v14 = vpop.f32.mrb[0].mxu0  ;;  %v9519_v15 = vpop.f32.mrb[0].mxu1 }
 0x22a   :  { %v365_v16 = vadd.f32 %v9519_v15, %v8544_v12  ;;  %v263_v17 = vpop.f32.mrb[1].mxu0  ;;  %v359_v18 = vpop.f32.mrb[1].mxu1  ;;  %v269_v39 = vadd.f32 %v9505_v14, %v8539_v13 }
 0x22b   :  { %v264_v19 = vadd.f32 %v8539_v13, %v263_v17  ;;  %v360_v20 = vadd.f32 %v8544_v12, %v359_v18 }
 0x22d   :  { %v10356_v22 = vpack.c.bf16 %v365_v16, %v360_v20  ;;  %v9508_v23 = vpop.f32.mrb[2].mxu0  ;;  %v9522_v24 = vpop.f32.mrb[2].mxu1  ;;  %9541 = vmatprep.mubr.msk.f32.mxu1 %vm474_vm1, %v264_v19 }
 0x22e   :  { %v375_v25 = vadd.f32 %v9522_v24, %v8544_v12  ;;  %v273_v26 = vpop.f32.mrb[3].mxu0  ;;  %v369_v27 = vpop.f32.mrb[3].mxu1  ;;  %v279_v47 = vadd.f32 %v9508_v23, %v8539_v13 }
 0x22f   :  { %v274_v30 = vadd.f32 %v8539_v13, %v273_v26  ;;  %v370_v31 = vadd.f32 %v8544_v12, %v369_v27  ;;  %10358 = vmatprep.subr.msk.bf16.mxu1 %vm11303_vm2, %v10356_v22  ;;  %v8571_v12 = vld [vmem:[%s12747_s0 + $0x1] ss:$0 sm:$0xff] }
 0x230   :  { %10361 = vmatpush3.bf16.xpose.msk.msra.mxu1 %vm11303_vm2, %v10356_v22  ;;  %v8591_v22 = vld [vmem:[%s12750_s9 + $0x1] ss:$0 sm:$0xff] }
 0x231   :  { %v10362_v33 = vpack.c.bf16 %v375_v25, %v370_v31  ;;  %9548 = vmatprep.mubr.msk.f32.mxu0 %vm474_vm1, %v274_v30 }
 0x232   :  { %v9533_v35 = vpop.f32.mrb[4].mxu0 }
 0x233   :  { %v461_v36 = vadd.f32 %v9533_v35, %v8549_v32  ;;  %v455_v37 = vpop.f32.mrb[5].mxu0  ;;  %10364 = vmatprep.subr.msk.bf16.mxu0 %vm11303_vm2, %v10362_v33 }
 0x234   :  { %v456_v38 = vadd.f32 %v8549_v32, %v455_v37  ;;  %10367 = vmatpush3.bf16.xpose.msk.msra.mxu0 %vm11303_vm2, %v10362_v33 }
 0x235   :  { %10377 = vmatprep.subr.bf16.mxu0 %v10376_v34 }
 0x236   :  { %v10368_v40 = vpack.c.bf16 %v461_v36, %v456_v38  ;;  %v9536_v41 = vpop.f32.mrb[6].mxu0 }
 0x237   :  { %v471_v44 = vadd.f32 %v9536_v41, %v8549_v32  ;;  %v465_v45 = vpop.f32.mrb[7].mxu0  ;;  %9542 = vmatmul.mubr.msk.f32.vlgmr.msra.gmra.mrb[4].mxu1 %vm474_vm1, %v269_v39 }
 0x238   :  { %v466_v46 = vadd.f32 %v8549_v32, %v465_v45  ;;  %10369 = vmatprep.subr.bf16.mxu1 %v10368_v40 }
 0x239   :  { %10371 = vmatpush3.bf16.msra.mxu1 %v10368_v40 }
 0x23a   :  { %v11333_v49 = vpack.c.bf16 %v471_v44, %v466_v46 }
 0x23b   :  { %9549 = vmatmul.mubr.msk.f32.vlgmr.msra.gmra.mrb[8].mxu0 %vm474_vm1, %v279_v47 }
 0x23c   :  { %10373 = vmatprep.subr.bf16.mxu1 %v11333_v49  ;;  %10379 = vmatpush3.bf16.msra.mxu0 %v10376_v34 }
 0x23d   :  { %9573 = vmatprep.mubr.msk.f32.mxu0 %vm96_vm0, %v11255_v62  ;;  %10381 = vmatprep.subr.bf16.mxu0 %v10380_v48 }
 0x240   :  { %10383 = vmatpush3.bf16.msra.mxu0 %v10380_v48 }
 0x241   :  { %10393 = vmatprep.subr.bf16.mxu0 %v10392_v52 }
 0x243   :  { %9574 = vmatmul.mubr.msk.f32.vlgmr.msra.gmra.mrb[10].mxu0 %vm96_vm0, %v11268_v6 }
 0x244   :  { %9576 = vmatprep.mubr.msk.f32.mxu0 %vm96_vm0, %v11271_v8  ;;  %10395 = vmatpush3.bf16.msra.mxu0 %v10392_v52 }
 0x245   :  { %10397 = vmatprep.subr.bf16.mxu0 %v10396_v55 }
 0x247   :  { %9577 = vmatmul.mubr.msk.f32.gmra.mrb[12].mxu0 %vm96_vm0, %v11281_v11 }
 0x248   :  { %10399 = vmatpush3.bf16.msra.mxu0 %v10396_v55  ;;  %9601 = vmatprep.mubr.msk.f32.mxu0 %vm96_vm0, %v11255_v62 }
 0x24b   :  { %9602 = vmatmul.mubr.msk.f32.vlgmr.msra.gmra.mrb[14].mxu0 %vm96_vm0, %v11268_v6 }
 0x24c   :  { %9604 = vmatprep.mubr.msk.f32.mxu0 %vm96_vm0, %v11271_v8 }
 0x24f   :  { %9605 = vmatmul.mubr.msk.f32.gmra.mrb[16].mxu0 %vm96_vm0, %v11281_v11 }
 0x30a   :  { %v9543_v58 = vpop.f32.mrb[4].mxu1 }
 0x30b   :  { %v559_v59 = vadd.f32 %v9543_v58, %v11368_v56  ;;  %v553_v60 = vpop.f32.mrb[5].mxu1 }
 0x30c   :  { %v554_v61 = vadd.f32 %v553_v60, %v11373_v57 }
 0x30d   :  { %v653_v0 = vsel %vm649_vm3, %v559_v59, -inf }
 0x30e   :  { %654 = vmax.xlane.f32.xlu1 %v653_v0  ;;  %v9550_v2 = vpop.f32.mrb[8].mxu0  ;;  %v650_v3 = vsel %vm649_vm3, %v554_v61, -inf  ;;  %v8577_v0 = vld [vmem:[%s12742_s5 + $0x28] sm:$0xff] }
 0x30f   :  { %v646_v4 = vadd.f32 %v9550_v2, %v11380_v63  ;;  %651 = vmax.xlane.f32.xlu0 %v650_v3  ;;  %v640_v5 = vpop.f32.mrb[9].mxu0 }
 0x310   :  { %v641_v7 = vadd.f32 %v640_v5, %v11386_v1 }
 0x311   :  { %v659_v9 = vsel %vm649_vm3, %v646_v4, -inf }
 0x312   :  { %660 = vmax.xlane.f32.xlu1 %v659_v9  ;;  %v656_v10 = vsel %vm649_vm3, %v641_v7, -inf  ;;  %v8578_v9 = vld [vmem:[%s12742_s5 + $0x30] sm:$0xff] }
 0x313   :  { %657 = vmax.xlane.f32.xlu0 %v656_v10  ;;  %v8579_v10 = vld [vmem:[%s12742_s5 + $0x38] sm:$0xff] }
 0x316   :  { %v9575_v13 = vpop.f32.mrb[10].mxu0 }
 0x317   :  { %v11396_v14 = vadd.f32 %v9575_v13, %v8571_v12  ;;  %v936_v15 = vpop.f32.mrb[11].mxu0 }
 0x318   :  { %v11398_v16 = vadd.f32 %v8571_v12, %v936_v15 }
 0x31a   :  { %v9578_v17 = vpop.f32.mrb[12].mxu0 }
 0x31b   :  { %v11400_v18 = vadd.f32 %v9578_v17, %v8571_v12  ;;  %v946_v19 = vpop.f32.mrb[13].mxu0  ;;  %v10388_v17 = vpack.c.bf16 %v8579_v10, %v8578_v9 }
 0x31c   :  { %v947_v20 = vadd.f32 %v8571_v12, %v946_v19 }
 0x31e   :  { %v9603_v23 = vpop.f32.mrb[14].mxu0  ;;  %9618 = vmatprep.mubr.msk.f32.mxu0 %vm474_vm1, %v947_v20 }
 0x31f   :  { %v1138_v24 = vadd.f32 %v9603_v23, %v8591_v22  ;;  %v1132_v25 = vpop.f32.mrb[15].mxu0  ;;  %v8581_v23 = vld [vmem:[%s12746_s3 + $0x1] ss:$0 sm:$0xff] }
 0x320   :  { %v1133_v26 = vadd.f32 %v8591_v22, %v1132_v25 }
 0x322   :  { %v11406_v27 = vpack.c.bf16 %v1138_v24, %v1133_v26  ;;  %v9606_v28 = vpop.f32.mrb[16].mxu0 }
 0x323   :  { %v1148_v29 = vadd.f32 %v9606_v28, %v8591_v22  ;;  %v1142_v30 = vpop.f32.mrb[17].mxu0 }
 0x324   :  { %v1143_v31 = vadd.f32 %v8591_v22, %v1142_v30 }
 0x326   :  { %v11408_v32 = vpack.c.bf16 %v1148_v29, %v1143_v31 }
 0x39b   :  { %v655_v33 = vpop.xlane.xlu1 %654 }
 0x39c   :  { %v663_v34 = vsub.f32 %v559_v59, %v655_v33  ;;  %v652_v35 = vpop.xlane.xlu0 %651 }
 0x39d   :  { %v662_v36 = vsub.f32 %v554_v61, %v652_v35  ;;  %v8576_v61 = vld [vmem:[%s12742_s5 + $0x20] sm:$0xff] }
 0x39e   :  { %v668_v37 = vmul.f32 1.442695, %v663_v34  ;;  %v10384_v5 = vpack.c.bf16 %v8577_v0, %v8576_v61 }
 0x39f   :  { %v666_v38 = vmul.f32 1.442695, %v662_v36  ;;  %v661_v39 = vpop.xlane.xlu1 %660 }
 0x3a0   :  { %10839 = vpow2.f32 %v668_v37  ;;  %v665_v40 = vsub.f32 %v646_v4, %v661_v39  ;;  %v658_v41 = vpop.xlane.xlu0 %657 }
 0x3a1   :  { %10841 = vpow2.f32 %v666_v38  ;;  %v664_v42 = vsub.f32 %v641_v7, %v658_v41 }
 0x3a2   :  { %v672_v43 = vmul.f32 1.442695, %v665_v40 }
 0x3a3   :  { %v670_v44 = vmul.f32 1.442695, %v664_v42 }
 0x3a4   :  { %10843 = vpow2.f32 %v672_v43 }
 0x3a5   :  { %10845 = vpow2.f32 %v670_v44 }
 0x3aa   :  { %v10840_v45 = vpop.eup %10839 }
 0x3ab   :  { %v10842_v46 = vpop.eup %10841  ;;  %v677_v47 = vsel %vm649_vm3, %v10840_v45, 0.0 }
 0x3ac   :  { %678 = vadd.xlane.f32.xlu1 %v677_v47  ;;  %v674_v48 = vsel %vm649_vm3, %v10842_v46, 0.0 }
 0x3ad   :  { %675 = vadd.xlane.f32.xlu0 %v674_v48 }
 0x3ae   :  { %v10844_v50 = vpop.eup %10843 }
 0x3af   :  { %v10846_v51 = vpop.eup %10845  ;;  %v683_v52 = vsel %vm649_vm3, %v10844_v50, 0.0 }
 0x3b0   :  { %684 = vadd.xlane.f32.xlu1 %v683_v52  ;;  %v680_v53 = vsel %vm649_vm3, %v10846_v51, 0.0 }
 0x3b1   :  { %681 = vadd.xlane.f32.xlu0 %v680_v53 }
 0x439   :  { %v679_v54 = vpop.xlane.xlu1 %678 }
 0x43a   :  { %10847 = vrcp.f32 %v679_v54  ;;  %v676_v55 = vpop.xlane.xlu0 %675 }
 0x43b   :  { %10849 = vrcp.f32 %v676_v55 }
 0x43d   :  { %v685_v58 = vpop.xlane.xlu1 %684 }
 0x43e   :  { %10851 = vrcp.f32 %v685_v58  ;;  %v682_v59 = vpop.xlane.xlu0 %681 }
 0x43f   :  { %10853 = vrcp.f32 %v682_v59 }
 0x444   :  { %v10848_v60 = vpop.eup %10847 }
 0x445   :  { %v10850_v2 = vpop.eup %10849  ;;  %v691_v4 = vmul.f32 %v10848_v60, %v10840_v45 }
 0x446   :  { %v690_v3 = vmul.f32 %v10850_v2, %v10842_v46 }
 0x448   :  { %v10852_v7 = vpop.eup %10851  ;;  %9555 = vmatprep.mubr.msk.f32.mxu1 %vm649_vm3, %v690_v3 }
 0x449   :  { %v10854_v12 = vpop.eup %10853  ;;  %9556 = vmatmul.mubr.msk.f32.vlgmr.msra.gmra.mrb[6].mxu1 %vm649_vm3, %v691_v4  ;;  %v693_v15 = vmul.f32 %v10852_v7, %v10844_v50 }
 0x44a   :  { %10375 = vmatpush3.bf16.msra.mxu1 %v11333_v49  ;;  %v692_v13 = vmul.f32 %v10854_v12, %v10846_v51 }
 0x44b   :  { %10385 = vmatprep.subr.bf16.mxu1 %v10384_v5 }
 0x44c   :  { %9562 = vmatprep.mubr.msk.f32.mxu1 %vm649_vm3, %v692_v13 }
 0x44d   :  { %9563 = vmatmul.mubr.msk.f32.vlgmr.msra.gmra.mrb[8].mxu1 %vm649_vm3, %v693_v15  ;;  %v8617_v15 = vld [vmem:[%s12741_s7 + $0x40] sm:$0xff] }
 0x44e   :  { %10387 = vmatpush3.bf16.msra.mxu1 %v10384_v5  ;;  %9587 = vmatprep.mubr.msk.f32.mxu1 %vm96_vm0, %v11255_v62 }
 0x44f   :  { %10389 = vmatprep.subr.bf16.mxu1 %v10388_v17 }
 0x452   :  { %10391 = vmatpush3.bf16.msra.mxu1 %v10388_v17  ;;  %v8618_v17 = vld [vmem:[%s12741_s7 + $0x48] sm:$0xff] }
 0x455   :  { %9588 = vmatmul.mubr.msk.f32.vlgmr.msra.gmra.mrb[10].mxu1 %vm96_vm0, %v11268_v6 }
 0x456   :  { %9590 = vmatprep.mubr.msk.f32.mxu1 %vm96_vm0, %v11271_v8 }
 0x459   :  { %9591 = vmatmul.mubr.msk.f32.gmra.mrb[12].mxu1 %vm96_vm0, %v11281_v11 }
 0x45a   :  { %9611 = vmatprep.mubr.msk.f32.mxu1 %vm474_vm1, %v11398_v16 }
 0x51c   :  { %v11441_v49 = vpop.f32.mrb[6].mxu1 }
 0x51d   :  { %v11443_v19 = vpop.f32.mrb[7].mxu1 }
 0x520   :  { %v11445_v20 = vpop.f32.mrb[8].mxu1 }
 0x521   :  { %v11447_v22 = vpop.f32.mrb[9].mxu1 }
 0x528   :  { %v9589_v24 = vpop.f32.mrb[10].mxu1 }
 0x529   :  { %v1040_v25 = vadd.f32 %v9589_v24, %v8581_v23  ;;  %v1034_v26 = vpop.f32.mrb[11].mxu1 }
 0x52a   :  { %v1035_v28 = vadd.f32 %v8581_v23, %v1034_v26  ;;  %v10420_v26 = vpack.c.bf16 %v8618_v17, %v8617_v15 }
 0x52c   :  { %v10400_v29 = vpack.c.bf16 %v1040_v25, %v1035_v28  ;;  %v9592_v30 = vpop.f32.mrb[12].mxu1 }
 0x52d   :  { %v1050_v31 = vadd.f32 %v9592_v30, %v8581_v23  ;;  %v1044_v16 = vpop.f32.mrb[13].mxu1  ;;  %v8620_v30 = vld [vmem:[%s12741_s7 + $0x58] sm:$0xff] }
 0x52e   :  { %v1045_v33 = vadd.f32 %v8581_v23, %v1044_v16  ;;  %10402 = vmatprep.subr.msk.bf16.mxu1 %vm11303_vm2, %v10400_v29 }
 0x52f   :  { %10405 = vmatpush3.bf16.xpose.msk.msra.mxu1 %vm11303_vm2, %v10400_v29  ;;  %v8619_v29 = vld [vmem:[%s12741_s7 + $0x50] sm:$0xff] }
 0x530   :  { %v10406_v34 = vpack.c.bf16 %v1050_v31, %v1045_v33  ;;  %10413 = vmatprep.subr.bf16.mxu1 %v11406_v27 }
 0x532   :  { %10408 = vmatprep.subr.msk.bf16.mxu0 %vm11303_vm2, %v10406_v34 }
 0x533   :  { %10411 = vmatpush3.bf16.xpose.msk.msra.mxu0 %vm11303_vm2, %v10406_v34  ;;  %v10424_v34 = vpack.c.bf16 %v8620_v30, %v8619_v29 }
 0x536   :  { %9612 = vmatmul.mubr.msk.f32.vlgmr.msra.gmra.mrb[14].mxu1 %vm474_vm1, %v11396_v14 }
 0x537   :  { %10415 = vmatpush3.bf16.msra.mxu1 %v11406_v27 }
 0x538   :  { %10417 = vmatprep.subr.bf16.mxu1 %v11408_v32 }
 0x53a   :  { %9619 = vmatmul.mubr.msk.f32.vlgmr.msra.gmra.mrb[18].mxu0 %vm474_vm1, %v11400_v18 }
 0x609   :  { %v9613_v35 = vpop.f32.mrb[14].mxu1 }
 0x60a   :  { %v1235_v36 = vadd.f32 %v9613_v35, %v11368_v56  ;;  %v1229_v37 = vpop.f32.mrb[15].mxu1  ;;  %v8627_v35 = vld [vmem:[%s12742_s5 + $0x40] sm:$0xff] }
 0x60b   :  { %v1230_v38 = vadd.f32 %v1229_v37, %v11373_v57  ;;  %v8629_v37 = vld [vmem:[%s12742_s5 + $0x50] sm:$0xff] }
 0x60c   :  { %v1328_v39 = vsel %vm649_vm3, %v1235_v36, -inf }
 0x60d   :  { %v9620_v40 = vpop.f32.mrb[18].mxu0  ;;  %1329 = vmax.xlane.f32.xlu1 %v1328_v39  ;;  %v1325_v41 = vsel %vm649_vm3, %v1230_v38, -inf }
 0x60e   :  { %v1322_v14 = vadd.f32 %v9620_v40, %v11380_v63  ;;  %v1316_v27 = vpop.f32.mrb[19].mxu0  ;;  %1326 = vmax.xlane.f32.xlu0 %v1325_v41  ;;  %v8608_v40 = vld [vmem:[%s12752_s11 + $0x8] sm:$0xff]  ;;  %v856_v41 = vld [vmem:[%s12752_s11] sm:$0xff] }
 0x60f   :  { %v1317_v42 = vadd.f32 %v1316_v27, %v11386_v1  ;;  %9635 = vmatprep.subr.mxu0 %v8608_v40  ;;  %v8638_v27 = vld [vmem:[%s12743_s8 + $0x48] sm:$0xff] }
 0x610   :  { %v1334_v18 = vsel %vm649_vm3, %v1322_v14, -inf  ;;  %9636 = vmatpush3.msra.mxu0 %v8608_v40 }
 0x611   :  { %1335 = vmax.xlane.f32.xlu1 %v1334_v18  ;;  %v1331_v43 = vsel %vm649_vm3, %v1317_v42, -inf  ;;  %9643 = vmatprep.subr.mxu0 %v856_v41 }
 0x612   :  { %1332 = vmax.xlane.f32.xlu0 %v1331_v43 }
 0x69a   :  { %v1330_v44 = vpop.xlane.xlu1 %1329 }
 0x69b   :  { %v1338_v45 = vsub.f32 %v1235_v36, %v1330_v44  ;;  %v1327_v46 = vpop.xlane.xlu0 %1326  ;;  %v8628_v36 = vld [vmem:[%s12742_s5 + $0x48] sm:$0xff] }
 0x69c   :  { %v1337_v47 = vsub.f32 %v1230_v38, %v1327_v46  ;;  %v8630_v38 = vld [vmem:[%s12742_s5 + $0x58] sm:$0xff]  ;;  %v8639_v46 = vld [vmem:[%s12743_s8 + $0x50] sm:$0xff] }
 0x69d   :  { %v1343_v48 = vmul.f32 1.442695, %v1338_v45  ;;  %v10432_v39 = vpack.c.bf16 %v8630_v38, %v8629_v37 }
 0x69e   :  { %v1341_v50 = vmul.f32 1.442695, %v1337_v47  ;;  %v1336_v51 = vpop.xlane.xlu1 %1335  ;;  %v8640_v47 = vld [vmem:[%s12743_s8 + $0x58] sm:$0xff] }
 0x69f   :  { %10855 = vpow2.f32 %v1343_v48  ;;  %v1340_v52 = vsub.f32 %v1322_v14, %v1336_v51  ;;  %v1333_v53 = vpop.xlane.xlu0 %1332  ;;  %v8637_v14 = vld [vmem:[%s12743_s8 + $0x40] sm:$0xff]  ;;  %v10440_v48 = vpack.c.bf16 %v8640_v47, %v8639_v46 }
 0x6a0   :  { %10857 = vpow2.f32 %v1341_v50  ;;  %v1339_v54 = vsub.f32 %v1317_v42, %v1333_v53  ;;  %v10436_v43 = vpack.c.bf16 %v8638_v27, %v8637_v14  ;;  %v8622_v50 = vld [vmem:[%s12747_s0 + $0x2] ss:$0 sm:$0xff] }
 0x6a1   :  { %v1347_v55 = vmul.f32 1.442695, %v1340_v52 }
 0x6a2   :  { %v1345_v58 = vmul.f32 1.442695, %v1339_v54  ;;  %v8632_v54 = vld [vmem:[%s12746_s3 + $0x2] ss:$0 sm:$0xff] }
 0x6a3   :  { %10859 = vpow2.f32 %v1347_v55 }
 0x6a4   :  { %10861 = vpow2.f32 %v1345_v58 }
 0x6a9   :  { %v10856_v59 = vpop.eup %10855 }
 0x6aa   :  { %v10858_v60 = vpop.eup %10857  ;;  %v1352_v61 = vsel %vm649_vm3, %v10856_v59, 0.0 }
 0x6ab   :  { %1353 = vadd.xlane.f32.xlu1 %v1352_v61  ;;  %v1349_v0 = vsel %vm649_vm3, %v10858_v60, 0.0 }
 0x6ac   :  { %1350 = vadd.xlane.f32.xlu0 %v1349_v0 }
 0x6ad   :  { %v10860_v2 = vpop.eup %10859 }
 0x6ae   :  { %v10862_v3 = vpop.eup %10861  ;;  %v1358_v4 = vsel %vm649_vm3, %v10860_v2, 0.0 }
 0x6af   :  { %1359 = vadd.xlane.f32.xlu1 %v1358_v4  ;;  %v1355_v5 = vsel %vm649_vm3, %v10862_v3, 0.0 }
 0x6b0   :  { %1356 = vadd.xlane.f32.xlu0 %v1355_v5 }
 0x738   :  { %v1354_v7 = vpop.xlane.xlu1 %1353 }
 0x739   :  { %10863 = vrcp.f32 %v1354_v7  ;;  %v1351_v9 = vpop.xlane.xlu0 %1350 }
 0x73a   :  { %10865 = vrcp.f32 %v1351_v9  ;;  %v8642_v9 = vld [vmem:[%s12750_s9 + $0x2] ss:$0 sm:$0xff] }
 0x73c   :  { %v1360_v10 = vpop.xlane.xlu1 %1359 }
 0x73d   :  { %10867 = vrcp.f32 %v1360_v10  ;;  %v1357_v12 = vpop.xlane.xlu0 %1356 }
 0x73e   :  { %10869 = vrcp.f32 %v1357_v12 }
 0x743   :  { %v10864_v13 = vpop.eup %10863 }
 0x744   :  { %v10866_v23 = vpop.eup %10865  ;;  %v1366_v25 = vmul.f32 %v10864_v13, %v10856_v59 }
 0x745   :  { %v1365_v24 = vmul.f32 %v10866_v23, %v10858_v60 }
 0x747   :  { %v10868_v28 = vpop.eup %10867  ;;  %9625 = vmatprep.mubr.msk.f32.mxu1 %vm649_vm3, %v1365_v24 }
 0x748   :  { %v10870_v31 = vpop.eup %10869  ;;  %9626 = vmatmul.mubr.msk.f32.vlgmr.msra.gmra.mrb[16].mxu1 %vm649_vm3, %v1366_v25  ;;  %v1368_v33 = vmul.f32 %v10868_v28, %v10860_v2 }
 0x749   :  { %10419 = vmatpush3.bf16.msra.mxu1 %v11408_v32  ;;  %v1367_v16 = vmul.f32 %v10870_v31, %v10862_v3  ;;  %v10428_v32 = vpack.c.bf16 %v8628_v36, %v8627_v35 }
 0x74a   :  { %10421 = vmatprep.subr.bf16.mxu1 %v10420_v26 }
 0x74b   :  { %9632 = vmatprep.mubr.msk.f32.mxu1 %vm649_vm3, %v1367_v16 }
 0x74c   :  { %9633 = vmatmul.mubr.msk.f32.vlgmr.msra.gmra.mrb[18].mxu1 %vm649_vm3, %v1368_v33 }
 0x74d   :  { %10423 = vmatpush3.bf16.msra.mxu1 %v10420_v26  ;;  %9659 = vmatprep.mubr.msk.f32.mxu1 %vm96_vm0, %v11255_v62 }
 0x74e   :  { %10425 = vmatprep.subr.bf16.mxu1 %v10424_v34 }
 0x751   :  { %10427 = vmatpush3.bf16.msra.mxu1 %v10424_v34 }
 0x752   :  { %10429 = vmatprep.subr.bf16.mxu1 %v10428_v32 }
 0x754   :  { %9660 = vmatmul.mubr.msk.f32.vlgmr.msra.gmra.mrb[20].mxu1 %vm96_vm0, %v11268_v6 }
 0x755   :  { %9662 = vmatprep.mubr.msk.f32.mxu1 %vm96_vm0, %v11271_v8  ;;  %10431 = vmatpush3.bf16.msra.mxu1 %v10428_v32 }
 0x756   :  { %10433 = vmatprep.subr.bf16.mxu1 %v10432_v39 }
 0x758   :  { %9663 = vmatmul.mubr.msk.f32.gmra.mrb[22].mxu1 %vm96_vm0, %v11281_v11 }
 0x759   :  { %10435 = vmatpush3.bf16.msra.mxu1 %v10432_v39  ;;  %9673 = vmatprep.mubr.msk.f32.mxu1 %vm96_vm0, %v11255_v62 }
 0x75c   :  { %9674 = vmatmul.mubr.msk.f32.vlgmr.msra.gmra.mrb[24].mxu1 %vm96_vm0, %v11268_v6 }
 0x75d   :  { %9676 = vmatprep.mubr.msk.f32.mxu1 %vm96_vm0, %v11271_v8 }
 0x760   :  { %9677 = vmatmul.mubr.msk.f32.gmra.mrb[26].mxu1 %vm96_vm0, %v11281_v11 }
 0x81b   :  { %v9627_v42 = vpop.f32.mrb[16].mxu1 }
 0x81c   :  { %v1441_v18 = vpop.f32.mrb[17].mxu1 }
 0x81d   :  { %9637 = vmatprep.mubr.msk.f32.mxu0 %vm474_vm1, %v1441_v18 }
 0x81e   :  { %9638 = vmatmul.mubr.msk.f32.vlgmr.msra.gmra.mrb[20].mxu0 %vm474_vm1, %v9627_v42 }
 0x81f   :  { %v9634_v44 = vpop.f32.mrb[18].mxu1  ;;  %9644 = vmatpush3.msra.mxu0 %v856_v41 }
 0x820   :  { %v1522_v45 = vpop.f32.mrb[19].mxu1  ;;  %10437 = vmatprep.subr.bf16.mxu0 %v10436_v43 }
 0x821   :  { %9640 = vmatprep.mubr.msk.f32.mxu0 %vm474_vm1, %v1522_v45 }
 0x822   :  { %9641 = vmatmul.mubr.msk.f32.gmra.mrb[22].mxu0 %vm474_vm1, %v9634_v44 }
 0x823   :  { %9645 = vmatprep.mubr.msk.f32.mxu0 %vm474_vm1, %v11443_v19 }
 0x826   :  { %9646 = vmatmul.mubr.msk.f32.vlgmr.msra.gmra.mrb[20].mxu0 %vm474_vm1, %v11441_v49 }
 0x827   :  { %v9661_v51 = vpop.f32.mrb[20].mxu1  ;;  %9648 = vmatprep.mubr.msk.f32.mxu0 %vm474_vm1, %v11447_v22  ;;  %10439 = vmatpush3.bf16.msra.mxu0 %v10436_v43 }
 0x828   :  { %v1806_v52 = vpop.f32.mrb[21].mxu1  ;;  %10441 = vmatprep.subr.bf16.mxu0 %v10440_v48  ;;  %v1812_v5 = vadd.f32 %v9661_v51, %v8622_v50 }
 0x829   :  { %v1807_v53 = vadd.f32 %v8622_v50, %v1806_v52 }
 0x82a   :  { %9649 = vmatmul.mubr.msk.f32.gmra.mrb[22].mxu0 %vm474_vm1, %v11445_v20 }
 0x82b   :  { %v9664_v19 = vpop.f32.mrb[22].mxu1  ;;  %9697 = vmatprep.mubr.msk.f32.mxu1 %vm474_vm1, %v1807_v53  ;;  %10443 = vmatpush3.bf16.msra.mxu0 %v10440_v48 }
 0x82c   :  { %v1816_v49 = vpop.f32.mrb[23].mxu1  ;;  %9687 = vmatprep.mubr.msk.f32.mxu0 %vm96_vm0, %v11255_v62  ;;  %v1822_v7 = vadd.f32 %v9664_v19, %v8622_v50 }
 0x82d   :  { %v1817_v58 = vadd.f32 %v8622_v50, %v1816_v49 }
 0x82e   :  { %9688 = vmatmul.mubr.msk.f32.vlgmr.msra.gmra.mrb[24].mxu0 %vm96_vm0, %v11268_v6 }
 0x82f   :  { %v9675_v22 = vpop.f32.mrb[24].mxu1  ;;  %9690 = vmatprep.mubr.msk.f32.mxu0 %vm96_vm0, %v11271_v8 }
 0x830   :  { %v1910_v20 = vadd.f32 %v9675_v22, %v8632_v54  ;;  %v1904_v55 = vpop.f32.mrb[25].mxu1 }
 0x831   :  { %v1905_v59 = vadd.f32 %v8632_v54, %v1904_v55  ;;  %v8665_v55 = vld [vmem:[%s12741_s7 + $0x68] sm:$0xff] }
 0x832   :  { %9691 = vmatmul.mubr.msk.f32.gmra.mrb[26].mxu0 %vm96_vm0, %v11281_v11 }
 0x833   :  { %v10444_v60 = vpack.c.bf16 %v1910_v20, %v1905_v59  ;;  %v9678_v61 = vpop.f32.mrb[26].mxu1  ;;  %9704 = vmatprep.mubr.msk.f32.mxu0 %vm474_vm1, %v1817_v58  ;;  %v8664_v20 = vld [vmem:[%s12741_s7 + $0x60] sm:$0xff]  ;;  %v8659_v59 = vld [vmem:[%s12752_s11 + $0x10] sm:$0xff] }
 0x834   :  { %v1920_v0 = vadd.f32 %v9678_v61, %v8632_v54  ;;  %v1914_v2 = vpop.f32.mrb[27].mxu1  ;;  %v10464_v58 = vpack.c.bf16 %v8665_v55, %v8664_v20  ;;  %v8679_v20 = vld [vmem:[%s12746_s3 + $0x3] ss:$0 sm:$0xff] }
 0x835   :  { %v1915_v3 = vadd.f32 %v8632_v54, %v1914_v2  ;;  %10446 = vmatprep.subr.msk.bf16.mxu1 %vm11303_vm2, %v10444_v60 }
 0x836   :  { %10449 = vmatpush3.bf16.xpose.msk.msra.mxu1 %vm11303_vm2, %v10444_v60 }
 0x837   :  { %v10450_v4 = vpack.c.bf16 %v1920_v0, %v1915_v3 }
 0x839   :  { %10452 = vmatprep.subr.msk.bf16.mxu0 %vm11303_vm2, %v10450_v4 }
 0x83a   :  { %10455 = vmatpush3.bf16.xpose.msk.msra.mxu0 %vm11303_vm2, %v10450_v4  ;;  %v8666_v4 = vld [vmem:[%s12741_s7 + $0x70] sm:$0xff] }
 0x83d   :  { %9698 = vmatmul.mubr.msk.f32.vlgmr.msra.gmra.mrb[28].mxu1 %vm474_vm1, %v1812_v5  ;;  %v8667_v5 = vld [vmem:[%s12741_s7 + $0x78] sm:$0xff] }
 0x841   :  { %9705 = vmatmul.mubr.msk.f32.vlgmr.msra.gmra.mrb[28].mxu0 %vm474_vm1, %v1822_v7 }
 0x901   :  { %v9689_v10 = vpop.f32.mrb[24].mxu0 }
 0x902   :  { %v2008_v12 = vadd.f32 %v9689_v10, %v8642_v9  ;;  %v2002_v13 = vpop.f32.mrb[25].mxu0 }
 0x903   :  { %v2003_v15 = vadd.f32 %v8642_v9, %v2002_v13 }
 0x905   :  { %v10456_v17 = vpack.c.bf16 %v2008_v12, %v2003_v15  ;;  %v9692_v23 = vpop.f32.mrb[26].mxu0  ;;  %v10468_v12 = vpack.c.bf16 %v8667_v5, %v8666_v4  ;;  %v8684_v15 = vld [vmem:[%s12743_s8 + $0x60] sm:$0xff] }
 0x906   :  { %v2018_v24 = vadd.f32 %v9692_v23, %v8642_v9  ;;  %v2012_v25 = vpop.f32.mrb[27].mxu0 }
 0x907   :  { %v2013_v26 = vadd.f32 %v8642_v9, %v2012_v25  ;;  %10457 = vmatprep.subr.bf16.mxu1 %v10456_v17 }
 0x908   :  { %10459 = vmatpush3.bf16.msra.mxu1 %v10456_v17  ;;  %v8685_v17 = vld [vmem:[%s12743_s8 + $0x68] sm:$0xff] }
 0x909   :  { %v10460_v28 = vpack.c.bf16 %v2018_v24, %v2013_v26  ;;  %10465 = vmatprep.subr.bf16.mxu1 %v10464_v58  ;;  %v10480_v26 = vpack.c.bf16 %v8685_v17, %v8684_v15 }
 0x90b   :  { %10461 = vmatprep.subr.bf16.mxu0 %v10460_v28 }
 0x90c   :  { %10463 = vmatpush3.bf16.msra.mxu0 %v10460_v28  ;;  %v8686_v28 = vld [vmem:[%s12743_s8 + $0x70] sm:$0xff] }
 0x90d   :  { %9721 = vmatprep.subr.mxu0 %v8659_v59 }
 0x910   :  { %v9699_v29 = vpop.f32.mrb[28].mxu1 }
 0x911   :  { %v2105_v30 = vadd.f32 %v9699_v29, %v11368_v56  ;;  %v2099_v31 = vpop.f32.mrb[29].mxu1  ;;  %v8687_v29 = vld [vmem:[%s12743_s8 + $0x78] sm:$0xff] }
 0x912   :  { %v2100_v16 = vadd.f32 %v2099_v31, %v11373_v57  ;;  %v8674_v31 = vld [vmem:[%s12742_s5 + $0x60] sm:$0xff] }
 0x913   :  { %v2198_v33 = vsel %vm649_vm3, %v2105_v30, -inf }
 0x914   :  { %2199 = vmax.xlane.f32.xlu1 %v2198_v33  ;;  %v9706_v34 = vpop.f32.mrb[28].mxu0  ;;  %v2195_v35 = vsel %vm649_vm3, %v2100_v16, -inf }
 0x915   :  { %v2192_v36 = vadd.f32 %v9706_v34, %v11380_v63  ;;  %2196 = vmax.xlane.f32.xlu0 %v2195_v35  ;;  %v2186_v32 = vpop.f32.mrb[29].mxu0  ;;  %v8676_v34 = vld [vmem:[%s12742_s5 + $0x70] sm:$0xff]  ;;  %v8677_v35 = vld [vmem:[%s12742_s5 + $0x78] sm:$0xff] }
 0x916   :  { %v2187_v37 = vadd.f32 %v2186_v32, %v11386_v1 }
 0x917   :  { %v2204_v38 = vsel %vm649_vm3, %v2192_v36, -inf }
 0x918   :  { %2205 = vmax.xlane.f32.xlu1 %v2204_v38  ;;  %v2201_v39 = vsel %vm649_vm3, %v2187_v37, -inf }
 0x919   :  { %2202 = vmax.xlane.f32.xlu0 %v2201_v39 }
 0x9a1   :  { %v2200_v40 = vpop.xlane.xlu1 %2199 }
 0x9a2   :  { %v2208_v41 = vsub.f32 %v2105_v30, %v2200_v40  ;;  %v2197_v14 = vpop.xlane.xlu0 %2196  ;;  %v10484_v30 = vpack.c.bf16 %v8687_v29, %v8686_v28  ;;  %v8669_v40 = vld [vmem:[%s12747_s0 + $0x3] ss:$0 sm:$0xff] }
 0x9a3   :  { %v2207_v27 = vsub.f32 %v2100_v16, %v2197_v14  ;;  %v8675_v16 = vld [vmem:[%s12742_s5 + $0x68] sm:$0xff] }
 0x9a4   :  { %v2213_v42 = vmul.f32 1.442695, %v2208_v41  ;;  %v10472_v33 = vpack.c.bf16 %v8675_v16, %v8674_v31 }
 0x9a5   :  { %v2211_v18 = vmul.f32 1.442695, %v2207_v27  ;;  %v2206_v43 = vpop.xlane.xlu1 %2205 }
 0x9a6   :  { %10871 = vpow2.f32 %v2213_v42  ;;  %v2210_v44 = vsub.f32 %v2192_v36, %v2206_v43  ;;  %v2203_v45 = vpop.xlane.xlu0 %2202 }
 0x9a7   :  { %10873 = vpow2.f32 %v2211_v18  ;;  %v2209_v46 = vsub.f32 %v2187_v37, %v2203_v45  ;;  %v10476_v37 = vpack.c.bf16 %v8677_v35, %v8676_v34 }
 0x9a8   :  { %v2217_v47 = vmul.f32 1.442695, %v2210_v44 }
 0x9a9   :  { %v2215_v48 = vmul.f32 1.442695, %v2209_v46  ;;  %v8689_v46 = vld [vmem:[%s12750_s9 + $0x3] ss:$0 sm:$0xff] }
 0x9aa   :  { %10875 = vpow2.f32 %v2217_v47 }
 0x9ab   :  { %10877 = vpow2.f32 %v2215_v48 }
 0x9b0   :  { %v10872_v50 = vpop.eup %10871 }
 0x9b1   :  { %v10874_v51 = vpop.eup %10873  ;;  %v2222_v52 = vsel %vm649_vm3, %v10872_v50, 0.0 }
 0x9b2   :  { %2223 = vadd.xlane.f32.xlu1 %v2222_v52  ;;  %v2219_v53 = vsel %vm649_vm3, %v10874_v51, 0.0 }
 0x9b3   :  { %2220 = vadd.xlane.f32.xlu0 %v2219_v53 }
 0x9b4   :  { %v10876_v19 = vpop.eup %10875 }
 0x9b5   :  { %v10878_v49 = vpop.eup %10877  ;;  %v2228_v54 = vsel %vm649_vm3, %v10876_v19, 0.0 }
 0x9b6   :  { %2229 = vadd.xlane.f32.xlu1 %v2228_v54  ;;  %v2225_v22 = vsel %vm649_vm3, %v10878_v49, 0.0 }
 0x9b7   :  { %2226 = vadd.xlane.f32.xlu0 %v2225_v22 }
 0xa3f   :  { %v2224_v60 = vpop.xlane.xlu1 %2223 }
 0xa40   :  { %10879 = vrcp.f32 %v2224_v60  ;;  %v2221_v61 = vpop.xlane.xlu0 %2220 }
 0xa41   :  { %10881 = vrcp.f32 %v2221_v61 }
 0xa43   :  { %v2230_v0 = vpop.xlane.xlu1 %2229 }
 0xa44   :  { %10883 = vrcp.f32 %v2230_v0  ;;  %v2227_v2 = vpop.xlane.xlu0 %2226 }
 0xa45   :  { %10885 = vrcp.f32 %v2227_v2 }
 0xa4a   :  { %v10880_v3 = vpop.eup %10879 }
 0xa4b   :  { %v10882_v7 = vpop.eup %10881  ;;  %v2236_v10 = vmul.f32 %v10880_v3, %v10872_v50 }
 0xa4c   :  { %v2235_v9 = vmul.f32 %v10882_v7, %v10874_v51 }
 0xa4e   :  { %v10884_v13 = vpop.eup %10883  ;;  %9711 = vmatprep.mubr.msk.f32.mxu1 %vm649_vm3, %v2235_v9 }
 0xa4f   :  { %v10886_v23 = vpop.eup %10885  ;;  %9712 = vmatmul.mubr.msk.f32.vlgmr.msra.gmra.mrb[30].mxu1 %vm649_vm3, %v2236_v10  ;;  %v2238_v25 = vmul.f32 %v10884_v13, %v10876_v19 }
 0xa50   :  { %10467 = vmatpush3.bf16.msra.mxu1 %v10464_v58  ;;  %9737 = vmatprep.mubr.msk.f32.mxu1 %vm96_vm0, %v11255_v62  ;;  %v2237_v24 = vmul.f32 %v10886_v23, %v10878_v49 }
 0xa51   :  { %10469 = vmatprep.subr.bf16.mxu1 %v10468_v12 }
 0xa52   :  { %9718 = vmatprep.mubr.msk.f32.mxu0 %vm649_vm3, %v2237_v24 }
 0xa53   :  { %9719 = vmatmul.mubr.msk.f32.vlgmr.msra.gmra.mrb[30].mxu0 %vm649_vm3, %v2238_v25 }
 0xa54   :  { %10471 = vmatpush3.bf16.msra.mxu1 %v10468_v12  ;;  %9722 = vmatpush3.msra.mxu0 %v8659_v59 }
 0xa55   :  { %10481 = vmatprep.subr.bf16.mxu1 %v10480_v26  ;;  %10473 = vmatprep.subr.bf16.mxu0 %v10472_v33 }
 0xa57   :  { %9738 = vmatmul.mubr.msk.f32.vlgmr.msra.gmra.mrb[32].mxu1 %vm96_vm0, %v11268_v6 }
 0xa58   :  { %9740 = vmatprep.mubr.msk.f32.mxu1 %vm96_vm0, %v11271_v8  ;;  %10483 = vmatpush3.bf16.msra.mxu1 %v10480_v26 }
 0xa59   :  { %10485 = vmatprep.subr.bf16.mxu1 %v10484_v30 }
 0xa5b   :  { %9741 = vmatmul.mubr.msk.f32.gmra.mrb[34].mxu1 %vm96_vm0, %v11281_v11 }
 0xa5c   :  { %10487 = vmatpush3.bf16.msra.mxu1 %v10484_v30  ;;  %9765 = vmatprep.mubr.msk.f32.mxu1 %vm96_vm0, %v11255_v62 }
 0xa5f   :  { %9766 = vmatmul.mubr.msk.f32.vlgmr.msra.gmra.mrb[36].mxu1 %vm96_vm0, %v11268_v6 }
 0xa60   :  { %9768 = vmatprep.mubr.msk.f32.mxu1 %vm96_vm0, %v11271_v8 }
 0xa63   :  { %9769 = vmatmul.mubr.msk.f32.gmra.mrb[38].mxu1 %vm96_vm0, %v11281_v11 }
 0xb22   :  { %v9713_v36 = vpop.f32.mrb[30].mxu1 }
 0xb23   :  { %v2311_v32 = vpop.f32.mrb[31].mxu1 }
 0xb24   :  { %9723 = vmatprep.mubr.msk.f32.mxu0 %vm474_vm1, %v2311_v32 }
 0xb25   :  { %9724 = vmatmul.mubr.msk.f32.vlgmr.msra.gmra.mrb[20].mxu0 %vm474_vm1, %v9713_v36 }
 0xb26   :  { %v9720_v38 = vpop.f32.mrb[30].mxu0  ;;  %10475 = vmatpush3.bf16.msra.mxu0 %v10472_v33 }
 0xb27   :  { %v2392_v39 = vpop.f32.mrb[31].mxu0  ;;  %10477 = vmatprep.subr.bf16.mxu0 %v10476_v37 }
 0xb28   :  { %9726 = vmatprep.mubr.msk.f32.mxu0 %vm474_vm1, %v2392_v39 }
 0xb29   :  { %9727 = vmatmul.mubr.msk.f32.gmra.mrb[22].mxu0 %vm474_vm1, %v9720_v38 }
 0xb2a   :  { %v9739_v41 = vpop.f32.mrb[32].mxu1  ;;  %10479 = vmatpush3.bf16.msra.mxu0 %v10476_v37  ;;  %9751 = vmatprep.mubr.msk.f32.mxu0 %vm96_vm0, %v11255_v62 }
 0xb2b   :  { %v2589_v14 = vadd.f32 %v9739_v41, %v8669_v40  ;;  %v2583_v27 = vpop.f32.mrb[33].mxu1 }
 0xb2c   :  { %v2584_v44 = vadd.f32 %v8669_v40, %v2583_v27 }
 0xb2d   :  { %9752 = vmatmul.mubr.msk.f32.vlgmr.msra.gmra.mrb[32].mxu0 %vm96_vm0, %v11268_v6 }
 0xb2e   :  { %v9742_v42 = vpop.f32.mrb[34].mxu1  ;;  %9754 = vmatprep.mubr.msk.f32.mxu0 %vm96_vm0, %v11271_v8 }
 0xb2f   :  { %v2599_v18 = vadd.f32 %v9742_v42, %v8669_v40  ;;  %v2593_v43 = vpop.f32.mrb[35].mxu1  ;;  %v8706_v42 = vld [vmem:[%s12752_s11 + $0x18] sm:$0xff] }
 0xb30   :  { %v2594_v45 = vadd.f32 %v8669_v40, %v2593_v43 }
 0xb31   :  { %9755 = vmatmul.mubr.msk.f32.gmra.mrb[34].mxu0 %vm96_vm0, %v11281_v11 }
 0xb32   :  { %v9767_v47 = vpop.f32.mrb[36].mxu1  ;;  %9782 = vmatprep.mubr.msk.f32.mxu1 %vm474_vm1, %v2594_v45  ;;  %9775 = vmatprep.mubr.msk.f32.mxu0 %vm474_vm1, %v2584_v44 }
 0xb33   :  { %v2785_v48 = vadd.f32 %v9767_v47, %v8689_v46  ;;  %v2779_v50 = vpop.f32.mrb[37].mxu1 }
 0xb34   :  { %v2780_v51 = vadd.f32 %v8689_v46, %v2779_v50 }
 0xb36   :  { %v10500_v52 = vpack.c.bf16 %v2785_v48, %v2780_v51  ;;  %v9770_v53 = vpop.f32.mrb[38].mxu1 }
 0xb37   :  { %v2795_v19 = vadd.f32 %v9770_v53, %v8689_v46  ;;  %v2789_v49 = vpop.f32.mrb[39].mxu1 }
 0xb38   :  { %v2790_v54 = vadd.f32 %v8689_v46, %v2789_v49 }
 0xb3a   :  { %v10504_v22 = vpack.c.bf16 %v2795_v19, %v2790_v54 }
 0xc00   :  { %v9753_v55 = vpop.f32.mrb[32].mxu0 }
 0xc01   :  { %v2687_v58 = vadd.f32 %v9753_v55, %v8679_v20  ;;  %v2681_v59 = vpop.f32.mrb[33].mxu0  ;;  %v8711_v55 = vld [vmem:[%s12753_s4] ss:$0 sm:$0xff] }
 0xc02   :  { %v2682_v60 = vadd.f32 %v8679_v20, %v2681_v59 }
 0xc04   :  { %v10488_v61 = vpack.c.bf16 %v2687_v58, %v2682_v60  ;;  %v9756_v0 = vpop.f32.mrb[34].mxu0 }
 0xc05   :  { %v2697_v2 = vadd.f32 %v9756_v0, %v8679_v20  ;;  %v2691_v3 = vpop.f32.mrb[35].mxu0 }
 0xc06   :  { %v2692_v4 = vadd.f32 %v8679_v20, %v2691_v3  ;;  %10490 = vmatprep.subr.msk.bf16.mxu0 %vm11303_vm2, %v10488_v61 }
 0xc07   :  { %10493 = vmatpush3.bf16.xpose.msk.msra.mxu0 %vm11303_vm2, %v10488_v61 }
 0xc08   :  { %v10494_v5 = vpack.c.bf16 %v2697_v2, %v2692_v4  ;;  %10501 = vmatprep.subr.bf16.mxu0 %v10500_v52 }
 0xc0a   :  { %10496 = vmatprep.subr.msk.bf16.mxu1 %vm11303_vm2, %v10494_v5 }
 0xc0b   :  { %10499 = vmatpush3.bf16.xpose.msk.msra.mxu1 %vm11303_vm2, %v10494_v5 }
 0xc0c   :  { %10505 = vmatprep.subr.bf16.mxu1 %v10504_v22 }
 0xc0e   :  { %9776 = vmatmul.mubr.msk.f32.vlgmr.msra.gmra.mrb[36].mxu0 %vm474_vm1, %v2589_v14 }
 0xc0f   :  { %10503 = vmatpush3.bf16.msra.mxu0 %v10500_v52 }
 0xc10   :  { %9799 = vmatprep.subr.mxu0 %v8706_v42 }
 0xc12   :  { %9783 = vmatmul.mubr.msk.f32.vlgmr.msra.gmra.mrb[40].mxu1 %vm474_vm1, %v2599_v18 }
 0xc13   :  { %10507 = vmatpush3.bf16.msra.mxu1 %v10504_v22 }
 0xce1   :  { %v9777_v7 = vpop.f32.mrb[36].mxu0 }
 0xce2   :  { %v2882_v9 = vadd.f32 %v9777_v7, %v11368_v56  ;;  %v2876_v10 = vpop.f32.mrb[37].mxu0 }
 0xce3   :  { %v2877_v12 = vadd.f32 %v2876_v10, %v11373_v57 }
 0xce4   :  { %v2975_v13 = vsel %vm649_vm3, %v2882_v9, -inf }
 0xce5   :  { %v9784_v15 = vpop.f32.mrb[40].mxu1  ;;  %2976 = vmax.xlane.f32.xlu1 %v2975_v13  ;;  %v2972_v17 = vsel %vm649_vm3, %v2877_v12, -inf }
 0xce6   :  { %v2969_v23 = vadd.f32 %v9784_v15, %v11380_v63  ;;  %v2963_v24 = vpop.f32.mrb[41].mxu1  ;;  %2973 = vmax.xlane.f32.xlu0 %v2972_v17 }
 0xce7   :  { %v2964_v25 = vadd.f32 %v2963_v24, %v11386_v1 }
 0xce8   :  { %v2981_v26 = vsel %vm649_vm3, %v2969_v23, -inf }
 0xce9   :  { %2982 = vmax.xlane.f32.xlu1 %v2981_v26  ;;  %v2978_v56 = vsel %vm649_vm3, %v2964_v25, -inf }
 0xcea   :  { %2979 = vmax.xlane.f32.xlu0 %v2978_v56 }
 0xd72   :  { %v2977_v28 = vpop.xlane.xlu1 %2976 }
 0xd73   :  { %v2985_v57 = vsub.f32 %v2882_v9, %v2977_v28  ;;  %v2974_v29 = vpop.xlane.xlu0 %2973 }
 0xd74   :  { %v2984_v30 = vsub.f32 %v2877_v12, %v2974_v29 }
 0xd75   :  { %v2990_v31 = vmul.f32 1.442695, %v2985_v57 }
 0xd76   :  { %v2988_v16 = vmul.f32 1.442695, %v2984_v30  ;;  %v2983_v33 = vpop.xlane.xlu1 %2982 }
 0xd77   :  { %10887 = vpow2.f32 %v2990_v31  ;;  %v2987_v34 = vsub.f32 %v2969_v23, %v2983_v33  ;;  %v2980_v63 = vpop.xlane.xlu0 %2979 }
 0xd78   :  { %10889 = vpow2.f32 %v2988_v16  ;;  %v2986_v35 = vsub.f32 %v2964_v25, %v2980_v63 }
 0xd79   :  { %v2994_v36 = vmul.f32 1.442695, %v2987_v34 }
 0xd7a   :  { %v2992_v1 = vmul.f32 1.442695, %v2986_v35 }
 0xd7b   :  { %10891 = vpow2.f32 %v2994_v36 }
 0xd7c   :  { %10893 = vpow2.f32 %v2992_v1  ;;  %v3370_v1 = vld [vmem:[%s12696_s14] sm:$0xff] }
 0xd81   :  { %v10888_v32 = vpop.eup %10887 }
 0xd82   :  { %v10890_v37 = vpop.eup %10889  ;;  %v2999_v38 = vsel %vm649_vm3, %v10888_v32, 0.0 }
 0xd83   :  { %3000 = vadd.xlane.f32.xlu1 %v2999_v38  ;;  %v2996_v39 = vsel %vm649_vm3, %v10890_v37, 0.0  ;;  %v3372_v38 = vld [vmem:[%s12696_s14 + $0x10] sm:$0xff] }
 0xd84   :  { %2997 = vadd.xlane.f32.xlu0 %v2996_v39  ;;  %v3373_v39 = vld [vmem:[%s12696_s14 + $0x18] sm:$0xff] }
 0xd85   :  { %v10892_v40 = vpop.eup %10891 }
 0xd86   :  { %v10894_v41 = vpop.eup %10893  ;;  %v3005_v14 = vsel %vm649_vm3, %v10892_v40, 0.0 }
 0xd87   :  { %3006 = vadd.xlane.f32.xlu1 %v3005_v14  ;;  %v3002_v27 = vsel %vm649_vm3, %v10894_v41, 0.0 }
 0xd88   :  { %3003 = vadd.xlane.f32.xlu0 %v3002_v27 }
 0xe10   :  { %v3001_v18 = vpop.xlane.xlu1 %3000 }
 0xe11   :  { %10895 = vrcp.f32 %v3001_v18  ;;  %v2998_v43 = vpop.xlane.xlu0 %2997 }
 0xe12   :  { %10897 = vrcp.f32 %v2998_v43 }
 0xe14   :  { %v3007_v44 = vpop.xlane.xlu1 %3006 }
 0xe15   :  { %10899 = vrcp.f32 %v3007_v44  ;;  %v3004_v45 = vpop.xlane.xlu0 %3003 }
 0xe16   :  { %10901 = vrcp.f32 %v3004_v45 }
 0xe1b   :  { %v10896_v46 = vpop.eup %10895 }
 0xe1c   :  { %v10898_v47 = vpop.eup %10897  ;;  %v3013_v50 = vmul.f32 %v10896_v46, %v10888_v32  ;;  %v3371_v32 = vld [vmem:[%s12696_s14 + $0x8] sm:$0xff] }
 0xe1d   :  { %v3012_v48 = vmul.f32 %v10898_v47, %v10890_v37  ;;  %v10508_v37 = vpack.c.bf16 %v3371_v32, %v3370_v1 }
 0xe1f   :  { %v10900_v51 = vpop.eup %10899  ;;  %9789 = vmatprep.mubr.msk.f32.mxu0 %vm649_vm3, %v3012_v48  ;;  %10509 = vmatprep.subr.bf16.mxu1 %v10508_v37 }
 0xe20   :  { %v10902_v52 = vpop.eup %10901  ;;  %9790 = vmatmul.mubr.msk.f32.vlgmr.msra.gmra.mrb[38].mxu0 %vm649_vm3, %v3013_v50  ;;  %v3015_v19 = vmul.f32 %v10900_v51, %v10892_v40  ;;  %v10512_v40 = vpack.c.bf16 %v3373_v39, %v3372_v38 }
 0xe21   :  { %v3014_v53 = vmul.f32 %v10902_v52, %v10894_v41  ;;  %9800 = vmatpush3.msra.mxu0 %v8706_v42  ;;  %v8712_v52 = vld [vmem:[%s12754_s6] ss:$0 sm:$0xff] }
 0xe23   :  { %9796 = vmatprep.mubr.msk.f32.mxu1 %vm649_vm3, %v3014_v53 }
 0xe24   :  { %9797 = vmatmul.mubr.msk.f32.vlgmr.msra.gmra.mrb[42].mxu1 %vm649_vm3, %v3015_v19 }
 0xe25   :  { %10511 = vmatpush3.bf16.msra.mxu1 %v10508_v37 }
 0xe26   :  { %10513 = vmatprep.subr.bf16.mxu1 %v10512_v40 }
 0xe29   :  { %10515 = vmatpush3.bf16.msra.mxu1 %v10512_v40 }
 0xef3   :  { %v9791_v49 = vpop.f32.mrb[38].mxu0 }
 0xef4   :  { %v3088_v54 = vpop.f32.mrb[39].mxu0 }
 0xef5   :  { %9801 = vmatprep.mubr.msk.f32.mxu0 %vm474_vm1, %v3088_v54  ;;  %v8713_v54 = vld [vmem:[%s12695_s13] ss:$0 sm:$0xff] }
 0xef6   :  { %9802 = vmatmul.mubr.msk.f32.vlgmr.msra.gmra.mrb[20].mxu0 %vm474_vm1, %v9791_v49 }
 0xef7   :  { %v9798_v22 = vpop.f32.mrb[42].mxu1 }
 0xef8   :  { %v3169_v20 = vpop.f32.mrb[43].mxu1 }
 0xef9   :  { %9804 = vmatprep.mubr.msk.f32.mxu0 %vm474_vm1, %v3169_v20 }
 0xefa   :  { %9805 = vmatmul.mubr.msk.f32.gmra.mrb[22].mxu0 %vm474_vm1, %v9798_v22 }
 0xfc9   :  { %v9803_v58 = vpop.f32.mrb[20].mxu0 }
 0xfca   :  { %v3289_v59 = vadd.f32 %v9803_v58, %v8711_v55  ;;  %v3258_v60 = vpop.f32.mrb[21].mxu0 }
 0xfcb   :  { %v3288_v61 = vadd.f32 %v8711_v55, %v3258_v60 }
 0xfcc   :  { %v3293_v0 = vadd.f32 %v3289_v59, %v11268_v6 }
 0xfcd   :  { %v9806_v2 = vpop.f32.mrb[22].mxu0  ;;  %v3292_v3 = vadd.f32 %v3288_v61, %v11255_v62 }
 0xfce   :  { %v3291_v4 = vadd.f32 %v9806_v2, %v8711_v55  ;;  %v3268_v5 = vpop.f32.mrb[23].mxu0  ;;  %v3301_v7 = vsel %vm96_vm0, %v3293_v0, 0.0 }
 0xfcf   :  { %v3290_v9 = vadd.f32 %v8711_v55, %v3268_v5  ;;  %3302 = vadd.xlane.f32.xlu1 %v3301_v7  ;;  %v3298_v10 = vsel %vm96_vm0, %v3292_v3, 0.0  ;;  %v3514_v7 = vld [vmem:[%s12698_s16] sm:$0xff] }
 0xfd0   :  { %3299 = vadd.xlane.f32.xlu0 %v3298_v10  ;;  %v3295_v12 = vadd.f32 %v3291_v4, %v11281_v11 }
 0xfd1   :  { %v3294_v13 = vadd.f32 %v3290_v9, %v11271_v8  ;;  %v3515_v9 = vld [vmem:[%s12698_s16 + $0x8] sm:$0xff] }
 0xfd2   :  { %v3307_v15 = vsel %vm96_vm0, %v3295_v12, 0.0  ;;  %v10516_v10 = vpack.c.bf16 %v3515_v9, %v3514_v7 }
 0xfd3   :  { %3308 = vadd.xlane.f32.xlu1 %v3307_v15  ;;  %v3304_v6 = vsel %vm96_vm0, %v3294_v13, 0.0 }
 0xfd4   :  { %3305 = vadd.xlane.f32.xlu0 %v3304_v6  ;;  %10517 = vmatprep.subr.bf16.mxu0 %v10516_v10  ;;  %v3518_v6 = vld [vmem:[%s12698_s16 + $0x20] sm:$0xff] }
 0xfd5   :  { %10519 = vmatpush3.bf16.msra.mxu0 %v10516_v10 }
0x105c   :  { %v3303_v62 = vpop.xlane.xlu1 %3302 }
0x105d   :  { %v3311_v17 = vmul.f32 0.03125, %v3303_v62  ;;  %v3300_v23 = vpop.xlane.xlu0 %3299  ;;  %v3519_v62 = vld [vmem:[%s12698_s16 + $0x28] sm:$0xff] }
0x105e   :  { %v3310_v24 = vmul.f32 0.03125, %v3300_v23  ;;  %v3520_v23 = vld [vmem:[%s12698_s16 + $0x30] sm:$0xff] }
0x105f   :  { %v3315_v25 = vsub.f32 %v3293_v0, %v3311_v17  ;;  %v10524_v17 = vpack.c.bf16 %v3519_v62, %v3518_v6 }
0x1060   :  { %v3314_v26 = vsub.f32 %v3292_v3, %v3310_v24  ;;  %v3309_v56 = vpop.xlane.xlu1 %3308  ;;  %v3521_v24 = vld [vmem:[%s12698_s16 + $0x38] sm:$0xff] }
0x1061   :  { %v3313_v28 = vmul.f32 0.03125, %v3309_v56  ;;  %v3306_v57 = vpop.xlane.xlu0 %3305  ;;  %v3319_v29 = vmul.f32 %v3315_v25, %v3315_v25 }
0x1062   :  { %v3312_v30 = vmul.f32 0.03125, %v3306_v57  ;;  %v3318_v11 = vmul.f32 %v3314_v26, %v3314_v26 }
0x1063   :  { %v3317_v31 = vsub.f32 %v3295_v12, %v3313_v28  ;;  %v3325_v8 = vsel %vm96_vm0, %v3319_v29, 0.0  ;;  %v3516_v12 = vld [vmem:[%s12698_s16 + $0x10] sm:$0xff] }
0x1064   :  { %v3316_v16 = vsub.f32 %v3294_v13, %v3312_v30  ;;  %3326 = vadd.xlane.f32.xlu1 %v3325_v8  ;;  %v3322_v33 = vsel %vm96_vm0, %v3318_v11, 0.0  ;;  %v3517_v13 = vld [vmem:[%s12698_s16 + $0x18] sm:$0xff] }
0x1065   :  { %3323 = vadd.xlane.f32.xlu0 %v3322_v33  ;;  %v3321_v34 = vmul.f32 %v3317_v31, %v3317_v31  ;;  %v10520_v15 = vpack.c.bf16 %v3517_v13, %v3516_v12 }
0x1066   :  { %v3320_v63 = vmul.f32 %v3316_v16, %v3316_v16 }
0x1067   :  { %v3331_v35 = vsel %vm96_vm0, %v3321_v34, 0.0  ;;  %10521 = vmatprep.subr.bf16.mxu0 %v10520_v15 }
0x1068   :  { %3332 = vadd.xlane.f32.xlu1 %v3331_v35  ;;  %v3328_v36 = vsel %vm96_vm0, %v3320_v63, 0.0  ;;  %10523 = vmatpush3.bf16.msra.mxu0 %v10520_v15 }
0x1069   :  { %3329 = vadd.xlane.f32.xlu0 %v3328_v36  ;;  %10525 = vmatprep.subr.bf16.mxu0 %v10524_v17 }
0x106c   :  { %10527 = vmatpush3.bf16.msra.mxu0 %v10524_v17 }
0x10f1   :  { %v3327_v41 = vpop.xlane.xlu1 %3326 }
0x10f2   :  { %v3335_v14 = vmul.f32 0.03125, %v3327_v41  ;;  %v3324_v27 = vpop.xlane.xlu0 %3323 }
0x10f3   :  { %v3334_v42 = vmul.f32 0.03125, %v3324_v27 }
0x10f4   :  { %v3339_v18 = vadd.f32 1e-12, %v3335_v14 }
0x10f5   :  { %v3338_v43 = vadd.f32 1e-12, %v3334_v42  ;;  %v3333_v44 = vpop.xlane.xlu1 %3332 }
0x10f6   :  { %10903 = vrsqrt.f32 %v3339_v18  ;;  %v3337_v45 = vmul.f32 0.03125, %v3333_v44  ;;  %v3330_v46 = vpop.xlane.xlu0 %3329 }
0x10f7   :  { %10905 = vrsqrt.f32 %v3338_v43  ;;  %v3336_v47 = vmul.f32 0.03125, %v3330_v46 }
0x10f8   :  { %v3341_v48 = vadd.f32 1e-12, %v3337_v45 }
0x10f9   :  { %v3340_v50 = vadd.f32 1e-12, %v3336_v47 }
0x10fa   :  { %10907 = vrsqrt.f32 %v3341_v48 }
0x10fb   :  { %10909 = vrsqrt.f32 %v3340_v50 }
0x1100   :  { %v10904_v51 = vpop.eup %10903 }
0x1101   :  { %v10906_v53 = vpop.eup %10905  ;;  %v3347_v19 = vmul.f32 %v10904_v51, %v3315_v25  ;;  %v10528_v25 = vpack.c.bf16 %v3521_v24, %v3520_v23 }
0x1102   :  { %v3346_v49 = vmul.f32 %v10906_v53, %v3314_v26  ;;  %v8714_v26 = vld [vmem:[%s12697_s15] ss:$0 sm:$0xff] }
0x1103   :  { %v3357_v22 = vmul.f32 %v8712_v52, %v3347_v19  ;;  %10529 = vmatprep.subr.bf16.mxu0 %v10528_v25 }
0x1104   :  { %v10908_v20 = vpop.eup %10907  ;;  %v3356_v55 = vmul.f32 %v8712_v52, %v3346_v49  ;;  %10531 = vmatpush3.bf16.msra.mxu0 %v10528_v25 }
0x1105   :  { %v10910_v58 = vpop.eup %10909  ;;  %v3349_v59 = vmul.f32 %v10908_v20, %v3317_v31  ;;  %v11745_v0 = vadd.f32 %v8713_v54, %v3357_v22 }
0x1106   :  { %v11743_v60 = vadd.f32 %v8713_v54, %v3356_v55  ;;  %v3348_v61 = vmul.f32 %v10910_v58, %v3316_v16 }
0x1107   :  { %v3359_v2 = vmul.f32 %v8712_v52, %v3349_v59 }
0x1108   :  { %9815 = vmatprep.mubr.msk.f32.mxu1 %vm96_vm0, %v11743_v60  ;;  %v3358_v3 = vmul.f32 %v8712_v52, %v3348_v61 }
0x1109   :  { %9816 = vmatmul.mubr.msk.f32.vlgmr.msra.gmra.mrb[44].mxu1 %vm96_vm0, %v11745_v0  ;;  %v11753_v5 = vadd.f32 %v8713_v54, %v3359_v2  ;;  %v8719_v2 = vld [vmem:[%s12699_s17] ss:$0 sm:$0xff] }
0x110a   :  { %v11751_v4 = vadd.f32 %v8713_v54, %v3358_v3 }
0x110c   :  { %9818 = vmatprep.mubr.msk.f32.mxu1 %vm96_vm0, %v11751_v4 }
0x110d   :  { %9819 = vmatmul.mubr.msk.f32.gmra.mrb[46].mxu1 %vm96_vm0, %v11753_v5 }
0x11dc   :  { %v9817_v56 = vpop.f32.mrb[44].mxu1 }
0x11dd   :  { %v3465_v28 = vadd.f32 %v9817_v56, %v8714_v26  ;;  %v3459_v57 = vpop.f32.mrb[45].mxu1 }
0x11de   :  { %v3460_v29 = vadd.f32 %v8714_v26, %v3459_v57 }
0x11df   :  { %v3483_v30 = vmul.f32 0.044715, %v3465_v28  ;;  %v3479_v52 = vmul.f32 0.5, %v3465_v28 }
0x11e0   :  { %v3482_v11 = vmul.f32 0.044715, %v3460_v29  ;;  %v9820_v31 = vpop.f32.mrb[46].mxu1  ;;  %v3478_v50 = vmul.f32 0.5, %v3460_v29 }
0x11e1   :  { %v3487_v8 = vmul.f32 %v3483_v30, %v3465_v28  ;;  %v3475_v16 = vadd.f32 %v9820_v31, %v8714_v26  ;;  %v3469_v33 = vpop.f32.mrb[47].mxu1 }
0x11e2   :  { %v3486_v34 = vmul.f32 %v3482_v11, %v3460_v29  ;;  %v3470_v63 = vadd.f32 %v8714_v26, %v3469_v33 }
0x11e3   :  { %v3491_v35 = vmul.f32 %v3487_v8, %v3465_v28  ;;  %v3485_v36 = vmul.f32 0.044715, %v3475_v16  ;;  %v3481_v58 = vmul.f32 0.5, %v3475_v16 }
0x11e4   :  { %v3490_v1 = vmul.f32 %v3486_v34, %v3460_v29  ;;  %v3484_v32 = vmul.f32 0.044715, %v3470_v63  ;;  %v3480_v20 = vmul.f32 0.5, %v3470_v63 }
0x11e5   :  { %v3495_v37 = vadd.f32 %v3491_v35, %v3465_v28  ;;  %v3489_v38 = vmul.f32 %v3485_v36, %v3475_v16 }
0x11e6   :  { %v3494_v39 = vadd.f32 %v3490_v1, %v3460_v29  ;;  %v3488_v40 = vmul.f32 %v3484_v32, %v3470_v63 }
0x11e7   :  { %v3499_v41 = vmul.f32 0.7978846, %v3495_v37  ;;  %v3493_v14 = vmul.f32 %v3489_v38, %v3475_v16 }
0x11e8   :  { %v3492_v27 = vmul.f32 %v3488_v40, %v3470_v63  ;;  %v3498_v42 = vmul.f32 0.7978846, %v3494_v39  ;;  %v8726_v39 = vld [vmem:[%s12741_s7 + $0x80] sm:$0xff]  ;;  %v8727_v40 = vld [vmem:[%s12741_s7 + $0x88] sm:$0xff] }
0x11e9   :  { %10911 = vtanh.f32 %v3499_v41  ;;  %v3497_v18 = vadd.f32 %v3493_v14, %v3475_v16  ;;  %v8746_v41 = vld [vmem:[%s12743_s8 + $0x80] sm:$0xff]  ;;  %v10532_v14 = vpack.c.bf16 %v8727_v40, %v8726_v39 }
0x11ea   :  { %v3496_v43 = vadd.f32 %v3492_v27, %v3470_v63  ;;  %10913 = vtanh.f32 %v3498_v42  ;;  %v8747_v27 = vld [vmem:[%s12743_s8 + $0x88] sm:$0xff] }
0x11eb   :  { %v3501_v44 = vmul.f32 0.7978846, %v3497_v18  ;;  %v10548_v42 = vpack.c.bf16 %v8747_v27, %v8746_v41  ;;  %10533 = vmatprep.subr.bf16.mxu1 %v10532_v14  ;;  %v8728_v18 = vld [vmem:[%s12741_s7 + $0x90] sm:$0xff]  ;;  %v8741_v41 = vld [vmem:[%s12746_s3 + $0x4] ss:$0 sm:$0xff] }
0x11ec   :  { %v3500_v45 = vmul.f32 0.7978846, %v3496_v43  ;;  %10535 = vmatpush3.bf16.msra.mxu1 %v10532_v14  ;;  %v8729_v43 = vld [vmem:[%s12741_s7 + $0x98] sm:$0xff] }
0x11ed   :  { %10915 = vtanh.f32 %v3501_v44  ;;  %10549 = vmatprep.subr.bf16.mxu0 %v10548_v42  ;;  %v8748_v44 = vld [vmem:[%s12743_s8 + $0x90] sm:$0xff] }
0x11ee   :  { %10917 = vtanh.f32 %v3500_v45  ;;  %v10536_v45 = vpack.c.bf16 %v8729_v43, %v8728_v18 }
0x11f0   :  { %10537 = vmatprep.subr.bf16.mxu1 %v10536_v45 }
0x11f1   :  { %10539 = vmatpush3.bf16.msra.mxu1 %v10536_v45 }
0x11f3   :  { %v10912_v46 = vpop.eup %10911 }
0x11f4   :  { %v10914_v47 = vpop.eup %10913  ;;  %v3507_v48 = vadd.f32 1.0, %v10912_v46  ;;  %v8749_v46 = vld [vmem:[%s12743_s8 + $0x98] sm:$0xff] }
0x11f5   :  { %v3506_v51 = vadd.f32 1.0, %v10914_v47  ;;  %v10552_v47 = vpack.c.bf16 %v8749_v46, %v8748_v44 }
0x11f6   :  { %v3511_v54 = vmul.f32 %v3507_v48, %v3479_v52  ;;  %v8736_v48 = vld [vmem:[%s12742_s5 + $0x80] sm:$0xff] }
0x11f7   :  { %v10916_v53 = vpop.eup %10915  ;;  %v3510_v19 = vmul.f32 %v3506_v51, %v3478_v50  ;;  %v8737_v50 = vld [vmem:[%s12742_s5 + $0x88] sm:$0xff] }
0x11f8   :  { %v10918_v49 = vpop.eup %10917  ;;  %v3509_v22 = vadd.f32 1.0, %v10916_v53  ;;  %v10540_v51 = vpack.c.bf16 %v8737_v50, %v8736_v48 }
0x11f9   :  { %9837 = vmatprep.mubr.msk.f32.mxu0 %vm3529_vm4, %v3510_v19  ;;  %v3508_v55 = vadd.f32 1.0, %v10918_v49 }
0x11fa   :  { %9838 = vmatmul.mubr.msk.f32.vlgmr.msra.gmra.mrb[40].mxu0 %vm3529_vm4, %v3511_v54  ;;  %v3513_v61 = vmul.f32 %v3509_v22, %v3481_v58  ;;  %10541 = vmatprep.subr.bf16.mxu1 %v10540_v51 }
0x11fb   :  { %v3512_v59 = vmul.f32 %v3508_v55, %v3480_v20  ;;  %10551 = vmatpush3.bf16.msra.mxu0 %v10548_v42 }
0x11fc   :  { %10553 = vmatprep.subr.bf16.mxu0 %v10552_v47 }
0x11fd   :  { %9840 = vmatprep.mubr.msk.f32.mxu0 %vm3529_vm4, %v3512_v59 }
0x11fe   :  { %9841 = vmatmul.mubr.msk.f32.gmra.mrb[42].mxu0 %vm3529_vm4, %v3513_v61 }
0x11ff   :  { %10555 = vmatpush3.bf16.msra.mxu0 %v10552_v47 }
0x12cd   :  { %v9839_v3 = vpop.f32.mrb[40].mxu0 }
0x12ce   :  { %v3614_v7 = vadd.f32 %v9839_v3, %v8719_v2  ;;  %v3608_v9 = vpop.f32.mrb[41].mxu0 }
0x12cf   :  { %v3609_v10 = vadd.f32 %v8719_v2, %v3608_v9 }
0x12d0   :  { %v3628_v12 = vadd.f32 %v3614_v7, %v11745_v0  ;;  %v8724_v7 = vld [vmem:[%s12700_s18] ss:$0 sm:$0xff] }
0x12d1   :  { %v9842_v13 = vpop.f32.mrb[42].mxu0  ;;  %v3627_v15 = vadd.f32 %v3609_v10, %v11743_v60 }
0x12d2   :  { %v3624_v6 = vadd.f32 %v9842_v13, %v8719_v2  ;;  %v3618_v62 = vpop.f32.mrb[43].mxu0  ;;  %v3636_v17 = vsel %vm96_vm0, %v3628_v12, 0.0  ;;  %v8725_v13 = vld [vmem:[%s12701_s19] ss:$0 sm:$0xff] }
0x12d3   :  { %v3619_v23 = vadd.f32 %v8719_v2, %v3618_v62  ;;  %3637 = vadd.xlane.f32.xlu1 %v3636_v17  ;;  %v3633_v24 = vsel %vm96_vm0, %v3627_v15, 0.0  ;;  %v8738_v17 = vld [vmem:[%s12742_s5 + $0x90] sm:$0xff] }
0x12d4   :  { %3634 = vadd.xlane.f32.xlu0 %v3633_v24  ;;  %v3630_v25 = vadd.f32 %v3624_v6, %v11753_v5 }
0x12d5   :  { %v3629_v26 = vadd.f32 %v3619_v23, %v11751_v4  ;;  %v8739_v23 = vld [vmem:[%s12742_s5 + $0x98] sm:$0xff] }
0x12d6   :  { %v3642_v56 = vsel %vm96_vm0, %v3630_v25, 0.0 }
0x12d7   :  { %3643 = vadd.xlane.f32.xlu1 %v3642_v56  ;;  %v3639_v0 = vsel %vm96_vm0, %v3629_v26, 0.0 }
0x12d8   :  { %3640 = vadd.xlane.f32.xlu0 %v3639_v0 }
0x1360   :  { %v3638_v60 = vpop.xlane.xlu1 %3637 }
0x1361   :  { %v3646_v28 = vmul.f32 0.03125, %v3638_v60  ;;  %v3635_v57 = vpop.xlane.xlu0 %3634 }
0x1362   :  { %v3645_v29 = vmul.f32 0.03125, %v3635_v57 }
0x1363   :  { %v11801_v30 = vsub.f32 %v3628_v12, %v3646_v28  ;;  %v10544_v28 = vpack.c.bf16 %v8739_v23, %v8738_v17 }
0x1364   :  { %v11803_v11 = vsub.f32 %v3627_v15, %v3645_v29  ;;  %v3644_v31 = vpop.xlane.xlu1 %3643 }
0x1365   :  { %v3648_v8 = vmul.f32 0.03125, %v3644_v31  ;;  %v3641_v16 = vpop.xlane.xlu0 %3640  ;;  %v3654_v4 = vmul.f32 %v11801_v30, %v11801_v30  ;;  %v8731_v31 = vld [vmem:[%s12747_s0 + $0x4] ss:$0 sm:$0xff] }
0x1366   :  { %v3647_v5 = vmul.f32 0.03125, %v3641_v16  ;;  %v3653_v33 = vmul.f32 %v11803_v11, %v11803_v11 }
0x1367   :  { %v11809_v34 = vsub.f32 %v3630_v25, %v3648_v8  ;;  %v3660_v63 = vsel %vm96_vm0, %v3654_v4, 0.0 }
0x1368   :  { %v11812_v35 = vsub.f32 %v3629_v26, %v3647_v5  ;;  %3661 = vadd.xlane.f32.xlu1 %v3660_v63  ;;  %v3657_v36 = vsel %vm96_vm0, %v3653_v33, 0.0 }
0x1369   :  { %3658 = vadd.xlane.f32.xlu0 %v3657_v36  ;;  %v3656_v1 = vmul.f32 %v11809_v34, %v11809_v34 }
0x136a   :  { %v3655_v32 = vmul.f32 %v11812_v35, %v11812_v35 }
0x136b   :  { %v3666_v37 = vsel %vm96_vm0, %v3656_v1, 0.0 }
0x136c   :  { %3667 = vadd.xlane.f32.xlu1 %v3666_v37  ;;  %v3663_v38 = vsel %vm96_vm0, %v3655_v32, 0.0 }
0x136d   :  { %3664 = vadd.xlane.f32.xlu0 %v3663_v38 }
0x13f5   :  { %v3662_v52 = vpop.xlane.xlu1 %3661 }
0x13f6   :  { %v3670_v53 = vmul.f32 0.03125, %v3662_v52  ;;  %v3659_v19 = vpop.xlane.xlu0 %3658 }
0x13f7   :  { %v3669_v49 = vmul.f32 0.03125, %v3659_v19 }
0x13f8   :  { %v3674_v54 = vadd.f32 1e-12, %v3670_v53 }
0x13f9   :  { %v3673_v22 = vadd.f32 1e-12, %v3669_v49  ;;  %v3668_v20 = vpop.xlane.xlu1 %3667 }
0x13fa   :  { %10919 = vrsqrt.f32 %v3674_v54  ;;  %v3672_v55 = vmul.f32 0.03125, %v3668_v20  ;;  %v3665_v58 = vpop.xlane.xlu0 %3664  ;;  %v11923_v54 = vld [vmem:[%s12751_s2 + $0x18] sm:$0xff] }
0x13fb   :  { %10921 = vrsqrt.f32 %v3673_v22  ;;  %v3671_v59 = vmul.f32 0.03125, %v3665_v58 }
0x13fc   :  { %v3676_v61 = vadd.f32 1e-12, %v3672_v55  ;;  %v11929_v55 = vld [vmem:[%s12751_s2 + $0x10] sm:$0xff] }
0x13fd   :  { %v3675_v2 = vadd.f32 1e-12, %v3671_v59  ;;  %v11935_v59 = vld [vmem:[%s12751_s2 + $0x8] sm:$0xff] }
0x13fe   :  { %10923 = vrsqrt.f32 %v3676_v61 }
0x13ff   :  { %10925 = vrsqrt.f32 %v3675_v2 }
0x1404   :  { %v10920_v3 = vpop.eup %10919 }
0x1405   :  { %v10922_v9 = vpop.eup %10921  ;;  %v3682_v10 = vmul.f32 %v10920_v3, %v11801_v30  ;;  %v11942_v3 = vld [vmem:[%s12751_s2] sm:$0xff]  ;;  %s11045_s2 = smov [#allocation2]  }
0x1406   :  { %v3681_v12 = vmul.f32 %v10922_v9, %v11803_v11  ;;  %v8751_v11 = vld [vmem:[%s12750_s9 + $0x4] ss:$0 sm:$0xff] }
0x1407   :  { %v3692_v15 = vmul.f32 %v8724_v7, %v3682_v10 }
0x1408   :  { %v10924_v6 = vpop.eup %10923  ;;  %v3691_v62 = vmul.f32 %v8724_v7, %v3681_v12 }
0x1409   :  { %v10926_v24 = vpop.eup %10925  ;;  %v3684_v25 = vmul.f32 %v10924_v6, %v11809_v34  ;;  %v11869_v0 = vadd.f32 %v8725_v13, %v3692_v15 }
0x140a   :  { %v11866_v26 = vadd.f32 %v8725_v13, %v3691_v62  ;;  %v3683_v56 = vmul.f32 %v10926_v24, %v11812_v35 }
0x140b   :  { %v3694_v60 = vmul.f32 %v8724_v7, %v3684_v25 }
0x140c   :  { %v3693_v57 = vmul.f32 %v8724_v7, %v3683_v56  ;;  %9851 = vmatprep.mubr.msk.f32.mxu1 %vm96_vm0, %v11866_v26  ;;  %9879 = vmatprep.mubr.msk.f32.mxu0 %vm96_vm0, %v11866_v26 }
0x140d   :  { %9852 = vmatmul.mubr.msk.f32.vlgmr.msra.gmra.mrb[48].mxu1 %vm96_vm0, %v11869_v0  ;;  %9880 = vmatmul.mubr.msk.f32.vlgmr.msra.gmra.mrb[44].mxu0 %vm96_vm0, %v11869_v0  ;;  %v11881_v30 = vadd.f32 %v8725_v13, %v3694_v60 }
0x140e   :  { %v11879_v29 = vadd.f32 %v8725_v13, %v3693_v57  ;;  %10543 = vmatpush3.bf16.msra.mxu1 %v10540_v51 }
0x140f   :  { %10545 = vmatprep.subr.bf16.mxu1 %v10544_v28 }
0x1410   :  { %9854 = vmatprep.mubr.msk.f32.mxu1 %vm96_vm0, %v11879_v29  ;;  %9882 = vmatprep.mubr.msk.f32.mxu0 %vm96_vm0, %v11879_v29 }
0x1411   :  { %9855 = vmatmul.mubr.msk.f32.gmra.mrb[50].mxu1 %vm96_vm0, %v11881_v30  ;;  %9883 = vmatmul.mubr.msk.f32.gmra.mrb[46].mxu0 %vm96_vm0, %v11881_v30 }
0x1412   :  { %10547 = vmatpush3.bf16.msra.mxu1 %v10544_v28  ;;  %9865 = vmatprep.mubr.msk.f32.mxu1 %vm96_vm0, %v11866_v26 }
0x1415   :  { %9866 = vmatmul.mubr.msk.f32.vlgmr.msra.gmra.mrb[52].mxu1 %vm96_vm0, %v11869_v0 }
0x1416   :  { %9868 = vmatprep.mubr.msk.f32.mxu1 %vm96_vm0, %v11879_v29 }
0x1419   :  { %9869 = vmatmul.mubr.msk.f32.gmra.mrb[54].mxu1 %vm96_vm0, %v11881_v30 }
0x14e0   :  { %v9853_v8 = vpop.f32.mrb[48].mxu1  ;;  %v9881_v16 = vpop.f32.mrb[44].mxu0 }
0x14e1   :  { %v3998_v4 = vadd.f32 %v9881_v16, %v8751_v11  ;;  %v3796_v5 = vpop.f32.mrb[49].mxu1  ;;  %v3992_v33 = vpop.f32.mrb[45].mxu0  ;;  %v3802_v51 = vadd.f32 %v9853_v8, %v8731_v31 }
0x14e2   :  { %v3797_v34 = vadd.f32 %v8731_v31, %v3796_v5  ;;  %v3993_v63 = vadd.f32 %v8751_v11, %v3992_v33 }
0x14e4   :  { %v10568_v35 = vpack.c.bf16 %v3998_v4, %v3993_v63  ;;  %v9856_v36 = vpop.f32.mrb[50].mxu1  ;;  %v9884_v1 = vpop.f32.mrb[46].mxu0  ;;  %9889 = vmatprep.mubr.msk.f32.mxu1 %vm474_vm1, %v3797_v34  ;;  %v8779_v63 = vld [vmem:[%s12742_s5 + $0xa0] sm:$0xff] }
0x14e5   :  { %v4008_v32 = vadd.f32 %v9884_v1, %v8751_v11  ;;  %v3806_v37 = vpop.f32.mrb[51].mxu1  ;;  %v4002_v38 = vpop.f32.mrb[47].mxu0  ;;  %v3812_v52 = vadd.f32 %v9856_v36, %v8731_v31  ;;  %v8769_v1 = vld [vmem:[%s12741_s7 + $0xa0] sm:$0xff] }
0x14e6   :  { %v3807_v39 = vadd.f32 %v8731_v31, %v3806_v37  ;;  %v4003_v40 = vadd.f32 %v8751_v11, %v4002_v38 }
0x14e8   :  { %v10572_v14 = vpack.c.bf16 %v4008_v32, %v4003_v40  ;;  %v9867_v27 = vpop.f32.mrb[52].mxu1  ;;  %9896 = vmatprep.mubr.msk.f32.mxu0 %vm474_vm1, %v3807_v39  ;;  %v8770_v32 = vld [vmem:[%s12741_s7 + $0xa8] sm:$0xff] }
0x14e9   :  { %v3900_v42 = vadd.f32 %v9867_v27, %v8741_v41  ;;  %v3894_v18 = vpop.f32.mrb[53].mxu1  ;;  %v10576_v37 = vpack.c.bf16 %v8770_v32, %v8769_v1  ;;  %v8781_v27 = vld [vmem:[%s12742_s5 + $0xb0] sm:$0xff] }
0x14ea   :  { %v3895_v43 = vadd.f32 %v8741_v41, %v3894_v18 }
0x14ec   :  { %v10556_v44 = vpack.c.bf16 %v3900_v42, %v3895_v43  ;;  %v9870_v45 = vpop.f32.mrb[54].mxu1  ;;  %v8782_v42 = vld [vmem:[%s12742_s5 + $0xb8] sm:$0xff] }
0x14ed   :  { %v3910_v46 = vadd.f32 %v9870_v45, %v8741_v41  ;;  %v3904_v47 = vpop.f32.mrb[55].mxu1  ;;  %v10588_v45 = vpack.c.bf16 %v8782_v42, %v8781_v27 }
0x14ee   :  { %v3905_v48 = vadd.f32 %v8741_v41, %v3904_v47  ;;  %10558 = vmatprep.subr.msk.bf16.mxu1 %vm11303_vm2, %v10556_v44  ;;  %v8771_v47 = vld [vmem:[%s12741_s7 + $0xb0] sm:$0xff] }
0x14ef   :  { %10561 = vmatpush3.bf16.xpose.msk.msra.mxu1 %vm11303_vm2, %v10556_v44 }
0x14f0   :  { %v10562_v50 = vpack.c.bf16 %v3910_v46, %v3905_v48  ;;  %10569 = vmatprep.subr.bf16.mxu1 %v10568_v35  ;;  %v8772_v48 = vld [vmem:[%s12741_s7 + $0xb8] sm:$0xff] }
0x14f2   :  { %10564 = vmatprep.subr.msk.bf16.mxu0 %vm11303_vm2, %v10562_v50 }
0x14f3   :  { %10567 = vmatpush3.bf16.xpose.msk.msra.mxu0 %vm11303_vm2, %v10562_v50 }
0x14f4   :  { %10573 = vmatprep.subr.bf16.mxu0 %v10572_v14 }
0x14f6   :  { %9890 = vmatmul.mubr.msk.f32.vlgmr.msra.gmra.mrb[56].mxu1 %vm474_vm1, %v3802_v51 }
0x14f7   :  { %10571 = vmatpush3.bf16.msra.mxu1 %v10568_v35  ;;  %v8780_v35 = vld [vmem:[%s12742_s5 + $0xa8] sm:$0xff] }
0x14f8   :  { %v10584_v36 = vpack.c.bf16 %v8780_v35, %v8779_v63  ;;  %10577 = vmatprep.subr.bf16.mxu1 %v10576_v37 }
0x14fa   :  { %9897 = vmatmul.mubr.msk.f32.vlgmr.msra.gmra.mrb[48].mxu0 %vm474_vm1, %v3812_v52 }
0x14fb   :  { %10575 = vmatpush3.bf16.msra.mxu0 %v10572_v14 }
0x14fc   :  { %10585 = vmatprep.subr.bf16.mxu0 %v10584_v36 }
0x15c9   :  { %v9891_v53 = vpop.f32.mrb[56].mxu1 }
0x15ca   :  { %v4089_v19 = vpop.f32.mrb[57].mxu1  ;;  %v4095_v61 = vadd.f32 %v11935_v59, %v9891_v53  ;;  %v10580_v53 = vpack.c.bf16 %v8772_v48, %v8771_v47 }
0x15cb   :  { %v4090_v7 = vadd.f32 %v11942_v3, %v4089_v19  ;;  %v8789_v19 = vld [vmem:[%s12743_s8 + $0xa0] sm:$0xff] }
0x15cc   :  { %v4188_v10 = vsel %vm649_vm3, %v4095_v61, -inf }
0x15cd   :  { %v9898_v49 = vpop.f32.mrb[48].mxu0  ;;  %v4185_v12 = vsel %vm649_vm3, %v4090_v7, -inf }
0x15ce   :  { %v4182_v22 = vadd.f32 %v11923_v54, %v9898_v49  ;;  %v4176_v20 = vpop.f32.mrb[49].mxu0  ;;  %v8790_v49 = vld [vmem:[%s12743_s8 + $0xa8] sm:$0xff] }
0x15cf   :  { %v4177_v58 = vadd.f32 %v11929_v55, %v4176_v20  ;;  %v8791_v20 = vld [vmem:[%s12743_s8 + $0xb0] sm:$0xff] }
0x15d0   :  { %v4194_v2 = vsel %vm649_vm3, %v4182_v22, -inf }
0x15d1   :  { %4195 = vmax.xlane.f32.xlu1 %v4194_v2  ;;  %v4191_v9 = vsel %vm649_vm3, %v4177_v58, -inf }
0x15d2   :  { %4192 = vmax.xlane.f32.xlu0 %v4191_v9 }
0x15d5   :  { %4189 = vmax.xlane.f32.xlu1 %v4188_v10 }
0x15d6   :  { %4186 = vmax.xlane.f32.xlu0 %v4185_v12  ;;  %v8784_v12 = vld [vmem:[%s12746_s3 + $0x5] ss:$0 sm:$0xff] }
0x165e   :  { %v4196_v13 = vpop.xlane.xlu1 %4195 }
0x165f   :  { %v4200_v15 = vsub.f32 %v4182_v22, %v4196_v13  ;;  %v4193_v6 = vpop.xlane.xlu0 %4192  ;;  %v10592_v22 = vpack.c.bf16 %v8790_v49, %v8789_v19 }
0x1660   :  { %v4199_v62 = vsub.f32 %v4177_v58, %v4193_v6  ;;  %v8792_v58 = vld [vmem:[%s12743_s8 + $0xb8] sm:$0xff] }
0x1661   :  { %v4207_v17 = vmul.f32 1.442695, %v4200_v15 }
0x1662   :  { %v4205_v23 = vmul.f32 1.442695, %v4199_v62  ;;  %v4190_v24 = vpop.xlane.xlu1 %4189 }
0x1663   :  { %10927 = vpow2.f32 %v4207_v17  ;;  %v4198_v25 = vsub.f32 %v4095_v61, %v4190_v24  ;;  %v4187_v56 = vpop.xlane.xlu0 %4186  ;;  %v10596_v61 = vpack.c.bf16 %v8792_v58, %v8791_v20  ;;  %v8774_v17 = vld [vmem:[%s12747_s0 + $0x5] ss:$0 sm:$0xff] }
0x1664   :  { %10929 = vpow2.f32 %v4205_v23  ;;  %v4197_v60 = vsub.f32 %v4090_v7, %v4187_v56 }
0x1665   :  { %v4203_v28 = vmul.f32 1.442695, %v4198_v25 }
0x1666   :  { %v4201_v57 = vmul.f32 1.442695, %v4197_v60 }
0x1667   :  { %10931 = vpow2.f32 %v4203_v28 }
0x1668   :  { %10933 = vpow2.f32 %v4201_v57 }
0x166d   :  { %v10928_v11 = vpop.eup %10927 }
0x166e   :  { %v10930_v31 = vpop.eup %10929  ;;  %v4218_v8 = vsel %vm649_vm3, %v10928_v11, 0.0 }
0x166f   :  { %4219 = vadd.xlane.f32.xlu1 %v4218_v8  ;;  %v4215_v16 = vsel %vm649_vm3, %v10930_v31, 0.0 }
0x1670   :  { %4216 = vadd.xlane.f32.xlu0 %v4215_v16 }
0x1671   :  { %v10932_v4 = vpop.eup %10931 }
0x1672   :  { %v10934_v5 = vpop.eup %10933  ;;  %v4212_v33 = vsel %vm649_vm3, %v10932_v4, 0.0 }
0x1673   :  { %4213 = vadd.xlane.f32.xlu1 %v4212_v33  ;;  %v4209_v34 = vsel %vm649_vm3, %v10934_v5, 0.0 }
0x1674   :  { %4210 = vadd.xlane.f32.xlu0 %v4209_v34 }
0x16fc   :  { %v4220_v38 = vpop.xlane.xlu1 %4219 }
0x16fd   :  { %10935 = vrcp.f32 %v4220_v38  ;;  %v4217_v39 = vpop.xlane.xlu0 %4216 }
0x16fe   :  { %10937 = vrcp.f32 %v4217_v39 }
0x1700   :  { %v4214_v40 = vpop.xlane.xlu1 %4213 }
0x1701   :  { %10939 = vrcp.f32 %v4214_v40  ;;  %v4211_v41 = vpop.xlane.xlu0 %4210 }
0x1702   :  { %10941 = vrcp.f32 %v4211_v41 }
0x1707   :  { %v10936_v14 = vpop.eup %10935 }
0x1708   :  { %v10938_v18 = vpop.eup %10937  ;;  %v4228_v44 = vmul.f32 %v10936_v14, %v10928_v11 }
0x1709   :  { %v4227_v43 = vmul.f32 %v10938_v18, %v10930_v31 }
0x170b   :  { %v10940_v46 = vpop.eup %10939  ;;  %9910 = vmatprep.mubr.msk.f32.mxu0 %vm649_vm3, %v4227_v43 }
0x170c   :  { %v10942_v50 = vpop.eup %10941  ;;  %9911 = vmatmul.mubr.msk.f32.vlgmr.msra.gmra.mrb[50].mxu0 %vm649_vm3, %v4228_v44  ;;  %v4226_v52 = vmul.f32 %v10940_v46, %v10932_v4 }
0x170d   :  { %10587 = vmatpush3.bf16.msra.mxu0 %v10584_v36  ;;  %9935 = vmatprep.mubr.msk.f32.mxu0 %vm96_vm0, %v11866_v26  ;;  %v4225_v51 = vmul.f32 %v10942_v50, %v10934_v5  ;;  %v8794_v5 = vld [vmem:[%s12750_s9 + $0x5] ss:$0 sm:$0xff] }
0x170e   :  { %10589 = vmatprep.subr.bf16.mxu0 %v10588_v45 }
0x170f   :  { %9903 = vmatprep.mubr.msk.f32.mxu1 %vm649_vm3, %v4225_v51 }
0x1710   :  { %9904 = vmatmul.mubr.msk.f32.vlgmr.msra.gmra.mrb[58].mxu1 %vm649_vm3, %v4226_v52 }
0x1711   :  { %10579 = vmatpush3.bf16.msra.mxu1 %v10576_v37  ;;  %10591 = vmatpush3.bf16.msra.mxu0 %v10588_v45 }
0x1712   :  { %9921 = vmatprep.mubr.msk.f32.mxu1 %vm96_vm0, %v11866_v26  ;;  %10581 = vmatprep.subr.bf16.mxu1 %v10580_v53 }
0x1714   :  { %9936 = vmatmul.mubr.msk.f32.vlgmr.msra.gmra.mrb[52].mxu0 %vm96_vm0, %v11869_v0 }
0x1715   :  { %10583 = vmatpush3.bf16.msra.mxu1 %v10580_v53  ;;  %9938 = vmatprep.mubr.msk.f32.mxu0 %vm96_vm0, %v11879_v29 }
0x1716   :  { %10593 = vmatprep.subr.bf16.mxu1 %v10592_v22 }
0x1718   :  { %9922 = vmatmul.mubr.msk.f32.vlgmr.msra.gmra.mrb[60].mxu1 %vm96_vm0, %v11869_v0  ;;  %9939 = vmatmul.mubr.msk.f32.gmra.mrb[54].mxu0 %vm96_vm0, %v11881_v30 }
0x1719   :  { %9924 = vmatprep.mubr.msk.f32.mxu1 %vm96_vm0, %v11879_v29  ;;  %10595 = vmatpush3.bf16.msra.mxu1 %v10592_v22 }
0x171a   :  { %10597 = vmatprep.subr.bf16.mxu1 %v10596_v61 }
0x171c   :  { %9925 = vmatmul.mubr.msk.f32.gmra.mrb[62].mxu1 %vm96_vm0, %v11881_v30 }
0x171d   :  { %10599 = vmatpush3.bf16.msra.mxu1 %v10596_v61  ;;  %9949 = vmatprep.mubr.msk.f32.mxu1 %vm96_vm0, %v11866_v26 }
0x1720   :  { %9950 = vmatmul.mubr.msk.f32.vlgmr.msra.gmra.mrb[64].mxu1 %vm96_vm0, %v11869_v0 }
0x1721   :  { %9952 = vmatprep.mubr.msk.f32.mxu1 %vm96_vm0, %v11879_v29 }
0x1724   :  { %9953 = vmatmul.mubr.msk.f32.gmra.mrb[66].mxu1 %vm96_vm0, %v11881_v30 }
0x17df   :  { %v12016_v2 = vpop.f32.mrb[50].mxu0 }
0x17e0   :  { %v12018_v7 = vpop.f32.mrb[51].mxu0 }
0x17e3   :  { %v12020_v9 = vpop.f32.mrb[58].mxu1 }
0x17e4   :  { %v12022_v10 = vpop.f32.mrb[59].mxu1 }
0x17e7   :  { %v9937_v13 = vpop.f32.mrb[52].mxu0 }
0x17e8   :  { %v4576_v15 = vadd.f32 %v9937_v13, %v8784_v12  ;;  %v4570_v6 = vpop.f32.mrb[53].mxu0 }
0x17e9   :  { %v4571_v62 = vadd.f32 %v8784_v12, %v4570_v6 }
0x17eb   :  { %v10600_v23 = vpack.c.bf16 %v4576_v15, %v4571_v62  ;;  %v9923_v24 = vpop.f32.mrb[60].mxu1  ;;  %v9940_v25 = vpop.f32.mrb[54].mxu0 }
0x17ec   :  { %v4586_v56 = vadd.f32 %v9940_v25, %v8784_v12  ;;  %v4472_v60 = vpop.f32.mrb[61].mxu1  ;;  %v4580_v28 = vpop.f32.mrb[55].mxu0  ;;  %v4478_v33 = vadd.f32 %v9923_v24, %v8774_v17 }
0x17ed   :  { %v4473_v57 = vadd.f32 %v8774_v17, %v4472_v60  ;;  %v4581_v11 = vadd.f32 %v8784_v12, %v4580_v28  ;;  %10602 = vmatprep.subr.msk.bf16.mxu0 %vm11303_vm2, %v10600_v23 }
0x17ee   :  { %10605 = vmatpush3.bf16.xpose.msk.msra.mxu0 %vm11303_vm2, %v10600_v23 }
0x17ef   :  { %v10606_v31 = vpack.c.bf16 %v4586_v56, %v4581_v11  ;;  %v9926_v8 = vpop.f32.mrb[62].mxu1  ;;  %9959 = vmatprep.mubr.msk.f32.mxu0 %vm474_vm1, %v4473_v57 }
0x17f0   :  { %v4482_v16 = vpop.f32.mrb[63].mxu1  ;;  %v4488_v1 = vadd.f32 %v9926_v8, %v8774_v17 }
0x17f1   :  { %v4483_v4 = vadd.f32 %v8774_v17, %v4482_v16  ;;  %10608 = vmatprep.subr.msk.bf16.mxu1 %vm11303_vm2, %v10606_v31 }
0x17f2   :  { %10611 = vmatpush3.bf16.xpose.msk.msra.mxu1 %vm11303_vm2, %v10606_v31 }
0x17f3   :  { %v9951_v34 = vpop.f32.mrb[64].mxu1  ;;  %9966 = vmatprep.mubr.msk.f32.mxu1 %vm474_vm1, %v4483_v4  ;;  %v8820_v4 = vld [vmem:[%s12741_s7 + $0xc0] sm:$0xff] }
0x17f4   :  { %v4674_v63 = vadd.f32 %v9951_v34, %v8794_v5  ;;  %v4668_v35 = vpop.f32.mrb[65].mxu1 }
0x17f5   :  { %v4669_v36 = vadd.f32 %v8794_v5, %v4668_v35  ;;  %9960 = vmatmul.mubr.msk.f32.vlgmr.msra.gmra.mrb[56].mxu0 %vm474_vm1, %v4478_v33 }
0x17f7   :  { %v10612_v32 = vpack.c.bf16 %v4674_v63, %v4669_v36  ;;  %v9954_v37 = vpop.f32.mrb[66].mxu1 }
0x17f8   :  { %v4684_v38 = vadd.f32 %v9954_v37, %v8794_v5  ;;  %v4678_v39 = vpop.f32.mrb[67].mxu1 }
0x17f9   :  { %v4679_v40 = vadd.f32 %v8794_v5, %v4678_v39  ;;  %9967 = vmatmul.mubr.msk.f32.vlgmr.msra.gmra.mrb[68].mxu1 %vm474_vm1, %v4488_v1  ;;  %10613 = vmatprep.subr.bf16.mxu0 %v10612_v32  ;;  %v8821_v5 = vld [vmem:[%s12741_s7 + $0xc8] sm:$0xff]  ;;  %v8822_v1 = vld [vmem:[%s12741_s7 + $0xd0] sm:$0xff] }
0x17fa   :  { %10615 = vmatpush3.bf16.msra.mxu0 %v10612_v32  ;;  %v10620_v35 = vpack.c.bf16 %v8821_v5, %v8820_v4  ;;  %v8823_v32 = vld [vmem:[%s12741_s7 + $0xd8] sm:$0xff] }
0x17fb   :  { %v12045_v41 = vpack.c.bf16 %v4684_v38, %v4679_v40  ;;  %v10624_v40 = vpack.c.bf16 %v8823_v32, %v8822_v1 }
0x17fd   :  { %10617 = vmatprep.subr.bf16.mxu0 %v12045_v41 }
0x18c8   :  { %v9961_v14 = vpop.f32.mrb[56].mxu0 }
0x18c9   :  { %v4771_v27 = vadd.f32 %v11935_v59, %v9961_v14  ;;  %v4765_v42 = vpop.f32.mrb[57].mxu0  ;;  %v8830_v14 = vld [vmem:[%s12742_s5 + $0xc0] sm:$0xff] }
0x18ca   :  { %v4766_v18 = vadd.f32 %v11942_v3, %v4765_v42  ;;  %v8832_v42 = vld [vmem:[%s12742_s5 + $0xd0] sm:$0xff] }
0x18cb   :  { %v4864_v43 = vsel %vm649_vm3, %v4771_v27, -inf }
0x18cc   :  { %v9968_v44 = vpop.f32.mrb[68].mxu1  ;;  %4865 = vmax.xlane.f32.xlu1 %v4864_v43  ;;  %v4861_v45 = vsel %vm649_vm3, %v4766_v18, -inf }
0x18cd   :  { %v4858_v46 = vadd.f32 %v11923_v54, %v9968_v44  ;;  %v4852_v47 = vpop.f32.mrb[69].mxu1  ;;  %4862 = vmax.xlane.f32.xlu0 %v4861_v45  ;;  %v8811_v44 = vld [vmem:[%s12752_s11 + $0x28] sm:$0xff]  ;;  %v8768_v45 = vld [vmem:[%s12752_s11 + $0x20] sm:$0xff] }
0x18ce   :  { %v4853_v48 = vadd.f32 %v11929_v55, %v4852_v47  ;;  %9983 = vmatprep.subr.mxu1 %v8811_v44  ;;  %v8841_v47 = vld [vmem:[%s12743_s8 + $0xc8] sm:$0xff] }
0x18cf   :  { %v4870_v50 = vsel %vm649_vm3, %v4858_v46, -inf  ;;  %9984 = vmatpush3.msra.mxu1 %v8811_v44 }
0x18d0   :  { %4871 = vmax.xlane.f32.xlu1 %v4870_v50  ;;  %v4867_v51 = vsel %vm649_vm3, %v4853_v48, -inf  ;;  %9991 = vmatprep.subr.mxu1 %v8768_v45 }
0x18d1   :  { %4868 = vmax.xlane.f32.xlu0 %v4867_v51 }
0x1959   :  { %v4866_v52 = vpop.xlane.xlu1 %4865 }
0x195a   :  { %v4874_v53 = vsub.f32 %v4771_v27, %v4866_v52  ;;  %v4863_v19 = vpop.xlane.xlu0 %4862  ;;  %v8831_v27 = vld [vmem:[%s12742_s5 + $0xc8] sm:$0xff] }
0x195b   :  { %v4873_v49 = vsub.f32 %v4766_v18, %v4863_v19  ;;  %v8833_v18 = vld [vmem:[%s12742_s5 + $0xd8] sm:$0xff]  ;;  %v8842_v19 = vld [vmem:[%s12743_s8 + $0xd0] sm:$0xff] }
0x195c   :  { %v4879_v22 = vmul.f32 1.442695, %v4874_v53  ;;  %v10632_v43 = vpack.c.bf16 %v8833_v18, %v8832_v42 }
0x195d   :  { %v4877_v20 = vmul.f32 1.442695, %v4873_v49  ;;  %v4872_v58 = vpop.xlane.xlu1 %4871  ;;  %v8843_v49 = vld [vmem:[%s12743_s8 + $0xd8] sm:$0xff] }
0x195e   :  { %10943 = vpow2.f32 %v4879_v22  ;;  %v4876_v61 = vsub.f32 %v4858_v46, %v4872_v58  ;;  %v4869_v12 = vpop.xlane.xlu0 %4868  ;;  %v8840_v46 = vld [vmem:[%s12743_s8 + $0xc0] sm:$0xff]  ;;  %v10640_v22 = vpack.c.bf16 %v8843_v49, %v8842_v19 }
0x195f   :  { %10945 = vpow2.f32 %v4877_v20  ;;  %v4875_v13 = vsub.f32 %v4853_v48, %v4869_v12  ;;  %v10636_v51 = vpack.c.bf16 %v8841_v47, %v8840_v46  ;;  %v8825_v20 = vld [vmem:[%s12747_s0 + $0x6] ss:$0 sm:$0xff] }
0x1960   :  { %v4883_v15 = vmul.f32 1.442695, %v4876_v61 }
0x1961   :  { %v4881_v6 = vmul.f32 1.442695, %v4875_v13  ;;  %v8835_v13 = vld [vmem:[%s12746_s3 + $0x6] ss:$0 sm:$0xff] }
0x1962   :  { %10947 = vpow2.f32 %v4883_v15 }
0x1963   :  { %10949 = vpow2.f32 %v4881_v6 }
0x1968   :  { %v10944_v62 = vpop.eup %10943 }
0x1969   :  { %v10946_v17 = vpop.eup %10945  ;;  %v4888_v23 = vsel %vm649_vm3, %v10944_v62, 0.0 }
0x196a   :  { %4889 = vadd.xlane.f32.xlu1 %v4888_v23  ;;  %v4885_v24 = vsel %vm649_vm3, %v10946_v17, 0.0 }
0x196b   :  { %4886 = vadd.xlane.f32.xlu0 %v4885_v24 }
0x196c   :  { %v10948_v25 = vpop.eup %10947 }
0x196d   :  { %v10950_v56 = vpop.eup %10949  ;;  %v4894_v60 = vsel %vm649_vm3, %v10948_v25, 0.0 }
0x196e   :  { %4895 = vadd.xlane.f32.xlu1 %v4894_v60  ;;  %v4891_v28 = vsel %vm649_vm3, %v10950_v56, 0.0 }
0x196f   :  { %4892 = vadd.xlane.f32.xlu0 %v4891_v28 }
0x19f7   :  { %v4890_v57 = vpop.xlane.xlu1 %4889 }
0x19f8   :  { %10951 = vrcp.f32 %v4890_v57  ;;  %v4887_v11 = vpop.xlane.xlu0 %4886 }
0x19f9   :  { %10953 = vrcp.f32 %v4887_v11  ;;  %v8845_v11 = vld [vmem:[%s12750_s9 + $0x6] ss:$0 sm:$0xff] }
0x19fb   :  { %v4896_v31 = vpop.xlane.xlu1 %4895 }
0x19fc   :  { %10955 = vrcp.f32 %v4896_v31  ;;  %v4893_v8 = vpop.xlane.xlu0 %4892 }
0x19fd   :  { %10957 = vrcp.f32 %v4893_v8 }
0x1a02   :  { %v10952_v16 = vpop.eup %10951 }
0x1a03   :  { %v10954_v33 = vpop.eup %10953  ;;  %v4902_v63 = vmul.f32 %v10952_v16, %v10944_v62 }
0x1a04   :  { %v4901_v34 = vmul.f32 %v10954_v33, %v10946_v17 }
0x1a06   :  { %v10956_v36 = vpop.eup %10955  ;;  %9973 = vmatprep.mubr.msk.f32.mxu0 %vm649_vm3, %v4901_v34 }
0x1a07   :  { %v10958_v37 = vpop.eup %10957  ;;  %9974 = vmatmul.mubr.msk.f32.vlgmr.msra.gmra.mrb[58].mxu0 %vm649_vm3, %v4902_v63  ;;  %v4904_v39 = vmul.f32 %v10956_v36, %v10948_v25 }
0x1a08   :  { %10619 = vmatpush3.bf16.msra.mxu0 %v12045_v41  ;;  %v4903_v38 = vmul.f32 %v10958_v37, %v10950_v56  ;;  %v10628_v41 = vpack.c.bf16 %v8831_v27, %v8830_v14 }
0x1a09   :  { %10621 = vmatprep.subr.bf16.mxu0 %v10620_v35 }
0x1a0a   :  { %9980 = vmatprep.mubr.msk.f32.mxu0 %vm649_vm3, %v4903_v38 }
0x1a0b   :  { %9981 = vmatmul.mubr.msk.f32.vlgmr.msra.gmra.mrb[60].mxu0 %vm649_vm3, %v4904_v39 }
0x1a0c   :  { %10623 = vmatpush3.bf16.msra.mxu0 %v10620_v35  ;;  %10007 = vmatprep.mubr.msk.f32.mxu0 %vm96_vm0, %v11866_v26 }
0x1a0d   :  { %10625 = vmatprep.subr.bf16.mxu0 %v10624_v40 }
0x1a10   :  { %10627 = vmatpush3.bf16.msra.mxu0 %v10624_v40 }
0x1a11   :  { %10629 = vmatprep.subr.bf16.mxu0 %v10628_v41 }
0x1a13   :  { %10008 = vmatmul.mubr.msk.f32.vlgmr.msra.gmra.mrb[62].mxu0 %vm96_vm0, %v11869_v0 }
0x1a14   :  { %10010 = vmatprep.mubr.msk.f32.mxu0 %vm96_vm0, %v11879_v29  ;;  %10631 = vmatpush3.bf16.msra.mxu0 %v10628_v41 }
0x1a15   :  { %10633 = vmatprep.subr.bf16.mxu0 %v10632_v43 }
0x1a17   :  { %10011 = vmatmul.mubr.msk.f32.gmra.mrb[64].mxu0 %vm96_vm0, %v11881_v30 }
0x1a18   :  { %10635 = vmatpush3.bf16.msra.mxu0 %v10632_v43  ;;  %10021 = vmatprep.mubr.msk.f32.mxu0 %vm96_vm0, %v11866_v26 }
0x1a1b   :  { %10022 = vmatmul.mubr.msk.f32.vlgmr.msra.gmra.mrb[66].mxu0 %vm96_vm0, %v11869_v0 }
0x1a1c   :  { %10024 = vmatprep.mubr.msk.f32.mxu0 %vm96_vm0, %v11879_v29 }
0x1a1f   :  { %10025 = vmatmul.mubr.msk.f32.gmra.mrb[68].mxu0 %vm96_vm0, %v11881_v30 }
0x1ada   :  { %v9975_v48 = vpop.f32.mrb[58].mxu0 }
0x1adb   :  { %v4977_v50 = vpop.f32.mrb[59].mxu0 }
0x1adc   :  { %9985 = vmatprep.mubr.msk.f32.mxu1 %vm474_vm1, %v4977_v50 }
0x1add   :  { %9986 = vmatmul.mubr.msk.f32.vlgmr.msra.gmra.mrb[70].mxu1 %vm474_vm1, %v9975_v48 }
0x1ade   :  { %v9982_v52 = vpop.f32.mrb[60].mxu0  ;;  %9992 = vmatpush3.msra.mxu1 %v8768_v45 }
0x1adf   :  { %v5058_v53 = vpop.f32.mrb[61].mxu0  ;;  %10637 = vmatprep.subr.bf16.mxu1 %v10636_v51 }
0x1ae0   :  { %9988 = vmatprep.mubr.msk.f32.mxu1 %vm474_vm1, %v5058_v53 }
0x1ae1   :  { %9989 = vmatmul.mubr.msk.f32.gmra.mrb[72].mxu1 %vm474_vm1, %v9982_v52 }
0x1ae2   :  { %9993 = vmatprep.mubr.msk.f32.mxu1 %vm474_vm1, %v12022_v10 }
0x1ae5   :  { %9994 = vmatmul.mubr.msk.f32.vlgmr.msra.gmra.mrb[70].mxu1 %vm474_vm1, %v12020_v9 }
0x1ae6   :  { %v10009_v58 = vpop.f32.mrb[62].mxu0  ;;  %9996 = vmatprep.mubr.msk.f32.mxu1 %vm474_vm1, %v12018_v7  ;;  %10639 = vmatpush3.bf16.msra.mxu1 %v10636_v51 }
0x1ae7   :  { %v5342_v61 = vpop.f32.mrb[63].mxu0  ;;  %10641 = vmatprep.subr.bf16.mxu1 %v10640_v22  ;;  %v5348_v28 = vadd.f32 %v10009_v58, %v8825_v20 }
0x1ae8   :  { %v5343_v12 = vadd.f32 %v8825_v20, %v5342_v61 }
0x1ae9   :  { %9997 = vmatmul.mubr.msk.f32.gmra.mrb[72].mxu1 %vm474_vm1, %v12016_v2 }
0x1aea   :  { %v10012_v10 = vpop.f32.mrb[64].mxu0  ;;  %10045 = vmatprep.mubr.msk.f32.mxu0 %vm474_vm1, %v5343_v12  ;;  %10643 = vmatpush3.bf16.msra.mxu1 %v10640_v22 }
0x1aeb   :  { %v5352_v9 = vpop.f32.mrb[65].mxu0  ;;  %10035 = vmatprep.mubr.msk.f32.mxu1 %vm96_vm0, %v11866_v26  ;;  %v5358_v57 = vadd.f32 %v10012_v10, %v8825_v20 }
0x1aec   :  { %v5353_v6 = vadd.f32 %v8825_v20, %v5352_v9 }
0x1aed   :  { %10036 = vmatmul.mubr.msk.f32.vlgmr.msra.gmra.mrb[74].mxu1 %vm96_vm0, %v11869_v0 }
0x1aee   :  { %v10023_v7 = vpop.f32.mrb[66].mxu0  ;;  %10038 = vmatprep.mubr.msk.f32.mxu1 %vm96_vm0, %v11879_v29 }
0x1aef   :  { %v5446_v2 = vadd.f32 %v10023_v7, %v8835_v13  ;;  %v5440_v15 = vpop.f32.mrb[67].mxu0 }
0x1af0   :  { %v5441_v62 = vadd.f32 %v8835_v13, %v5440_v15  ;;  %v8868_v15 = vld [vmem:[%s12741_s7 + $0xe8] sm:$0xff] }
0x1af1   :  { %10039 = vmatmul.mubr.msk.f32.gmra.mrb[76].mxu1 %vm96_vm0, %v11881_v30 }
0x1af2   :  { %v10644_v17 = vpack.c.bf16 %v5446_v2, %v5441_v62  ;;  %v10026_v23 = vpop.f32.mrb[68].mxu0  ;;  %10052 = vmatprep.mubr.msk.f32.mxu1 %vm474_vm1, %v5353_v6  ;;  %v8867_v2 = vld [vmem:[%s12741_s7 + $0xe0] sm:$0xff]  ;;  %v8862_v62 = vld [vmem:[%s12752_s11 + $0x30] sm:$0xff] }
0x1af3   :  { %v5456_v24 = vadd.f32 %v10026_v23, %v8835_v13  ;;  %v5450_v25 = vpop.f32.mrb[69].mxu0  ;;  %v10664_v6 = vpack.c.bf16 %v8868_v15, %v8867_v2  ;;  %v8882_v2 = vld [vmem:[%s12746_s3 + $0x7] ss:$0 sm:$0xff]  ;;  %s8529_s3 = sshll.u32 %s11045_s2, 4  ;;  %s8530_s3 = int_to_ptr.vmem [resolvable:$true] %s8529_s3 }
0x1af4   :  { %v5451_v56 = vadd.f32 %v8835_v13, %v5450_v25  ;;  %10646 = vmatprep.subr.msk.bf16.mxu0 %vm11303_vm2, %v10644_v17  ;;  %p11024_p1 = scmp.lt.s32.totalorder %s8530_s3, %s8530_s3 }
0x1af5   :  { %10649 = vmatpush3.bf16.xpose.msk.msra.mxu0 %vm11303_vm2, %v10644_v17 }
0x1af6   :  { %v10650_v60 = vpack.c.bf16 %v5456_v24, %v5451_v56 }
0x1af8   :  { %10652 = vmatprep.subr.msk.bf16.mxu1 %vm11303_vm2, %v10650_v60 }
0x1af9   :  { %10655 = vmatpush3.bf16.xpose.msk.msra.mxu1 %vm11303_vm2, %v10650_v60  ;;  %v8869_v60 = vld [vmem:[%s12741_s7 + $0xf0] sm:$0xff] }
0x1afc   :  { %10046 = vmatmul.mubr.msk.f32.vlgmr.msra.gmra.mrb[70].mxu0 %vm474_vm1, %v5348_v28  ;;  %v8870_v28 = vld [vmem:[%s12741_s7 + $0xf8] sm:$0xff] }
0x1b00   :  { %10053 = vmatmul.mubr.msk.f32.vlgmr.msra.gmra.mrb[78].mxu1 %vm474_vm1, %v5358_v57 }
0x1bc0   :  { %v10037_v31 = vpop.f32.mrb[74].mxu1 }
0x1bc1   :  { %v5544_v8 = vadd.f32 %v10037_v31, %v8845_v11  ;;  %v5538_v16 = vpop.f32.mrb[75].mxu1 }
0x1bc2   :  { %v5539_v4 = vadd.f32 %v8845_v11, %v5538_v16 }
0x1bc4   :  { %v10656_v5 = vpack.c.bf16 %v5544_v8, %v5539_v4  ;;  %v10040_v33 = vpop.f32.mrb[76].mxu1  ;;  %v10668_v8 = vpack.c.bf16 %v8870_v28, %v8869_v60  ;;  %v8887_v4 = vld [vmem:[%s12743_s8 + $0xe0] sm:$0xff] }
0x1bc5   :  { %v5554_v34 = vadd.f32 %v10040_v33, %v8845_v11  ;;  %v5548_v63 = vpop.f32.mrb[77].mxu1 }
0x1bc6   :  { %v5549_v35 = vadd.f32 %v8845_v11, %v5548_v63  ;;  %10657 = vmatprep.subr.bf16.mxu0 %v10656_v5 }
0x1bc7   :  { %10659 = vmatpush3.bf16.msra.mxu0 %v10656_v5  ;;  %v8888_v5 = vld [vmem:[%s12743_s8 + $0xe8] sm:$0xff] }
0x1bc8   :  { %v10660_v36 = vpack.c.bf16 %v5554_v34, %v5549_v35  ;;  %10665 = vmatprep.subr.bf16.mxu0 %v10664_v6  ;;  %v10680_v35 = vpack.c.bf16 %v8888_v5, %v8887_v4 }
0x1bca   :  { %10661 = vmatprep.subr.bf16.mxu1 %v10660_v36 }
0x1bcb   :  { %10663 = vmatpush3.bf16.msra.mxu1 %v10660_v36  ;;  %v8889_v36 = vld [vmem:[%s12743_s8 + $0xf0] sm:$0xff] }
0x1bcc   :  { %10069 = vmatprep.subr.mxu1 %v8862_v62 }
0x1bcf   :  { %v10047_v1 = vpop.f32.mrb[70].mxu0 }
0x1bd0   :  { %v5641_v32 = vadd.f32 %v11935_v59, %v10047_v1  ;;  %v5635_v37 = vpop.f32.mrb[71].mxu0  ;;  %v8890_v1 = vld [vmem:[%s12743_s8 + $0xf8] sm:$0xff] }
0x1bd1   :  { %v5636_v38 = vadd.f32 %v11942_v3, %v5635_v37  ;;  %v8877_v37 = vld [vmem:[%s12742_s5 + $0xe0] sm:$0xff] }
0x1bd2   :  { %v5734_v39 = vsel %vm649_vm3, %v5641_v32, -inf }
0x1bd3   :  { %5735 = vmax.xlane.f32.xlu1 %v5734_v39  ;;  %v10054_v40 = vpop.f32.mrb[78].mxu1  ;;  %v5731_v14 = vsel %vm649_vm3, %v5636_v38, -inf }
0x1bd4   :  { %v5728_v27 = vadd.f32 %v11923_v54, %v10054_v40  ;;  %5732 = vmax.xlane.f32.xlu0 %v5731_v14  ;;  %v5722_v41 = vpop.f32.mrb[79].mxu1  ;;  %v8879_v40 = vld [vmem:[%s12742_s5 + $0xf0] sm:$0xff]  ;;  %v8880_v14 = vld [vmem:[%s12742_s5 + $0xf8] sm:$0xff] }
0x1bd5   :  { %v5723_v42 = vadd.f32 %v11929_v55, %v5722_v41 }
0x1bd6   :  { %v5740_v18 = vsel %vm649_vm3, %v5728_v27, -inf }
0x1bd7   :  { %5741 = vmax.xlane.f32.xlu1 %v5740_v18  ;;  %v5737_v43 = vsel %vm649_vm3, %v5723_v42, -inf }
0x1bd8   :  { %5738 = vmax.xlane.f32.xlu0 %v5737_v43 }
0x1c60   :  { %v5736_v44 = vpop.xlane.xlu1 %5735 }
0x1c61   :  { %v5744_v45 = vsub.f32 %v5641_v32, %v5736_v44  ;;  %v5733_v46 = vpop.xlane.xlu0 %5732  ;;  %v10684_v32 = vpack.c.bf16 %v8890_v1, %v8889_v36  ;;  %v8872_v44 = vld [vmem:[%s12747_s0 + $0x7] ss:$0 sm:$0xff] }
0x1c62   :  { %v5743_v47 = vsub.f32 %v5636_v38, %v5733_v46  ;;  %v8878_v38 = vld [vmem:[%s12742_s5 + $0xe8] sm:$0xff] }
0x1c63   :  { %v5749_v48 = vmul.f32 1.442695, %v5744_v45  ;;  %v10672_v39 = vpack.c.bf16 %v8878_v38, %v8877_v37 }
0x1c64   :  { %v5747_v50 = vmul.f32 1.442695, %v5743_v47  ;;  %v5742_v51 = vpop.xlane.xlu1 %5741 }
0x1c65   :  { %10959 = vpow2.f32 %v5749_v48  ;;  %v5746_v52 = vsub.f32 %v5728_v27, %v5742_v51  ;;  %v5739_v53 = vpop.xlane.xlu0 %5738 }
0x1c66   :  { %10961 = vpow2.f32 %v5747_v50  ;;  %v5745_v19 = vsub.f32 %v5723_v42, %v5739_v53  ;;  %v10676_v42 = vpack.c.bf16 %v8880_v14, %v8879_v40 }
0x1c67   :  { %v5753_v49 = vmul.f32 1.442695, %v5746_v52 }
0x1c68   :  { %v5751_v22 = vmul.f32 1.442695, %v5745_v19  ;;  %v8892_v19 = vld [vmem:[%s12750_s9 + $0x7] ss:$0 sm:$0xff]  ;;  %s11019_s9 = scalar_lea.vmem %s8530_s3, 32 }
0x1c69   :  { %10963 = vpow2.f32 %v5753_v49  ;;  %p11020_p0 = scmp.ne.s32.totalorder %s8530_s3, %s11019_s9  ;;  %p11025_p2 = scmp.lt.s32.totalorder %s11019_s9, %s11019_s9 }
0x1c6a   :  { %10965 = vpow2.f32 %v5751_v22 }
0x1c6b   :  { %p11026_p3 = por %p11025_p2, %p11024_p1 }
0x1c6d   :  { %p11027_p4 = pnand %p11026_p3, %p11020_p0 }
0x1c6f   :  { %v10960_v20 = vpop.eup %10959 }
0x1c70   :  { %v10962_v58 = vpop.eup %10961  ;;  %v5758_v61 = vsel %vm649_vm3, %v10960_v20, 0.0 }
0x1c71   :  { %5759 = vadd.xlane.f32.xlu1 %v5758_v61  ;;  %v5755_v12 = vsel %vm649_vm3, %v10962_v58, 0.0 }
0x1c72   :  { %5756 = vadd.xlane.f32.xlu0 %v5755_v12 }
0x1c73   :  { %v10964_v10 = vpop.eup %10963 }
0x1c74   :  { %v10966_v9 = vpop.eup %10965  ;;  %v5764_v13 = vsel %vm649_vm3, %v10964_v10, 0.0 }
0x1c75   :  { %5765 = vadd.xlane.f32.xlu1 %v5764_v13  ;;  %v5761_v7 = vsel %vm649_vm3, %v10966_v9, 0.0 }
0x1c76   :  { %5762 = vadd.xlane.f32.xlu0 %v5761_v7 }
0x1cfe   :  { %v5760_v17 = vpop.xlane.xlu1 %5759 }
0x1cff   :  { %10967 = vrcp.f32 %v5760_v17  ;;  %v5757_v23 = vpop.xlane.xlu0 %5756 }
0x1d00   :  { %10969 = vrcp.f32 %v5757_v23 }
0x1d02   :  { %v5766_v24 = vpop.xlane.xlu1 %5765 }
0x1d03   :  { %10971 = vrcp.f32 %v5766_v24  ;;  %v5763_v25 = vpop.xlane.xlu0 %5762 }
0x1d04   :  { %10973 = vrcp.f32 %v5763_v25 }
0x1d09   :  { %v10968_v56 = vpop.eup %10967 }
0x1d0a   :  { %v10970_v57 = vpop.eup %10969  ;;  %v5772_v31 = vmul.f32 %v10968_v56, %v10960_v20 }
0x1d0b   :  { %v5771_v11 = vmul.f32 %v10970_v57, %v10962_v58 }
0x1d0d   :  { %v10972_v16 = vpop.eup %10971  ;;  %10059 = vmatprep.mubr.msk.f32.mxu0 %vm649_vm3, %v5771_v11 }
0x1d0e   :  { %v10974_v33 = vpop.eup %10973  ;;  %10060 = vmatmul.mubr.msk.f32.vlgmr.msra.gmra.mrb[72].mxu0 %vm649_vm3, %v5772_v31  ;;  %v5774_v63 = vmul.f32 %v10972_v16, %v10964_v10 }
0x1d0f   :  { %10667 = vmatpush3.bf16.msra.mxu0 %v10664_v6  ;;  %10085 = vmatprep.mubr.msk.f32.mxu0 %vm96_vm0, %v11866_v26  ;;  %v5773_v34 = vmul.f32 %v10974_v33, %v10966_v9 }
0x1d10   :  { %10669 = vmatprep.subr.bf16.mxu0 %v10668_v8 }
0x1d11   :  { %10066 = vmatprep.mubr.msk.f32.mxu1 %vm649_vm3, %v5773_v34 }
0x1d12   :  { %10067 = vmatmul.mubr.msk.f32.vlgmr.msra.gmra.mrb[80].mxu1 %vm649_vm3, %v5774_v63 }
0x1d13   :  { %10671 = vmatpush3.bf16.msra.mxu0 %v10668_v8  ;;  %10070 = vmatpush3.msra.mxu1 %v8862_v62 }
0x1d14   :  { %10681 = vmatprep.subr.bf16.mxu0 %v10680_v35  ;;  %10673 = vmatprep.subr.bf16.mxu1 %v10672_v39 }
0x1d16   :  { %10086 = vmatmul.mubr.msk.f32.vlgmr.msra.gmra.mrb[74].mxu0 %vm96_vm0, %v11869_v0 }
0x1d17   :  { %10088 = vmatprep.mubr.msk.f32.mxu0 %vm96_vm0, %v11879_v29  ;;  %10683 = vmatpush3.bf16.msra.mxu0 %v10680_v35 }
0x1d18   :  { %10685 = vmatprep.subr.bf16.mxu0 %v10684_v32 }
0x1d1a   :  { %10089 = vmatmul.mubr.msk.f32.gmra.mrb[76].mxu0 %vm96_vm0, %v11881_v30 }
0x1d1b   :  { %10687 = vmatpush3.bf16.msra.mxu0 %v10684_v32  ;;  %10113 = vmatprep.mubr.msk.f32.mxu0 %vm96_vm0, %v11866_v26 }
0x1d1e   :  { %10114 = vmatmul.mubr.msk.f32.vlgmr.msra.gmra.mrb[78].mxu0 %vm96_vm0, %v11869_v0 }
0x1d1f   :  { %10116 = vmatprep.mubr.msk.f32.mxu0 %vm96_vm0, %v11879_v29 }
0x1d22   :  { %10117 = vmatmul.mubr.msk.f32.gmra.mrb[80].mxu0 %vm96_vm0, %v11881_v30 }
0x1de1   :  { %v10061_v27 = vpop.f32.mrb[72].mxu0 }
0x1de2   :  { %v5847_v41 = vpop.f32.mrb[73].mxu0 }
0x1de3   :  { %10071 = vmatprep.mubr.msk.f32.mxu1 %vm474_vm1, %v5847_v41 }
0x1de4   :  { %10072 = vmatmul.mubr.msk.f32.vlgmr.msra.gmra.mrb[70].mxu1 %vm474_vm1, %v10061_v27 }
0x1de5   :  { %v10068_v18 = vpop.f32.mrb[80].mxu1  ;;  %10675 = vmatpush3.bf16.msra.mxu1 %v10672_v39 }
0x1de6   :  { %v5928_v43 = vpop.f32.mrb[81].mxu1  ;;  %10677 = vmatprep.subr.bf16.mxu1 %v10676_v42 }
0x1de7   :  { %10074 = vmatprep.mubr.msk.f32.mxu1 %vm474_vm1, %v5928_v43 }
0x1de8   :  { %10075 = vmatmul.mubr.msk.f32.gmra.mrb[72].mxu1 %vm474_vm1, %v10068_v18 }
0x1de9   :  { %v10087_v45 = vpop.f32.mrb[74].mxu0  ;;  %10679 = vmatpush3.bf16.msra.mxu1 %v10676_v42  ;;  %10099 = vmatprep.mubr.msk.f32.mxu1 %vm96_vm0, %v11866_v26 }
0x1dea   :  { %v6125_v46 = vadd.f32 %v10087_v45, %v8872_v44  ;;  %v6119_v47 = vpop.f32.mrb[75].mxu0 }
0x1deb   :  { %v6120_v52 = vadd.f32 %v8872_v44, %v6119_v47  ;;  %v8909_v47 = vld [vmem:[%s12752_s11 + $0x38] sm:$0xff] }
0x1dec   :  { %10100 = vmatmul.mubr.msk.f32.vlgmr.msra.gmra.mrb[82].mxu1 %vm96_vm0, %v11869_v0 }
0x1ded   :  { %v10090_v48 = vpop.f32.mrb[76].mxu0  ;;  %10102 = vmatprep.mubr.msk.f32.mxu1 %vm96_vm0, %v11879_v29 }
0x1dee   :  { %v6135_v50 = vadd.f32 %v10090_v48, %v8872_v44  ;;  %v6129_v51 = vpop.f32.mrb[77].mxu0 }
0x1def   :  { %v6130_v53 = vadd.f32 %v8872_v44, %v6129_v51 }
0x1df0   :  { %10103 = vmatmul.mubr.msk.f32.gmra.mrb[84].mxu1 %vm96_vm0, %v11881_v30 }
0x1df1   :  { %v10115_v49 = vpop.f32.mrb[78].mxu0  ;;  %10130 = vmatprep.mubr.msk.f32.mxu0 %vm474_vm1, %v6130_v53  ;;  %10123 = vmatprep.mubr.msk.f32.mxu1 %vm474_vm1, %v6120_v52 }
0x1df2   :  { %v6321_v22 = vadd.f32 %v10115_v49, %v8892_v19  ;;  %v6315_v20 = vpop.f32.mrb[79].mxu0 }
0x1df3   :  { %v6316_v58 = vadd.f32 %v8892_v19, %v6315_v20 }
0x1df5   :  { %v10700_v61 = vpack.c.bf16 %v6321_v22, %v6316_v58  ;;  %v10118_v12 = vpop.f32.mrb[80].mxu0 }
0x1df6   :  { %v6331_v10 = vadd.f32 %v10118_v12, %v8892_v19  ;;  %v6325_v9 = vpop.f32.mrb[81].mxu0 }
0x1df7   :  { %v6326_v13 = vadd.f32 %v8892_v19, %v6325_v9 }
0x1df9   :  { %v10704_v7 = vpack.c.bf16 %v6331_v10, %v6326_v13 }
0x1ebf   :  { %v10101_v15 = vpop.f32.mrb[82].mxu1 }
0x1ec0   :  { %v6223_v6 = vadd.f32 %v10101_v15, %v8882_v2  ;;  %v6217_v62 = vpop.f32.mrb[83].mxu1 }
0x1ec1   :  { %v6218_v17 = vadd.f32 %v8882_v2, %v6217_v62 }
0x1ec3   :  { %v10688_v23 = vpack.c.bf16 %v6223_v6, %v6218_v17  ;;  %v10104_v24 = vpop.f32.mrb[84].mxu1 }
0x1ec4   :  { %v6233_v25 = vadd.f32 %v10104_v24, %v8882_v2  ;;  %v6227_v56 = vpop.f32.mrb[85].mxu1 }
0x1ec5   :  { %v6228_v60 = vadd.f32 %v8882_v2, %v6227_v56  ;;  %10690 = vmatprep.subr.msk.bf16.mxu1 %vm11303_vm2, %v10688_v23  ;;  %v8915_v2 = vld [vmem:[%s12753_s4 + $0x1] ss:$0 sm:$0xff] }
0x1ec6   :  { %10693 = vmatpush3.bf16.xpose.msk.msra.mxu1 %vm11303_vm2, %v10688_v23 }
0x1ec7   :  { %v10694_v28 = vpack.c.bf16 %v6233_v25, %v6228_v60  ;;  %10701 = vmatprep.subr.bf16.mxu1 %v10700_v61 }
0x1ec9   :  { %10696 = vmatprep.subr.msk.bf16.mxu0 %vm11303_vm2, %v10694_v28 }
0x1eca   :  { %10699 = vmatpush3.bf16.xpose.msk.msra.mxu0 %vm11303_vm2, %v10694_v28 }
0x1ecb   :  { %10705 = vmatprep.subr.bf16.mxu0 %v10704_v7 }
0x1ecd   :  { %10124 = vmatmul.mubr.msk.f32.vlgmr.msra.gmra.mrb[86].mxu1 %vm474_vm1, %v6125_v46 }
0x1ece   :  { %10703 = vmatpush3.bf16.msra.mxu1 %v10700_v61 }
0x1ecf   :  { %10147 = vmatprep.subr.mxu1 %v8909_v47 }
0x1ed1   :  { %10131 = vmatmul.mubr.msk.f32.vlgmr.msra.gmra.mrb[82].mxu0 %vm474_vm1, %v6135_v50 }
0x1ed2   :  { %10707 = vmatpush3.bf16.msra.mxu0 %v10704_v7 }
0x1fa0   :  { %v10125_v57 = vpop.f32.mrb[86].mxu1 }
0x1fa1   :  { %v6418_v11 = vadd.f32 %v11935_v59, %v10125_v57  ;;  %v6412_v31 = vpop.f32.mrb[87].mxu1 }
0x1fa2   :  { %v6413_v8 = vadd.f32 %v11942_v3, %v6412_v31 }
0x1fa3   :  { %v6511_v16 = vsel %vm649_vm3, %v6418_v11, -inf }
0x1fa4   :  { %v10132_v4 = vpop.f32.mrb[82].mxu0  ;;  %6512 = vmax.xlane.f32.xlu1 %v6511_v16  ;;  %v6508_v21 = vsel %vm649_vm3, %v6413_v8, -inf }
0x1fa5   :  { %v6505_v5 = vadd.f32 %v11923_v54, %v10132_v4  ;;  %v6499_v33 = vpop.f32.mrb[83].mxu0  ;;  %6509 = vmax.xlane.f32.xlu0 %v6508_v21 }
0x1fa6   :  { %v6500_v34 = vadd.f32 %v11929_v55, %v6499_v33 }
0x1fa7   :  { %v6517_v63 = vsel %vm649_vm3, %v6505_v5, -inf }
0x1fa8   :  { %6518 = vmax.xlane.f32.xlu1 %v6517_v63  ;;  %v6514_v59 = vsel %vm649_vm3, %v6500_v34, -inf }
0x1fa9   :  { %6515 = vmax.xlane.f32.xlu0 %v6514_v59 }
0x2031   :  { %v6513_v35 = vpop.xlane.xlu1 %6512 }
0x2032   :  { %v6521_v3 = vsub.f32 %v6418_v11, %v6513_v35  ;;  %v6510_v36 = vpop.xlane.xlu0 %6509 }
0x2033   :  { %v6520_v1 = vsub.f32 %v6413_v8, %v6510_v36 }
0x2034   :  { %v6526_v32 = vmul.f32 1.442695, %v6521_v3 }
0x2035   :  { %v6524_v37 = vmul.f32 1.442695, %v6520_v1  ;;  %v6519_v38 = vpop.xlane.xlu1 %6518 }
0x2036   :  { %10975 = vpow2.f32 %v6526_v32  ;;  %v6523_v39 = vsub.f32 %v6505_v5, %v6519_v38  ;;  %v6516_v54 = vpop.xlane.xlu0 %6515 }
0x2037   :  { %10977 = vpow2.f32 %v6524_v37  ;;  %v6522_v40 = vsub.f32 %v6500_v34, %v6516_v54 }
0x2038   :  { %v6530_v14 = vmul.f32 1.442695, %v6523_v39 }
0x2039   :  { %v6528_v55 = vmul.f32 1.442695, %v6522_v40 }
0x203a   :  { %10979 = vpow2.f32 %v6530_v14  ;;  %v8920_v14 = vld [vmem:[%s12696_s14 + $0x20] sm:$0xff] }
0x203b   :  { %10981 = vpow2.f32 %v6528_v55  ;;  %v8921_v55 = vld [vmem:[%s12696_s14 + $0x28] sm:$0xff] }
0x2040   :  { %v10976_v27 = vpop.eup %10975 }
0x2041   :  { %v10978_v41 = vpop.eup %10977  ;;  %v6535_v42 = vsel %vm649_vm3, %v10976_v27, 0.0 }
0x2042   :  { %6536 = vadd.xlane.f32.xlu1 %v6535_v42  ;;  %v6532_v18 = vsel %vm649_vm3, %v10978_v41, 0.0  ;;  %v8923_v42 = vld [vmem:[%s12696_s14 + $0x38] sm:$0xff] }
0x2043   :  { %6533 = vadd.xlane.f32.xlu0 %v6532_v18 }
0x2044   :  { %v10980_v43 = vpop.eup %10979 }
0x2045   :  { %v10982_v44 = vpop.eup %10981  ;;  %v6541_v45 = vsel %vm649_vm3, %v10980_v43, 0.0 }
0x2046   :  { %6542 = vadd.xlane.f32.xlu1 %v6541_v45  ;;  %v6538_v46 = vsel %vm649_vm3, %v10982_v44, 0.0 }
0x2047   :  { %6539 = vadd.xlane.f32.xlu0 %v6538_v46 }
0x20cf   :  { %v6537_v48 = vpop.xlane.xlu1 %6536 }
0x20d0   :  { %10983 = vrcp.f32 %v6537_v48  ;;  %v6534_v50 = vpop.xlane.xlu0 %6533 }
0x20d1   :  { %10985 = vrcp.f32 %v6534_v50 }
0x20d3   :  { %v6543_v51 = vpop.xlane.xlu1 %6542 }
0x20d4   :  { %10987 = vrcp.f32 %v6543_v51  ;;  %v6540_v52 = vpop.xlane.xlu0 %6539 }
0x20d5   :  { %10989 = vrcp.f32 %v6540_v52 }
0x20da   :  { %v10984_v53 = vpop.eup %10983 }
0x20db   :  { %v10986_v19 = vpop.eup %10985  ;;  %v6549_v22 = vmul.f32 %v10984_v53, %v10976_v27  ;;  %v10708_v27 = vpack.c.bf16 %v8921_v55, %v8920_v14 }
0x20dc   :  { %v6548_v49 = vmul.f32 %v10986_v19, %v10978_v41  ;;  %v8922_v41 = vld [vmem:[%s12696_s14 + $0x30] sm:$0xff] }
0x20dd   :  { %10709 = vmatprep.subr.bf16.mxu0 %v10708_v27  ;;  %v10712_v18 = vpack.c.bf16 %v8923_v42, %v8922_v41 }
0x20de   :  { %v10988_v20 = vpop.eup %10987  ;;  %10137 = vmatprep.mubr.msk.f32.mxu1 %vm649_vm3, %v6548_v49 }
0x20df   :  { %v10990_v58 = vpop.eup %10989  ;;  %10138 = vmatmul.mubr.msk.f32.vlgmr.msra.gmra.mrb[88].mxu1 %vm649_vm3, %v6549_v22  ;;  %v6551_v12 = vmul.f32 %v10988_v20, %v10980_v43  ;;  %v8918_v20 = vld [vmem:[%s12754_s6 + $0x1] ss:$0 sm:$0xff] }
0x20e0   :  { %v6550_v61 = vmul.f32 %v10990_v58, %v10982_v44  ;;  %10148 = vmatpush3.msra.mxu1 %v8909_v47 }
0x20e2   :  { %10144 = vmatprep.mubr.msk.f32.mxu0 %vm649_vm3, %v6550_v61 }
0x20e3   :  { %10145 = vmatmul.mubr.msk.f32.vlgmr.msra.gmra.mrb[84].mxu0 %vm649_vm3, %v6551_v12 }
0x20e4   :  { %10711 = vmatpush3.bf16.msra.mxu0 %v10708_v27 }
0x20e5   :  { %10713 = vmatprep.subr.bf16.mxu0 %v10712_v18 }
0x20e8   :  { %10715 = vmatpush3.bf16.msra.mxu0 %v10712_v18 }
0x21b2   :  { %v10139_v10 = vpop.f32.mrb[88].mxu1 }
0x21b3   :  { %v6624_v9 = vpop.f32.mrb[89].mxu1 }
0x21b4   :  { %10149 = vmatprep.mubr.msk.f32.mxu1 %vm474_vm1, %v6624_v9 }
0x21b5   :  { %10150 = vmatmul.mubr.msk.f32.vlgmr.msra.gmra.mrb[70].mxu1 %vm474_vm1, %v10139_v10  ;;  %v8919_v10 = vld [vmem:[%s12695_s13 + $0x1] ss:$0 sm:$0xff] }
0x21b6   :  { %v10146_v13 = vpop.f32.mrb[84].mxu0 }
0x21b7   :  { %v6705_v7 = vpop.f32.mrb[85].mxu0 }
0x21b8   :  { %10152 = vmatprep.mubr.msk.f32.mxu1 %vm474_vm1, %v6705_v7 }
0x21b9   :  { %10153 = vmatmul.mubr.msk.f32.gmra.mrb[72].mxu1 %vm474_vm1, %v10146_v13 }
0x2288   :  { %v10151_v15 = vpop.f32.mrb[70].mxu1 }
0x2289   :  { %v6826_v6 = vadd.f32 %v10151_v15, %v8915_v2  ;;  %v6794_v62 = vpop.f32.mrb[71].mxu1 }
0x228a   :  { %v6825_v17 = vadd.f32 %v8915_v2, %v6794_v62 }
0x228b   :  { %v6830_v23 = vadd.f32 %v6826_v6, %v11869_v0 }
0x228c   :  { %v10154_v24 = vpop.f32.mrb[72].mxu1  ;;  %v6829_v25 = vadd.f32 %v6825_v17, %v11866_v26 }
0x228d   :  { %v6828_v56 = vadd.f32 %v10154_v24, %v8915_v2  ;;  %v6804_v60 = vpop.f32.mrb[73].mxu1  ;;  %v6840_v28 = vsel %vm96_vm0, %v6830_v23, 0.0 }
0x228e   :  { %v6827_v57 = vadd.f32 %v8915_v2, %v6804_v60  ;;  %6841 = vadd.xlane.f32.xlu1 %v6840_v28  ;;  %v6837_v11 = vsel %vm96_vm0, %v6829_v25, 0.0  ;;  %v8930_v60 = vld [vmem:[%s12698_s16 + $0x40] sm:$0xff]  ;;  %v8931_v28 = vld [vmem:[%s12698_s16 + $0x48] sm:$0xff] }
0x228f   :  { %6838 = vadd.xlane.f32.xlu0 %v6837_v11  ;;  %v6832_v31 = vadd.f32 %v6828_v56, %v11881_v30  ;;  %v8932_v11 = vld [vmem:[%s12698_s16 + $0x50] sm:$0xff] }
0x2290   :  { %v6831_v8 = vadd.f32 %v6827_v57, %v11879_v29  ;;  %v10716_v57 = vpack.c.bf16 %v8931_v28, %v8930_v60 }
0x2291   :  { %v6846_v16 = vsel %vm96_vm0, %v6832_v31, 0.0 }
0x2292   :  { %6847 = vadd.xlane.f32.xlu1 %v6846_v16  ;;  %v6843_v0 = vsel %vm96_vm0, %v6831_v8, 0.0  ;;  %10717 = vmatprep.subr.bf16.mxu1 %v10716_v57  ;;  %v8934_v16 = vld [vmem:[%s12698_s16 + $0x60] sm:$0xff] }
0x2293   :  { %6844 = vadd.xlane.f32.xlu0 %v6843_v0  ;;  %10719 = vmatpush3.bf16.msra.mxu1 %v10716_v57  ;;  %v8935_v0 = vld [vmem:[%s12698_s16 + $0x68] sm:$0xff] }
0x231b   :  { %v6842_v26 = vpop.xlane.xlu1 %6841 }
0x231c   :  { %v6850_v4 = vmul.f32 0.03125, %v6842_v26  ;;  %v6839_v21 = vpop.xlane.xlu0 %6838  ;;  %v10724_v26 = vpack.c.bf16 %v8935_v0, %v8934_v16 }
0x231d   :  { %v6849_v5 = vmul.f32 0.03125, %v6839_v21  ;;  %v8937_v21 = vld [vmem:[%s12698_s16 + $0x78] sm:$0xff] }
0x231e   :  { %v6854_v33 = vsub.f32 %v6830_v23, %v6850_v4  ;;  %v8936_v4 = vld [vmem:[%s12698_s16 + $0x70] sm:$0xff] }
0x231f   :  { %v6853_v34 = vsub.f32 %v6829_v25, %v6849_v5  ;;  %v6848_v63 = vpop.xlane.xlu1 %6847  ;;  %v10728_v5 = vpack.c.bf16 %v8937_v21, %v8936_v4 }
0x2320   :  { %v6852_v59 = vmul.f32 0.03125, %v6848_v63  ;;  %v6845_v35 = vpop.xlane.xlu0 %6844  ;;  %v6858_v3 = vmul.f32 %v6854_v33, %v6854_v33 }
0x2321   :  { %v6851_v36 = vmul.f32 0.03125, %v6845_v35  ;;  %v6857_v30 = vmul.f32 %v6853_v34, %v6853_v34 }
0x2322   :  { %v6856_v1 = vsub.f32 %v6832_v31, %v6852_v59  ;;  %v6864_v29 = vsel %vm96_vm0, %v6858_v3, 0.0  ;;  %v8933_v31 = vld [vmem:[%s12698_s16 + $0x58] sm:$0xff] }
0x2323   :  { %v6855_v32 = vsub.f32 %v6831_v8, %v6851_v36  ;;  %6865 = vadd.xlane.f32.xlu1 %v6864_v29  ;;  %v6861_v37 = vsel %vm96_vm0, %v6857_v30, 0.0  ;;  %v10720_v8 = vpack.c.bf16 %v8933_v31, %v8932_v11 }
0x2324   :  { %6862 = vadd.xlane.f32.xlu0 %v6861_v37  ;;  %v6860_v38 = vmul.f32 %v6856_v1, %v6856_v1 }
0x2325   :  { %v6859_v39 = vmul.f32 %v6855_v32, %v6855_v32  ;;  %10721 = vmatprep.subr.bf16.mxu1 %v10720_v8 }
0x2326   :  { %v6870_v54 = vsel %vm96_vm0, %v6860_v38, 0.0  ;;  %10723 = vmatpush3.bf16.msra.mxu1 %v10720_v8 }
0x2327   :  { %6871 = vadd.xlane.f32.xlu1 %v6870_v54  ;;  %v6867_v40 = vsel %vm96_vm0, %v6859_v39, 0.0  ;;  %10725 = vmatprep.subr.bf16.mxu1 %v10724_v26 }
0x2328   :  { %6868 = vadd.xlane.f32.xlu0 %v6867_v40 }
0x232a   :  { %10727 = vmatpush3.bf16.msra.mxu1 %v10724_v26 }
0x232b   :  { %10729 = vmatprep.subr.bf16.mxu1 %v10728_v5 }
0x232e   :  { %10731 = vmatpush3.bf16.msra.mxu1 %v10728_v5 }
0x23b0   :  { %v6866_v43 = vpop.xlane.xlu1 %6865 }
0x23b1   :  { %v6874_v44 = vmul.f32 0.03125, %v6866_v43  ;;  %v6863_v45 = vpop.xlane.xlu0 %6862 }
0x23b2   :  { %v6873_v46 = vmul.f32 0.03125, %v6863_v45 }
0x23b3   :  { %v6878_v47 = vadd.f32 1e-12, %v6874_v44 }
0x23b4   :  { %v6877_v48 = vadd.f32 1e-12, %v6873_v46  ;;  %v6872_v50 = vpop.xlane.xlu1 %6871 }
0x23b5   :  { %10991 = vrsqrt.f32 %v6878_v47  ;;  %v6876_v51 = vmul.f32 0.03125, %v6872_v50  ;;  %v6869_v52 = vpop.xlane.xlu0 %6868 }
0x23b6   :  { %10993 = vrsqrt.f32 %v6877_v48  ;;  %v6875_v53 = vmul.f32 0.03125, %v6869_v52 }
0x23b7   :  { %v6880_v19 = vadd.f32 1e-12, %v6876_v51 }
0x23b8   :  { %v6879_v49 = vadd.f32 1e-12, %v6875_v53 }
0x23b9   :  { %10995 = vrsqrt.f32 %v6880_v19 }
0x23ba   :  { %10997 = vrsqrt.f32 %v6879_v49 }
0x23bf   :  { %v10992_v22 = vpop.eup %10991 }
0x23c0   :  { %v10994_v58 = vpop.eup %10993  ;;  %v6886_v61 = vmul.f32 %v10992_v22, %v6854_v33  ;;  %v8925_v33 = vld [vmem:[%s12697_s15 + $0x1] ss:$0 sm:$0xff] }
0x23c1   :  { %v6885_v12 = vmul.f32 %v10994_v58, %v6853_v34 }
0x23c2   :  { %v6896_v9 = vmul.f32 %v8918_v20, %v6886_v61 }
0x23c3   :  { %v10996_v13 = vpop.eup %10995  ;;  %v6895_v7 = vmul.f32 %v8918_v20, %v6885_v12 }
0x23c4   :  { %v10998_v2 = vpop.eup %10997  ;;  %v6888_v15 = vmul.f32 %v10996_v13, %v6856_v1  ;;  %v12326_v17 = vadd.f32 %v8919_v10, %v6896_v9 }
0x23c5   :  { %v12324_v6 = vadd.f32 %v8919_v10, %v6895_v7  ;;  %v6887_v62 = vmul.f32 %v10998_v2, %v6855_v32 }
0x23c6   :  { %v6898_v23 = vmul.f32 %v8918_v20, %v6888_v15 }
0x23c7   :  { %10163 = vmatprep.mubr.msk.f32.mxu0 %vm96_vm0, %v12324_v6  ;;  %v6897_v24 = vmul.f32 %v8918_v20, %v6887_v62  ;;  %v8939_v62 = vld [vmem:[%s12699_s17 + $0x1] ss:$0 sm:$0xff] }
0x23c8   :  { %10164 = vmatmul.mubr.msk.f32.vlgmr.msra.gmra.mrb[86].mxu0 %vm96_vm0, %v12326_v17  ;;  %v12334_v56 = vadd.f32 %v8919_v10, %v6898_v23 }
0x23c9   :  { %v12332_v25 = vadd.f32 %v8919_v10, %v6897_v24 }
0x23cb   :  { %10166 = vmatprep.mubr.msk.f32.mxu0 %vm96_vm0, %v12332_v25 }
0x23cc   :  { %10167 = vmatmul.mubr.msk.f32.gmra.mrb[88].mxu0 %vm96_vm0, %v12334_v56 }
0x249b   :  { %v10165_v34 = vpop.f32.mrb[86].mxu0 }
0x249c   :  { %v7006_v63 = vadd.f32 %v10165_v34, %v8925_v33  ;;  %v7000_v59 = vpop.f32.mrb[87].mxu0 }
0x249d   :  { %v7001_v35 = vadd.f32 %v8925_v33, %v7000_v59 }
0x249e   :  { %v7024_v3 = vmul.f32 0.044715, %v7006_v63  ;;  %v7020_v22 = vmul.f32 0.5, %v7006_v63 }
0x249f   :  { %v7023_v36 = vmul.f32 0.044715, %v7001_v35  ;;  %v10168_v30 = vpop.f32.mrb[88].mxu0  ;;  %v7019_v19 = vmul.f32 0.5, %v7001_v35 }
0x24a0   :  { %v7028_v1 = vmul.f32 %v7024_v3, %v7006_v63  ;;  %v7016_v29 = vadd.f32 %v10168_v30, %v8925_v33  ;;  %v7010_v32 = vpop.f32.mrb[89].mxu0 }
0x24a1   :  { %v7027_v37 = vmul.f32 %v7023_v36, %v7001_v35  ;;  %v7011_v38 = vadd.f32 %v8925_v33, %v7010_v32 }
0x24a2   :  { %v7032_v39 = vmul.f32 %v7028_v1, %v7006_v63  ;;  %v7026_v54 = vmul.f32 0.044715, %v7016_v29  ;;  %v7022_v7 = vmul.f32 0.5, %v7016_v29 }
0x24a3   :  { %v7031_v40 = vmul.f32 %v7027_v37, %v7001_v35  ;;  %v7025_v14 = vmul.f32 0.044715, %v7011_v38  ;;  %v7021_v9 = vmul.f32 0.5, %v7011_v38 }
0x24a4   :  { %v7036_v55 = vadd.f32 %v7032_v39, %v7006_v63  ;;  %v7030_v27 = vmul.f32 %v7026_v54, %v7016_v29 }
0x24a5   :  { %v7035_v41 = vadd.f32 %v7031_v40, %v7001_v35  ;;  %v7029_v42 = vmul.f32 %v7025_v14, %v7011_v38 }
0x24a6   :  { %v7040_v18 = vmul.f32 0.7978846, %v7036_v55  ;;  %v7034_v43 = vmul.f32 %v7030_v27, %v7016_v29  ;;  %v7249_v27 = vld [vmem:[%s12702_s20] sm:$0xff] }
0x24a7   :  { %v7033_v44 = vmul.f32 %v7029_v42, %v7011_v38  ;;  %v7039_v45 = vmul.f32 0.7978846, %v7035_v41  ;;  %v7250_v41 = vld [vmem:[%s12702_s20 + $0x8] sm:$0xff]  ;;  %v7494_v42 = vld [vmem:[%s12704_s22] sm:$0xff] }
0x24a8   :  { %10999 = vtanh.f32 %v7040_v18  ;;  %v7038_v46 = vadd.f32 %v7034_v43, %v7016_v29  ;;  %v10732_v18 = vpack.c.bf16 %v7250_v41, %v7249_v27  ;;  %v7495_v43 = vld [vmem:[%s12704_s22 + $0x8] sm:$0xff] }
0x24a9   :  { %v7037_v47 = vadd.f32 %v7033_v44, %v7011_v38  ;;  %11001 = vtanh.f32 %v7039_v45  ;;  %v10748_v44 = vpack.c.bf16 %v7495_v43, %v7494_v42  ;;  %v7251_v45 = vld [vmem:[%s12702_s20 + $0x10] sm:$0xff]  ;;  %v8982_v41 = vld [vmem:[%s12708_s26 + $0x8] sm:$0xff]  ;;  %v7987_v42 = vld [vmem:[%s12706_s24] sm:$0xff] }
0x24aa   :  { %v7042_v48 = vmul.f32 0.7978846, %v7038_v46  ;;  %10733 = vmatprep.subr.bf16.mxu0 %v10732_v18  ;;  %v7252_v46 = vld [vmem:[%s12702_s20 + $0x18] sm:$0xff] }
0x24ab   :  { %v7041_v50 = vmul.f32 0.7978846, %v7037_v47  ;;  %10749 = vmatprep.subr.bf16.mxu1 %v10748_v44  ;;  %10735 = vmatpush3.bf16.msra.mxu0 %v10732_v18  ;;  %v7496_v47 = vld [vmem:[%s12704_s22 + $0x10] sm:$0xff]  ;;  %v7988_v18 = vld [vmem:[%s12706_s24 + $0x8] sm:$0xff] }
0x24ac   :  { %11003 = vtanh.f32 %v7042_v48  ;;  %v10736_v48 = vpack.c.bf16 %v7252_v46, %v7251_v45  ;;  %v12547_v43 = vpack.c.bf16 %v7988_v18, %v7987_v42 }
0x24ad   :  { %11005 = vtanh.f32 %v7041_v50  ;;  %v7497_v50 = vld [vmem:[%s12704_s22 + $0x18] sm:$0xff] }
0x24ae   :  { %10737 = vmatprep.subr.bf16.mxu0 %v10736_v48 }
0x24af   :  { %10739 = vmatpush3.bf16.msra.mxu0 %v10736_v48 }
0x24b2   :  { %v11000_v51 = vpop.eup %10999 }
0x24b3   :  { %v11002_v52 = vpop.eup %11001  ;;  %v7048_v53 = vadd.f32 1.0, %v11000_v51  ;;  %v10752_v51 = vpack.c.bf16 %v7497_v50, %v7496_v47 }
0x24b4   :  { %v7047_v49 = vadd.f32 1.0, %v11002_v52  ;;  %v8952_v52 = vld [vmem:[%s12702_s20 + $0x20] sm:$0xff] }
0x24b5   :  { %v7052_v12 = vmul.f32 %v7048_v53, %v7020_v22  ;;  %v8953_v53 = vld [vmem:[%s12702_s20 + $0x28] sm:$0xff] }
0x24b6   :  { %v11004_v20 = vpop.eup %11003  ;;  %v7051_v58 = vmul.f32 %v7047_v49, %v7019_v19  ;;  %v8973_v19 = vld [vmem:[%s12704_s22 + $0x40] sm:$0xff]  ;;  %v10740_v49 = vpack.c.bf16 %v8953_v53, %v8952_v52  ;;  %v8974_v22 = vld [vmem:[%s12704_s22 + $0x48] sm:$0xff] }
0x24b7   :  { %v11006_v61 = vpop.eup %11005  ;;  %v7050_v10 = vadd.f32 1.0, %v11004_v20  ;;  %v10764_v20 = vpack.c.bf16 %v8974_v22, %v8973_v19 }
0x24b8   :  { %10185 = vmatprep.mubr.msk.f32.mxu1 %vm3529_vm4, %v7051_v58  ;;  %v7049_v13 = vadd.f32 1.0, %v11006_v61  ;;  %10741 = vmatprep.subr.bf16.mxu0 %v10740_v49 }
0x24b9   :  { %10186 = vmatmul.mubr.msk.f32.vlgmr.msra.gmra.mrb[90].mxu1 %vm3529_vm4, %v7052_v12  ;;  %v7054_v15 = vmul.f32 %v7050_v10, %v7022_v7 }
0x24ba   :  { %v7053_v2 = vmul.f32 %v7049_v13, %v7021_v9  ;;  %10751 = vmatpush3.bf16.msra.mxu1 %v10748_v44 }
0x24bb   :  { %10753 = vmatprep.subr.bf16.mxu1 %v10752_v51 }
0x24bc   :  { %10188 = vmatprep.mubr.msk.f32.mxu1 %vm3529_vm4, %v7053_v2 }
0x24bd   :  { %10189 = vmatmul.mubr.msk.f32.gmra.mrb[92].mxu1 %vm3529_vm4, %v7054_v15 }
0x24be   :  { %10755 = vmatpush3.bf16.msra.mxu1 %v10752_v51 }
0x24bf   :  { %10765 = vmatprep.subr.bf16.mxu1 %v10764_v20 }
0x258c   :  { %v10187_v23 = vpop.f32.mrb[90].mxu1 }
0x258d   :  { %v7156_v24 = vadd.f32 %v10187_v23, %v8939_v62  ;;  %v7150_v60 = vpop.f32.mrb[91].mxu1 }
0x258e   :  { %v7151_v28 = vadd.f32 %v8939_v62, %v7150_v60 }
0x258f   :  { %v7170_v57 = vadd.f32 %v7156_v24, %v12326_v17 }
0x2590   :  { %v10190_v11 = vpop.f32.mrb[92].mxu1  ;;  %v7169_v31 = vadd.f32 %v7151_v28, %v12324_v6  ;;  %v8946_v28 = vld [vmem:[%s12700_s18 + $0x1] ss:$0 sm:$0xff]  ;;  %s12757_s18 = sld [smem:[#allocation20_spill]] }
0x2591   :  { %v7166_v8 = vadd.f32 %v10190_v11, %v8939_v62  ;;  %v7160_v16 = vpop.f32.mrb[93].mxu1  ;;  %v7180_v0 = vsel %vm96_vm0, %v7170_v57, 0.0 }
0x2592   :  { %v7161_v26 = vadd.f32 %v8939_v62, %v7160_v16  ;;  %7181 = vadd.xlane.f32.xlu1 %v7180_v0  ;;  %v7177_v4 = vsel %vm96_vm0, %v7169_v31, 0.0  ;;  %v8954_v0 = vld [vmem:[%s12702_s20 + $0x30] sm:$0xff] }
0x2593   :  { %v7172_v21 = vadd.f32 %v7166_v8, %v12334_v56  ;;  %7178 = vadd.xlane.f32.xlu0 %v7177_v4  ;;  %v8947_v8 = vld [vmem:[%s12701_s19 + $0x1] ss:$0 sm:$0xff] }
0x2594   :  { %v7171_v5 = vadd.f32 %v7161_v26, %v12332_v25 }
0x2595   :  { %v7186_v33 = vsel %vm96_vm0, %v7172_v21, 0.0 }
0x2596   :  { %7187 = vadd.xlane.f32.xlu1 %v7186_v33  ;;  %v7183_v17 = vsel %vm96_vm0, %v7171_v5, 0.0  ;;  %v8976_v33 = vld [vmem:[%s12704_s22 + $0x58] sm:$0xff] }
0x2597   :  { %7184 = vadd.xlane.f32.xlu0 %v7183_v17 }
0x261f   :  { %v7182_v6 = vpop.xlane.xlu1 %7181 }
0x2620   :  { %v7190_v34 = vmul.f32 0.03125, %v7182_v6  ;;  %v7179_v63 = vpop.xlane.xlu0 %7178 }
0x2621   :  { %v7189_v59 = vmul.f32 0.03125, %v7179_v63 }
0x2622   :  { %v12382_v35 = vsub.f32 %v7170_v57, %v7190_v34 }
0x2623   :  { %v12384_v3 = vsub.f32 %v7169_v31, %v7189_v59  ;;  %v7188_v36 = vpop.xlane.xlu1 %7187 }
0x2624   :  { %v7192_v30 = vmul.f32 0.03125, %v7188_v36  ;;  %v7185_v56 = vpop.xlane.xlu0 %7184  ;;  %v7198_v25 = vmul.f32 %v12382_v35, %v12382_v35 }
0x2625   :  { %v7191_v1 = vmul.f32 0.03125, %v7185_v56  ;;  %v7197_v29 = vmul.f32 %v12384_v3, %v12384_v3  ;;  %v8965_v56 = vld [vmem:[%s12704_s22 + $0x20] sm:$0xff] }
0x2626   :  { %v12390_v32 = vsub.f32 %v7172_v21, %v7192_v30  ;;  %v7204_v37 = vsel %vm96_vm0, %v7198_v25, 0.0  ;;  %v8955_v21 = vld [vmem:[%s12702_s20 + $0x38] sm:$0xff]  ;;  %v8966_v25 = vld [vmem:[%s12704_s22 + $0x28] sm:$0xff] }
0x2627   :  { %v12393_v38 = vsub.f32 %v7171_v5, %v7191_v1  ;;  %7205 = vadd.xlane.f32.xlu1 %v7204_v37  ;;  %v7201_v39 = vsel %vm96_vm0, %v7197_v29, 0.0  ;;  %v8975_v5 = vld [vmem:[%s12704_s22 + $0x50] sm:$0xff] }
0x2628   :  { %7202 = vadd.xlane.f32.xlu0 %v7201_v39  ;;  %v7200_v54 = vmul.f32 %v12390_v32, %v12390_v32  ;;  %v10768_v36 = vpack.c.bf16 %v8976_v33, %v8975_v5  ;;  %v8967_v37 = vld [vmem:[%s12704_s22 + $0x30] sm:$0xff] }
0x2629   :  { %v7199_v40 = vmul.f32 %v12393_v38, %v12393_v38 }
0x262a   :  { %v7210_v14 = vsel %vm96_vm0, %v7200_v54, 0.0  ;;  %v8989_v54 = vld [vmem:[%s12706_s24 + $0x20] sm:$0xff] }
0x262b   :  { %7211 = vadd.xlane.f32.xlu1 %v7210_v14  ;;  %v7207_v55 = vsel %vm96_vm0, %v7199_v40, 0.0  ;;  %v8990_v40 = vld [vmem:[%s12706_s24 + $0x28] sm:$0xff]  ;;  %v11043_v14 = vmov 0.0  }
0x262c   :  { %7208 = vadd.xlane.f32.xlu0 %v7207_v55  ;;  %v7493_v55 = vld [vmem:[%s12708_s26] sm:$0xff]  ;;  %v12530_v27 = vpack.c.bf16 %v8990_v40, %v8989_v54 }
0x26b4   :  { %v7206_v58 = vpop.xlane.xlu1 %7205 }
0x26b5   :  { %v7214_v61 = vmul.f32 0.03125, %v7206_v58  ;;  %v7203_v12 = vpop.xlane.xlu0 %7202 }
0x26b6   :  { %v7213_v10 = vmul.f32 0.03125, %v7203_v12 }
0x26b7   :  { %v7218_v9 = vadd.f32 1e-12, %v7214_v61 }
0x26b8   :  { %v7217_v13 = vadd.f32 1e-12, %v7213_v10  ;;  %v7212_v7 = vpop.xlane.xlu1 %7211 }
0x26b9   :  { %11007 = vrsqrt.f32 %v7218_v9  ;;  %v7216_v2 = vmul.f32 0.03125, %v7212_v7  ;;  %v7209_v15 = vpop.xlane.xlu0 %7208 }
0x26ba   :  { %11009 = vrsqrt.f32 %v7217_v13  ;;  %v7215_v62 = vmul.f32 0.03125, %v7209_v15 }
0x26bb   :  { %v7220_v23 = vadd.f32 1e-12, %v7216_v2 }
0x26bc   :  { %v7219_v24 = vadd.f32 1e-12, %v7215_v62 }
0x26bd   :  { %11011 = vrsqrt.f32 %v7220_v23 }
0x26be   :  { %11013 = vrsqrt.f32 %v7219_v24 }
0x26c3   :  { %v11008_v60 = vpop.eup %11007 }
0x26c4   :  { %v11010_v57 = vpop.eup %11009  ;;  %v7226_v11 = vmul.f32 %v11008_v60, %v12382_v35 }
0x26c5   :  { %v7225_v31 = vmul.f32 %v11010_v57, %v12384_v3  ;;  %v10744_v3 = vpack.c.bf16 %v8955_v21, %v8954_v0 }
0x26c6   :  { %v7236_v16 = vmul.f32 %v8946_v28, %v7226_v11 }
0x26c7   :  { %v11012_v26 = vpop.eup %11011  ;;  %v7235_v4 = vmul.f32 %v8946_v28, %v7225_v31 }
0x26c8   :  { %v11014_v17 = vpop.eup %11013  ;;  %v7228_v6 = vmul.f32 %v11012_v26, %v12390_v32  ;;  %v12462_v59 = vadd.f32 %v8947_v8, %v7236_v16  ;;  %v10756_v32 = vpack.c.bf16 %v8966_v25, %v8965_v56 }
0x26c9   :  { %v12459_v34 = vadd.f32 %v8947_v8, %v7235_v4  ;;  %v7227_v63 = vmul.f32 %v11014_v17, %v12393_v38  ;;  %v8968_v38 = vld [vmem:[%s12704_s22 + $0x38] sm:$0xff] }
0x26ca   :  { %v7238_v35 = vmul.f32 %v8946_v28, %v7228_v6  ;;  %v10760_v39 = vpack.c.bf16 %v8968_v38, %v8967_v37  ;;  %v8981_v38 = vld [vmem:[%s12755_s12] ss:$0 sm:$0xff] }
0x26cb   :  { %v7237_v30 = vmul.f32 %v8946_v28, %v7227_v63  ;;  %10199 = vmatprep.mubr.msk.f32.mxu0 %vm96_vm0, %v12459_v34  ;;  %10227 = vmatprep.mubr.msk.f32.mxu1 %vm96_vm0, %v12459_v34 }
0x26cc   :  { %10200 = vmatmul.mubr.msk.f32.vlgmr.msra.gmra.mrb[90].mxu0 %vm96_vm0, %v12462_v59  ;;  %10228 = vmatmul.mubr.msk.f32.vlgmr.msra.gmra.mrb[94].mxu1 %vm96_vm0, %v12462_v59  ;;  %v12480_v29 = vadd.f32 %v8947_v8, %v7238_v35 }
0x26cd   :  { %v12478_v1 = vadd.f32 %v8947_v8, %v7237_v30  ;;  %10743 = vmatpush3.bf16.msra.mxu0 %v10740_v49  ;;  %10767 = vmatpush3.bf16.msra.mxu1 %v10764_v20  ;;  %v8960_v20 = vld [vmem:[%s12703_s21] ss:$0 sm:$0xff]  ;;  %s12756_s21 = sld [smem:[#allocation19_spill]] }
0x26ce   :  { %10745 = vmatprep.subr.bf16.mxu0 %v10744_v3  ;;  %10769 = vmatprep.subr.bf16.mxu1 %v10768_v36 }
0x26cf   :  { %10202 = vmatprep.mubr.msk.f32.mxu0 %vm96_vm0, %v12478_v1  ;;  %10230 = vmatprep.mubr.msk.f32.mxu1 %vm96_vm0, %v12478_v1 }
0x26d0   :  { %10203 = vmatmul.mubr.msk.f32.gmra.mrb[92].mxu0 %vm96_vm0, %v12480_v29  ;;  %10231 = vmatmul.mubr.msk.f32.gmra.mrb[96].mxu1 %vm96_vm0, %v12480_v29 }
0x26d1   :  { %10747 = vmatpush3.bf16.msra.mxu0 %v10744_v3  ;;  %10213 = vmatprep.mubr.msk.f32.mxu0 %vm96_vm0, %v12459_v34 }
0x26d2   :  { %10771 = vmatpush3.bf16.msra.mxu1 %v10768_v36  ;;  %10255 = vmatprep.mubr.msk.f32.mxu1 %vm96_vm0, %v12459_v34 }
0x26d3   :  { %10757 = vmatprep.subr.bf16.mxu0 %v10756_v32  ;;  %10266 = vmatprep.subr.mxu1 %v11043_v14 }
0x26d4   :  { %10214 = vmatmul.mubr.msk.f32.vlgmr.msra.gmra.mrb[94].mxu0 %vm96_vm0, %v12462_v59 }
0x26d5   :  { %10256 = vmatmul.mubr.msk.f32.vlgmr.msra.gmra.mrb[98].mxu1 %vm96_vm0, %v12462_v59  ;;  %10216 = vmatprep.mubr.msk.f32.mxu0 %vm96_vm0, %v12478_v1 }
0x26d6   :  { %10759 = vmatpush3.bf16.msra.mxu0 %v10756_v32  ;;  %10258 = vmatprep.mubr.msk.f32.mxu1 %vm96_vm0, %v12478_v1 }
0x26d7   :  { %10761 = vmatprep.subr.bf16.mxu0 %v10760_v39  ;;  %10267 = vmatpush3.msra.mxu1 %v7493_v55 }
0x26d8   :  { %10217 = vmatmul.mubr.msk.f32.gmra.mrb[96].mxu0 %vm96_vm0, %v12480_v29  ;;  %10781 = vmatprep.subr.bf16.mxu1 %v12530_v27 }
0x26d9   :  { %10259 = vmatmul.mubr.msk.f32.gmra.mrb[100].mxu1 %vm96_vm0, %v12480_v29  ;;  %10241 = vmatprep.mubr.msk.f32.mxu0 %vm96_vm0, %v12459_v34 }
0x26da   :  { %10763 = vmatpush3.bf16.msra.mxu0 %v10760_v39  ;;  %10268 = vmatprep.mubr.msk.f32.mxu1 %vm11044_vm5, %v11043_v14 }
0x26db   :  { %10261 = vmatprep.subr.mxu0 %v11043_v14 }
0x26dd   :  { %10242 = vmatmul.mubr.msk.f32.vlgmr.msra.gmra.mrb[98].mxu0 %vm96_vm0, %v12462_v59 }
0x26de   :  { %10244 = vmatprep.mubr.msk.f32.mxu0 %vm96_vm0, %v12478_v1  ;;  %10262 = vmatpush3.msra.mxu0 %v8982_v41 }
0x26df   :  { %10773 = vmatprep.subr.bf16.mxu0 %v12547_v43 }
0x26e1   :  { %10245 = vmatmul.mubr.msk.f32.gmra.mrb[100].mxu0 %vm96_vm0, %v12480_v29 }
0x26e2   :  { %10263 = vmatprep.mubr.msk.f32.mxu0 %vm11044_vm5, %v11043_v14 }
0x279f   :  { %v10201_v44 = vpop.f32.mrb[90].mxu0  ;;  %v10229_v45 = vpop.f32.mrb[94].mxu1 }
0x27a0   :  { %v7331_v46 = vpop.f32.mrb[91].mxu0  ;;  %v7564_v47 = vpop.f32.mrb[95].mxu1 }
0x27a3   :  { %v10204_v48 = vpop.f32.mrb[92].mxu0  ;;  %v10232_v50 = vpop.f32.mrb[96].mxu1 }
0x27a4   :  { %v7341_v51 = vpop.f32.mrb[93].mxu0  ;;  %v12550_v52 = vpop.f32.mrb[97].mxu1 }
0x27a7   :  { %v10215_v53 = vpop.f32.mrb[94].mxu0 }
0x27a8   :  { %v7446_v19 = vrot.slane %v10215_v53, 1  ;;  %v10257_v49 = vpop.f32.mrb[98].mxu1  ;;  %v7421_v22 = vpop.f32.mrb[95].mxu0 }
0x27a9   :  { %v7787_v58 = vrot.slane %v10257_v49, 2  ;;  %v7445_v61 = vrot.slane %v7421_v22, 1  ;;  %v7762_v12 = vpop.f32.mrb[99].mxu1 }
0x27aa   :  { %v7456_v10 = vadd.f32 %v10201_v44, %v7446_v19  ;;  %v7786_v9 = vrot.slane %v7762_v12, 2 }
0x27ab   :  { %v7447_v13 = vsel %vm7444_vm6, %v7445_v61, %v7446_v19  ;;  %v10218_v7 = vpop.f32.mrb[96].mxu0 }
0x27ac   :  { %v7467_v2 = vadd.f32 %v8960_v20, %v7456_v10  ;;  %v7455_v15 = vadd.f32 %v7447_v13, %v7331_v46  ;;  %v7788_v62 = vsel %vm7785_vm7, %v7786_v9, %v7787_v58  ;;  %v7449_v23 = vrot.slane %v10218_v7, 1  ;;  %v10260_v24 = vpop.f32.mrb[100].mxu1  ;;  %v7431_v60 = vpop.f32.mrb[97].mxu0 }
0x27ad   :  { %v7790_v28 = vrot.slane %v10260_v24, 2  ;;  %v7448_v57 = vrot.slane %v7431_v60, 1  ;;  %v7772_v11 = vpop.f32.mrb[101].mxu1 }
0x27ae   :  { %v7471_v31 = vmax.f32 %v7467_v2, 0.0  ;;  %v7466_v8 = vadd.f32 %v8960_v20, %v7455_v15  ;;  %v7458_v16 = vadd.f32 %v10204_v48, %v7449_v23  ;;  %v7789_v0 = vrot.slane %v7772_v11, 2 }
0x27af   :  { %v7450_v26 = vsel %vm7444_vm6, %v7448_v57, %v7449_v23 }
0x27b0   :  { %v7470_v4 = vmax.f32 %v7466_v8, 0.0  ;;  %v7469_v21 = vadd.f32 %v8960_v20, %v7458_v16  ;;  %v7457_v5 = vadd.f32 %v7450_v26, %v7341_v51  ;;  %v10243_v33 = vpop.f32.mrb[98].mxu0  ;;  %v7476_v17 = vsel %vm7475_vm8, %v7471_v31, -inf }
0x27b1   :  { %v7791_v6 = vsel %vm7785_vm7, %v7789_v0, %v7790_v28  ;;  %v7678_v63 = vrot.slane %v10243_v33, 1  ;;  %v7654_v35 = vpop.f32.mrb[99].mxu0  ;;  %v8992_v0 = vld [vmem:[%s12706_s24 + $0x38] sm:$0xff] }
0x27b2   :  { %v7474_v3 = vsel %vm474_vm1, %v7470_v4, -inf  ;;  %v7473_v36 = vmax.f32 %v7469_v21, 0.0  ;;  %v7468_v30 = vadd.f32 %v8960_v20, %v7457_v5  ;;  %v7677_v56 = vrot.slane %v7654_v35, 1 }
0x27b3   :  { %v7477_v25 = vmax.f32 %v7474_v3, %v7476_v17  ;;  %v7688_v32 = vadd.f32 %v10229_v45, %v7678_v63 }
0x27b4   :  { %v7472_v37 = vmax.f32 %v7468_v30, 0.0  ;;  %v7679_v39 = vsel %vm7444_vm6, %v7677_v56, %v7678_v63  ;;  %v10246_v54 = vpop.f32.mrb[100].mxu0  ;;  %v7485_v44 = vsel %vm7475_vm8, %v7473_v36, -inf  ;;  %v9005_v36 = vld [vmem:[%s12706_s24 + $0x60] sm:$0xff]  ;;  %v9006_v30 = vld [vmem:[%s12706_s24 + $0x68] sm:$0xff] }
0x27b5   :  { %v7478_v40 = vrot.slane %v7477_v25, 4  ;;  %v7797_v55 = vadd.f32 %v7787_v58, %v7688_v32  ;;  %v7687_v41 = vadd.f32 %v7679_v39, %v7564_v47  ;;  %v7681_v42 = vrot.slane %v10246_v54, 1  ;;  %v7664_v18 = vpop.f32.mrb[101].mxu0  ;;  %v9008_v39 = vld [vmem:[%s12706_s24 + $0x78] sm:$0xff] }
0x27b6   :  { %v7484_v46 = vsel %vm474_vm1, %v7472_v37, -inf  ;;  %v7680_v48 = vrot.slane %v7664_v18, 1  ;;  %v10796_v32 = vpack.c.bf16 %v9006_v30, %v9005_v36 }
0x27b7   :  { %v7479_v51 = vmax.f32 %v7477_v25, %v7478_v40  ;;  %v7486_v45 = vmax.f32 %v7484_v46, %v7485_v44  ;;  %v7808_v53 = vadd.f32 %v8981_v38, %v7797_v55  ;;  %v7796_v19 = vadd.f32 %v7788_v62, %v7687_v41  ;;  %v7989_v41 = vld [vmem:[%s12706_s24 + $0x10] sm:$0xff] }
0x27b8   :  { %v7690_v49 = vadd.f32 %v10232_v50, %v7681_v42  ;;  %v7682_v22 = vsel %vm7444_vm6, %v7680_v48, %v7681_v42  ;;  %v7990_v42 = vld [vmem:[%s12706_s24 + $0x18] sm:$0xff] }
0x27b9   :  { %v7480_v20 = vrot.slane %v7479_v51, 2  ;;  %v7487_v61 = vrot.slane %v7486_v45, 4  ;;  %v7812_v12 = vmax.f32 %v7808_v53, 0.0  ;;  %v7807_v10 = vadd.f32 %v8981_v38, %v7796_v19  ;;  %v8999_v19 = vld [vmem:[%s12706_s24 + $0x50] sm:$0xff] }
0x27ba   :  { %v7799_v47 = vadd.f32 %v7790_v28, %v7690_v49  ;;  %v7689_v58 = vadd.f32 %v7682_v22, %v12550_v52  ;;  %v8991_v52 = vld [vmem:[%s12706_s24 + $0x30] sm:$0xff]  ;;  %v10776_v48 = vpack.c.bf16 %v7990_v42, %v7989_v41  ;;  %v9000_v49 = vld [vmem:[%s12706_s24 + $0x58] sm:$0xff] }
0x27bb   :  { %v7488_v9 = vmax.f32 %v7486_v45, %v7487_v61  ;;  %v7811_v13 = vmax.f32 %v7807_v10, 0.0  ;;  %v7481_v7 = vmax.f32 %v7479_v51, %v7480_v20  ;;  %v7817_v24 = vsel %vm7816_vm9, %v7812_v12, -inf  ;;  %v8997_v51 = vld [vmem:[%s12706_s24 + $0x40] sm:$0xff]  ;;  %v8998_v45 = vld [vmem:[%s12706_s24 + $0x48] sm:$0xff]  ;;  %v9014_v22 = vld [vmem:[%s12708_s26 + $0x10] sm:$0xff] }
0x27bc   :  { %v7810_v2 = vadd.f32 %v8981_v38, %v7799_v47  ;;  %v7798_v15 = vadd.f32 %v7791_v6, %v7689_v58  ;;  %v10784_v6 = vpack.c.bf16 %v8992_v0, %v8991_v52  ;;  %v10788_v53 = vpack.c.bf16 %v8998_v45, %v8997_v51 }
0x27bd   :  { %v7489_v23 = vrot.slane %v7488_v9, 2  ;;  %v7815_v50 = vsel %vm474_vm1, %v7811_v13, -inf  ;;  %v7482_v11 = vrot.slane %v7481_v7, 1 }
0x27be   :  { %v7818_v62 = vmax.f32 %v7815_v50, %v7817_v24  ;;  %v7814_v60 = vmax.f32 %v7810_v2, 0.0  ;;  %v7809_v57 = vadd.f32 %v8981_v38, %v7798_v15  ;;  %v9007_v38 = vld [vmem:[%s12706_s24 + $0x70] sm:$0xff] }
0x27bf   :  { %v7490_v31 = vmax.f32 %v7488_v9, %v7489_v23  ;;  %v7483_v33 = vmax.f32 %v7481_v7, %v7482_v11 }
0x27c0   :  { %v7819_v8 = vrot.slane %v7818_v62, 4  ;;  %v7813_v16 = vmax.f32 %v7809_v57, 0.0  ;;  %v7826_v4 = vsel %vm7816_vm9, %v7814_v60, -inf }
0x27c1   :  { %v7491_v28 = vrot.slane %v7490_v31, 1 }
0x27c2   :  { %v7820_v26 = vmax.f32 %v7818_v62, %v7819_v8  ;;  %v7825_v21 = vsel %vm474_vm1, %v7813_v16, -inf }
0x27c3   :  { %v7827_v5 = vmax.f32 %v7825_v21, %v7826_v4  ;;  %v7492_v17 = vmax.f32 %v7490_v31, %v7491_v28 }
0x27c4   :  { %v7821_v63 = vrot.slane %v7820_v26, 2 }
0x27c5   :  { %v7828_v35 = vrot.slane %v7827_v5, 4  ;;  %v7914_v3 = vsel %vm7838_vm10, %v7492_v17, %v7483_v33 }
0x27c6   :  { %10269 = vmatmul.mubr.msk.f32.vlgmr.msra.gmra.mrb[102].mxu1 %vm474_vm1, %v7914_v3  ;;  %v7822_v25 = vmax.f32 %v7820_v26, %v7821_v63  ;;  %v9013_v3 = vld [vmem:[%s12756_s21] ss:$0 sm:$0xff] }
0x27c7   :  { %v7829_v56 = vmax.f32 %v7827_v5, %v7828_v35  ;;  %10783 = vmatpush3.bf16.msra.mxu1 %v12530_v27  ;;  %10293 = vmatprep.mubr.msk.f32.mxu1 %vm96_vm0, %v12459_v34  ;;  %v10800_v27 = vpack.c.bf16 %v9008_v39, %v9007_v38 }
0x27c8   :  { %10785 = vmatprep.subr.bf16.mxu1 %v10784_v6  ;;  %v7823_v54 = vrot.slane %v7822_v25, 1 }
0x27c9   :  { %v7830_v37 = vrot.slane %v7829_v56, 2 }
0x27ca   :  { %v7824_v18 = vmax.f32 %v7822_v25, %v7823_v54 }
0x27cb   :  { %10787 = vmatpush3.bf16.msra.mxu1 %v10784_v6  ;;  %v7831_v40 = vmax.f32 %v7829_v56, %v7830_v37 }
0x27cc   :  { %10797 = vmatprep.subr.bf16.mxu1 %v10796_v32 }
0x27cd   :  { %v7832_v55 = vrot.slane %v7831_v40, 1 }
0x27ce   :  { %10294 = vmatmul.mubr.msk.f32.vlgmr.msra.gmra.mrb[104].mxu1 %vm96_vm0, %v12462_v59 }
0x27cf   :  { %10296 = vmatprep.mubr.msk.f32.mxu1 %vm96_vm0, %v12478_v1  ;;  %10799 = vmatpush3.bf16.msra.mxu1 %v10796_v32  ;;  %v7833_v44 = vmax.f32 %v7831_v40, %v7832_v55 }
0x27d0   :  { %10801 = vmatprep.subr.bf16.mxu1 %v10800_v27 }
0x27d1   :  { %v7839_v46 = vsel %vm7838_vm10, %v7833_v44, %v7824_v18 }
0x27d2   :  { %10264 = vmatmul.mubr.msk.f32.vlgmr.msra.gmra.mrb[102].mxu0 %vm474_vm1, %v7839_v46  ;;  %10297 = vmatmul.mubr.msk.f32.gmra.mrb[106].mxu1 %vm96_vm0, %v12480_v29 }
0x27d3   :  { %10775 = vmatpush3.bf16.msra.mxu0 %v12547_v43  ;;  %10279 = vmatprep.mubr.msk.f32.mxu0 %vm96_vm0, %v12459_v34  ;;  %v10792_v43 = vpack.c.bf16 %v9000_v49, %v8999_v19 }
0x27d4   :  { %10803 = vmatpush3.bf16.msra.mxu1 %v10800_v27  ;;  %10321 = vmatprep.mubr.msk.f32.mxu1 %vm96_vm0, %v12459_v34 }
0x27d5   :  { %10777 = vmatprep.subr.bf16.mxu0 %v10776_v48 }
0x27d7   :  { %10779 = vmatpush3.bf16.msra.mxu0 %v10776_v48  ;;  %10322 = vmatmul.mubr.msk.f32.vlgmr.msra.gmra.mrb[108].mxu1 %vm96_vm0, %v12462_v59 }
0x27d8   :  { %10324 = vmatprep.mubr.msk.f32.mxu1 %vm96_vm0, %v12478_v1  ;;  %10789 = vmatprep.subr.bf16.mxu0 %v10788_v53 }
0x27da   :  { %10280 = vmatmul.mubr.msk.f32.vlgmr.msra.gmra.mrb[104].mxu0 %vm96_vm0, %v12462_v59 }
0x27db   :  { %10282 = vmatprep.mubr.msk.f32.mxu0 %vm96_vm0, %v12478_v1  ;;  %10791 = vmatpush3.bf16.msra.mxu0 %v10788_v53 }
0x27dc   :  { %10325 = vmatmul.mubr.msk.f32.gmra.mrb[110].mxu1 %vm96_vm0, %v12480_v29  ;;  %10793 = vmatprep.subr.bf16.mxu0 %v10792_v43 }
0x27de   :  { %10283 = vmatmul.mubr.msk.f32.gmra.mrb[106].mxu0 %vm96_vm0, %v12480_v29 }
0x27df   :  { %10795 = vmatpush3.bf16.msra.mxu0 %v10792_v43  ;;  %10307 = vmatprep.mubr.msk.f32.mxu0 %vm96_vm0, %v12459_v34 }
0x27e0   :  { %10327 = vmatprep.subr.mxu0 %v11043_v14 }
0x27e2   :  { %10308 = vmatmul.mubr.msk.f32.vlgmr.msra.gmra.mrb[108].mxu0 %vm96_vm0, %v12462_v59 }
0x27e3   :  { %10310 = vmatprep.mubr.msk.f32.mxu0 %vm96_vm0, %v12478_v1  ;;  %10328 = vmatpush3.msra.mxu0 %v9014_v22 }
0x27e6   :  { %10311 = vmatmul.mubr.msk.f32.gmra.mrb[110].mxu0 %vm96_vm0, %v12480_v29 }
0x27e7   :  { %10329 = vmatprep.mubr.msk.f32.mxu0 %vm11044_vm5, %v11043_v14 }
0x2899   :  { %v7983_v34 = vpop.f32.mrb[102].mxu1 }
0x289a   :  { %v10270_v20 = vpop.f32.mrb[103].mxu1 }
0x28a1   :  { %v10295_v61 = vpop.f32.mrb[104].mxu1 }
0x28a2   :  { %v8171_v12 = vrot.slane %v10295_v61, 1  ;;  %v8147_v10 = vpop.f32.mrb[105].mxu1 }
0x28a3   :  { %v8170_v59 = vrot.slane %v8147_v10, 1 }
0x28a5   :  { %v7908_v47 = vpop.f32.mrb[102].mxu0  ;;  %v10298_v58 = vpop.f32.mrb[106].mxu1  ;;  %v8172_v1 = vsel %vm7444_vm6, %v8170_v59, %v8171_v12 }
0x28a6   :  { %v12654_v9 = vadd.f32 %v7983_v34, %v7908_v47  ;;  %v10265_v29 = vpop.f32.mrb[103].mxu0  ;;  %v8174_v13 = vrot.slane %v10298_v58, 1  ;;  %v8157_v14 = vpop.f32.mrb[107].mxu1 }
0x28a7   :  { %v8173_v7 = vrot.slane %v8157_v14, 1 }
0x28a9   :  { %v8175_v2 = vsel %vm7444_vm6, %v8173_v7, %v8174_v13 }
0x28aa   :  { %v10323_v15 = vpop.f32.mrb[108].mxu1 }
0x28ab   :  { %v8388_v23 = vrot.slane %v10323_v15, 3  ;;  %v8363_v24 = vpop.f32.mrb[109].mxu1 }
0x28ac   :  { %v8387_v50 = vrot.slane %v8363_v24, 3  ;;  %v9016_v24 = vld [vmem:[%s12757_s18] ss:$0 sm:$0xff] }
0x28ad   :  { %v10281_v62 = vpop.f32.mrb[104].mxu0 }
0x28ae   :  { %v8389_v60 = vsel %vm8386_vm11, %v8387_v50, %v8388_v23  ;;  %v8181_v57 = vadd.f32 %v10281_v62, %v8171_v12  ;;  %v8057_v11 = vpop.f32.mrb[105].mxu0 }
0x28af   :  { %v8180_v31 = vadd.f32 %v8172_v1, %v8057_v11  ;;  %v10326_v8 = vpop.f32.mrb[110].mxu1 }
0x28b0   :  { %v8391_v16 = vrot.slane %v10326_v8, 3  ;;  %v8373_v28 = vpop.f32.mrb[111].mxu1 }
0x28b1   :  { %v8390_v52 = vrot.slane %v8373_v28, 3  ;;  %v10284_v0 = vpop.f32.mrb[106].mxu0 }
0x28b2   :  { %v8183_v26 = vadd.f32 %v10284_v0, %v8174_v13  ;;  %v8067_v4 = vpop.f32.mrb[107].mxu0 }
0x28b3   :  { %v8392_v21 = vsel %vm8386_vm11, %v8390_v52, %v8391_v16  ;;  %v8182_v5 = vadd.f32 %v8175_v2, %v8067_v4 }
0x28b5   :  { %v10309_v33 = vpop.f32.mrb[108].mxu0 }
0x28b6   :  { %v8279_v17 = vrot.slane %v10309_v33, 2  ;;  %v8255_v6 = vpop.f32.mrb[109].mxu0 }
0x28b7   :  { %v8278_v63 = vrot.slane %v8255_v6, 2 }
0x28b8   :  { %v8289_v35 = vadd.f32 %v8279_v17, %v8181_v57 }
0x28b9   :  { %v8280_v36 = vsel %vm7785_vm7, %v8278_v63, %v8279_v17  ;;  %v10312_v30 = vpop.f32.mrb[110].mxu0 }
0x28ba   :  { %v8398_v56 = vadd.f32 %v8388_v23, %v8289_v35  ;;  %v8288_v25 = vadd.f32 %v8280_v36, %v8180_v31  ;;  %v8282_v32 = vrot.slane %v10312_v30, 2  ;;  %v8265_v37 = vpop.f32.mrb[111].mxu0 }
0x28bb   :  { %v8281_v38 = vrot.slane %v8265_v37, 2 }
0x28bc   :  { %v8409_v39 = vadd.f32 %v9013_v3, %v8398_v56  ;;  %v8397_v54 = vadd.f32 %v8389_v60, %v8288_v25  ;;  %v8291_v40 = vadd.f32 %v8282_v32, %v8183_v26 }
0x28bd   :  { %v8283_v27 = vsel %vm7785_vm7, %v8281_v38, %v8282_v32 }
0x28be   :  { %v8413_v55 = vmax.f32 %v8409_v39, 0.0  ;;  %v8408_v41 = vadd.f32 %v9013_v3, %v8397_v54  ;;  %v8400_v42 = vadd.f32 %v8391_v16, %v8291_v40  ;;  %v8290_v18 = vadd.f32 %v8283_v27, %v8182_v5 }
0x28c0   :  { %v8412_v44 = vmax.f32 %v8408_v41, 0.0  ;;  %v8411_v46 = vadd.f32 %v9013_v3, %v8400_v42  ;;  %v8399_v48 = vadd.f32 %v8392_v21, %v8290_v18  ;;  %v8418_v51 = vsel %vm8417_vm12, %v8413_v55, -inf }
0x28c2   :  { %v8416_v45 = vsel %vm474_vm1, %v8412_v44, -inf  ;;  %v8415_v53 = vmax.f32 %v8411_v46, 0.0  ;;  %v8410_v19 = vadd.f32 %v9013_v3, %v8399_v48 }
0x28c3   :  { %v8419_v49 = vmax.f32 %v8416_v45, %v8418_v51 }
0x28c4   :  { %v8414_v43 = vmax.f32 %v8410_v19, 0.0  ;;  %v8427_v34 = vsel %vm8417_vm12, %v8415_v53, -inf }
0x28c5   :  { %v8420_v22 = vrot.slane %v8419_v49, 4 }
0x28c6   :  { %v8426_v20 = vsel %vm474_vm1, %v8414_v43, -inf }
0x28c7   :  { %v8421_v61 = vmax.f32 %v8419_v49, %v8420_v22  ;;  %v8428_v12 = vmax.f32 %v8426_v20, %v8427_v34 }
0x28c9   :  { %v8429_v10 = vrot.slane %v8428_v12, 4  ;;  %v8422_v59 = vrot.slane %v8421_v61, 2 }
0x28cb   :  { %v8430_v47 = vmax.f32 %v8428_v12, %v8429_v10  ;;  %v8423_v58 = vmax.f32 %v8421_v61, %v8422_v59 }
0x28cd   :  { %v8431_v1 = vrot.slane %v8430_v47, 2  ;;  %v8424_v29 = vrot.slane %v8423_v58, 1 }
0x28cf   :  { %v8432_v13 = vmax.f32 %v8430_v47, %v8431_v1  ;;  %v8425_v7 = vmax.f32 %v8423_v58, %v8424_v29 }
0x28d1   :  { %v8433_v14 = vrot.slane %v8432_v13, 1 }
0x28d3   :  { %v8434_v2 = vmax.f32 %v8432_v13, %v8433_v14 }
0x28d5   :  { %v8439_v15 = vsel %vm7838_vm10, %v8434_v2, %v8425_v7 }
0x28d6   :  { %10330 = vmatmul.mubr.msk.f32.vlgmr.msra.gmra.mrb[112].mxu0 %vm474_vm1, %v8439_v15 }
0x29a9   :  { %v8508_v23 = vpop.f32.mrb[112].mxu0 }
0x29aa   :  { %v8512_v50 = vadd.f32 %v8508_v23, %v12654_v9  ;;  %v10331_v62 = vpop.f32.mrb[113].mxu0 }
0x29ac   :  { %v8520_v60 = vadd.f32 %v9016_v24, %v8512_v50 }
0x29ae   :  { %8522 = vst.msk [vmem:[#allocation2] sm:$0x3] %vm8521_vm13, %v8520_v60 }
0x29af   :  { %11030 = shalt.err (!%p11027_p4)
}
0x29b0   :  { %s12758_s11 = sld [smem:[#allocation21_spill]] }
0x29b6   :  { %s11031_s8 = scalar_lea.hbm %s12758_s11, 32 }
0x29b7   :  { %p11032_p5 = scmp.ne.s32.totalorder %s12758_s11, %s11031_s8  ;;  %p11035_p6 = scmp.lt.u32.totalorder %s11031_s8, %s12758_s11 }
0x29b9   :  { %p11037_p7 = pnand %p11035_p6, %p11032_p5 }
0x29bb   :  { %11040 = shalt.err (!%p11037_p7)
}
0x29bc   :  { %8532 = dma.vmem_to_hbm [thread:$0]  %s8530_s3, 32, %s12758_s11, [#allocation3]  }
0x29bd   :  { %11041 = dma.done.wait [#allocation3], 32  }
0x29be   :  { %11042 = vsyncadd [#allocation3], 4294967264 }
0x29bf   :  { %8536 = vsyncpa [#allocation3], 1 }

</bundles_post_ra>
